<compile_context>
chip_gen: v7x
topology: tpu7x:2x2x1
jax: 0.10.0
libtpu: 0.0.40
codegen_flags: <defaults>
</compile_context>

<pallas_src>
import math
import functools
import numpy as np
import jax
import jax.numpy as jnp
from jax.experimental import pallas as pl
from jax.experimental.pallas import tpu as pltpu

LN_EPS = 1e-5  # nn.LayerNorm default


def _layer_norm(x, g, b):
    mean = jnp.mean(x, axis=-1, keepdims=True)
    var = jnp.mean((x - mean) ** 2, axis=-1, keepdims=True)
    return (x - mean) * jax.lax.rsqrt(var + LN_EPS) * g + b


# ----------------------------- Pallas kernels ------------------------------

def _attn_block_kernel(*refs, num_heads, causal, use_kpm, is_self):
    """Fused: [QKV proj] -> multi-head attention -> out proj -> +residual -> LN."""
    idx = 0
    xq_ref = refs[idx]; idx += 1
    if is_self:
        xkv_ref = xq_ref
    else:
        xkv_ref = refs[idx]; idx += 1
    kpm_ref = None
    if use_kpm:
        kpm_ref = refs[idx]; idx += 1
    if is_self:
        (wqkv_ref, bqkv_ref, wo_ref, bo_ref,
         g_ref, b_ref, o_ref, attn_ref) = refs[idx:]
    else:
        (wq_ref, bq_ref, wkv_ref, bkv_ref, wo_ref, bo_ref,
         g_ref, b_ref, o_ref, attn_ref) = refs[idx:]

    f32, bf16 = jnp.float32, jnp.bfloat16
    xq = xq_ref[0]                      # (Sq, D) f32
    xkv = xkv_ref[0]                    # (Skv, D) f32
    Sq, D = xq.shape
    Skv = xkv.shape[0]
    Dh = D // num_heads
    scale = 1.0 / math.sqrt(Dh)

    if is_self:
        # fused QKV projection: one (Sq,D)@(D,3D) matmul (bf16 weights already)
        qkv = jnp.dot(xq.astype(bf16), wqkv_ref[...],
                      preferred_element_type=f32) + bqkv_ref[...]   # (Sq, 3D)
        q = qkv[:, :D] * scale          # scale q ONCE, not per-head score matrix
        k = qkv[:, D:2 * D]
        v = qkv[:, 2 * D:]
    else:
        q = (jnp.dot(xq.astype(bf16), wq_ref[...],
                     preferred_element_type=f32) + bq_ref[...]) * scale
        kv = jnp.dot(xkv.astype(bf16), wkv_ref[...],
                     preferred_element_type=f32) + bkv_ref[...]
        k = kv[:, :D]
        v = kv[:, D:]

    # Additive mask, built in-kernel (no O(B*Sq*Skv) HBM array / DMA).
    mask = None
    if use_kpm:
        mask = kpm_ref[0]               # (1, Skv): 0 or -inf, broadcast over rows
    if causal:
        rows = jax.lax.broadcasted_iota(jnp.int32, (Sq, Skv), 0)
        cols = jax.lax.broadcasted_iota(jnp.int32, (Sq, Skv), 1)
        cmask = jnp.where(rows >= cols, jnp.float32(0.0), jnp.float32(-jnp.inf))
        mask = cmask if mask is None else mask + cmask

    # Heads processed with a static unroll; per-head outputs land in one (Sq, D)
    # VMEM buffer (disjoint lane slices) so the output projection is ONE matmul.
    for h in range(num_heads):
        sl = slice(h * Dh, (h + 1) * Dh)
        qh = q[:, sl].astype(bf16)
        kh = k[:, sl].astype(bf16)
        vh = v[:, sl].astype(bf16)
        s = jax.lax.dot_general(qh, kh, (((1,), (1,)), ((), ())),
                                preferred_element_type=f32)          # (Sq, Skv)
        if mask is not None:
            s = s + mask
        # guard fully-masked rows (-inf - -inf = NaN) without changing other rows
        s_max = jnp.maximum(jnp.max(s, axis=-1, keepdims=True), -1e30)
        p = jnp.exp(s - s_max)
        denom = jnp.sum(p, axis=-1, keepdims=True)
        inv = pl.reciprocal(jnp.maximum(denom, 1e-30), approx=True)  # EUP, ~free
        oh = jnp.dot(p.astype(bf16), vh, preferred_element_type=f32)  # (Sq, Dh)
        attn_ref[:, sl] = oh * inv      # normalize AFTER P@V (scales Dh, not Skv)

    # single output projection over all heads
    y = jnp.dot(attn_ref[...].astype(bf16), wo_ref[...],
                preferred_element_type=f32) + bo_ref[...]            # (Sq, D)

    # residual + LayerNorm (f32)
    o_ref[0] = _layer_norm(xq + y, g_ref[...], b_ref[...])


def attn_block(x_q, x_kv, kpm, p, gamma, beta, num_heads, *, causal, is_self):
    """x_q:(B,Sq,D), x_kv:(B,Skv,D), kpm:(B,Skv) additive (-inf / 0) or None."""
    B, Sq, D = x_q.shape
    Skv = x_kv.shape[1]
    use_kpm = kpm is not None

    inputs = [x_q]
    in_specs = [pl.BlockSpec((1, Sq, D), lambda b: (b, 0, 0))]
    if not is_self:
        inputs.append(x_kv)
        in_specs.append(pl.BlockSpec((1, Skv, D), lambda b: (b, 0, 0)))
    if use_kpm:
        inputs.append(kpm.reshape(B, 1, Skv))
        in_specs.append(pl.BlockSpec((1, 1, Skv), lambda b: (b, 0, 0)))
    if is_self:
        inputs += [p["wqkv"], p["bqkv"].reshape(1, 3 * D)]
        in_specs += [pl.BlockSpec((D, 3 * D), lambda b: (0, 0)),
                     pl.BlockSpec((1, 3 * D), lambda b: (0, 0))]
    else:
        # pre-split projections for cross-attention (no in-kernel lane slicing)
        inputs += [p["wq"], p["bq"].reshape(1, D),
                   p["wkv"], p["bkv"].reshape(1, 2 * D)]
        in_specs += [pl.BlockSpec((D, D), lambda b: (0, 0)),
                     pl.BlockSpec((1, D), lambda b: (0, 0)),
                     pl.BlockSpec((D, 2 * D), lambda b: (0, 0)),
                     pl.BlockSpec((1, 2 * D), lambda b: (0, 0))]
    inputs += [p["wo"], p["bo"].reshape(1, D),
               gamma.reshape(1, D), beta.reshape(1, D)]
    in_specs += [pl.BlockSpec((D, D), lambda b: (0, 0)),
                 pl.BlockSpec((1, D), lambda b: (0, 0)),
                 pl.BlockSpec((1, D), lambda b: (0, 0)),
                 pl.BlockSpec((1, D), lambda b: (0, 0))]

    kernel = functools.partial(_attn_block_kernel, num_heads=num_heads,
                               causal=causal, use_kpm=use_kpm, is_self=is_self)
    return pl.pallas_call(
        kernel,
        out_shape=jax.ShapeDtypeStruct((B, Sq, D), jnp.float32),
        grid=(B,),
        in_specs=in_specs,
        out_specs=pl.BlockSpec((1, Sq, D), lambda b: (b, 0, 0)),
        scratch_shapes=[pltpu.VMEM((Sq, D), jnp.float32)],
        compiler_params=pltpu.CompilerParams(dimension_semantics=("parallel",)),
    )(*inputs)


def _ffn_ln_kernel(*refs, extra_ln):
    """Fused FFN: LN(x + relu(x@W1+b1)@W2 + b2), tiled over F; o_ref is the f32
    accumulator (output block resident across the f axis). Optional second LN
    (final encoder norm) fused into the finalize step."""
    if extra_ln:
        (x_ref, w1_ref, b1_ref, w2_ref, b2_ref, g_ref, b_ref,
         g2_ref, beta2_ref, o_ref) = refs
    else:
        x_ref, w1_ref, b1_ref, w2_ref, b2_ref, g_ref, b_ref, o_ref = refs

    f = pl.program_id(1)
    f32, bf16 = jnp.float32, jnp.bfloat16
    x = x_ref[...]                                   # (tm, D) f32

    @pl.when(f == 0)
    def _():
        o_ref[...] = x + b2_ref[...]                 # residual + second bias (once)

    h = jnp.dot(x.astype(bf16), w1_ref[...],
                preferred_element_type=f32) + b1_ref[...]
    h = jnp.maximum(h, 0.0)
    o_ref[...] += jnp.dot(h.astype(bf16), w2_ref[...],
                          preferred_element_type=f32)

    @pl.when(f == pl.num_programs(1) - 1)
    def _():
        r = _layer_norm(o_ref[...], g_ref[...], b_ref[...])
        if extra_ln:
            r = _layer_norm(r, g2_ref[...], beta2_ref[...])
        o_ref[...] = r


def ffn_block(x, w1, b1, w2, b2, gamma, beta, extra=None, *, tf=512,
              token_tile=None):
    """Tokens flattened to M=B*S so weight tiles stream from HBM exactly once.
    token_tile < M re-exposes a 'parallel' grid axis (useful on v7x's 2 TCs) at
    the cost of re-streaming weights per token tile."""
    B, S, D = x.shape
    F = w1.shape[1]
    tf = min(tf, F)
    assert F % tf == 0
    nF = F // tf
    M = B * S
    tm = M if token_tile is None else token_tile
    assert M % tm == 0
    nM = M // tm
    x2 = x.reshape(M, D)
    extra_ln = extra is not None

    inputs = [x2, w1, b1.reshape(1, F), w2, b2.reshape(1, D),
              gamma.reshape(1, D), beta.reshape(1, D)]
    in_specs = [pl.BlockSpec((tm, D), lambda m, f: (m, 0)),
                pl.BlockSpec((D, tf), lambda m, f: (0, f)),
                pl.BlockSpec((1, tf), lambda m, f: (0, f)),
                pl.BlockSpec((tf, D), lambda m, f: (f, 0)),
                pl.BlockSpec((1, D), lambda m, f: (0, 0)),
                pl.BlockSpec((1, D), lambda m, f: (0, 0)),
                pl.BlockSpec((1, D), lambda m, f: (0, 0))]
    if extra_ln:
        g2, beta2 = extra
        inputs += [g2.reshape(1, D), beta2.reshape(1, D)]
        in_specs += [pl.BlockSpec((1, D), lambda m, f: (0, 0)),
                     pl.BlockSpec((1, D), lambda m, f: (0, 0))]

    # explicit VMEM budget (double-buffered bf16 weight tiles + activation blocks),
    # clamped so it is safe on v7x's 64 MiB/TC while >= actual need at small D.
    vmem_bytes = (4 * (D * tf + tf * D) * 2       # w1/w2 tiles, bf16, double-buffered
                  + 4 * tm * D * 4                # x block + resident output (f32)
                  + (2 * F + 8 * D) * 4           # biases / LN params
                  + (2 << 20))                    # headroom
    vmem_limit = max(16 << 20, min(vmem_bytes, 48 << 20))

    out = pl.pallas_call(
        functools.partial(_ffn_ln_kernel, extra_ln=extra_ln),
        out_shape=jax.ShapeDtypeStruct((M, D), jnp.float32),
        grid=(nM, nF),
        in_specs=in_specs,
        out_specs=pl.BlockSpec((tm, D), lambda m, f: (m, 0)),
        compiler_params=pltpu.CompilerParams(
            dimension_semantics=("parallel", "arbitrary"),
            vmem_limit_bytes=vmem_limit),
    )(*inputs)
    return out.reshape(B, S, D)


def _out_logsoftmax_kernel(x_ref, g_ref, b_ref, w_ref, bo_ref, o_ref):
    """Fused final decoder LayerNorm + projection + log_softmax (lane-dense V)."""
    f32, bf16 = jnp.float32, jnp.bfloat16
    x = _layer_norm(x_ref[0], g_ref[...], b_ref[...])            # (S, D) f32
    logits = jnp.dot(x.astype(bf16), w_ref[...],
                     preferred_element_type=f32) + bo_ref[...]   # (S, Vp)
    m = jnp.max(logits, axis=-1, keepdims=True)
    sh = logits - m
    lse = jnp.log(jnp.sum(jnp.exp(sh), axis=-1, keepdims=True))
    o_ref[0] = sh - lse


def out_project_logsoftmax(x, gamma, beta, w, b):
    B, S, D = x.shape
    V = b.shape[0]
    Vp = ((V + 127) // 128) * 128
    if Vp != V:
        # zero weight columns + (-inf) bias -> pad columns contribute 0 to the
        # softmax denominator, so slicing back to V is exact.
        w = jnp.pad(w, ((0, 0), (0, Vp - V)))
        b = jnp.pad(b, (0, Vp - V), constant_values=-jnp.inf)
    out = pl.pallas_call(
        _out_logsoftmax_kernel,
        out_shape=jax.ShapeDtypeStruct((B, S, Vp), jnp.float32),
        grid=(B,),
        in_specs=[pl.BlockSpec((1, S, D), lambda i: (i, 0, 0)),
                  pl.BlockSpec((1, D), lambda i: (0, 0)),
                  pl.BlockSpec((1, D), lambda i: (0, 0)),
                  pl.BlockSpec((D, Vp), lambda i: (0, 0)),
                  pl.BlockSpec((1, Vp), lambda i: (0, 0))],
        out_specs=pl.BlockSpec((1, S, Vp), lambda i: (i, 0, 0)),
        compiler_params=pltpu.CompilerParams(dimension_semantics=("parallel",)),
    )(x, gamma.reshape(1, D), beta.reshape(1, D), w, b.reshape(1, Vp))
    return out[..., :V]


# ----------------------------- model (JAX glue) -----------------------------

def encoder_layer(x, p, src_kpm, num_heads, *, final_norm=None):
    # post-norm (norm_first=False, PyTorch default)
    x = attn_block(x, x, src_kpm, p["self_attn"], p["n1g"], p["n1b"], num_heads,
                   causal=False, is_self=True)
    return ffn_block(x, p["w1"], p["b1"], p["w2"], p["b2"], p["n2g"], p["n2b"],
                     extra=final_norm)


def decoder_layer(x, mem, p, tgt_kpm, num_heads):
    x = attn_block(x, x, tgt_kpm, p["self_attn"], p["n1g"], p["n1b"], num_heads,
                   causal=True, is_self=True)
    # memory_key_padding_mask=None in nn.Transformer.forward -> no mask here.
    x = attn_block(x, mem, None, p["cross_attn"], p["n2g"], p["n2b"], num_heads,
                   causal=False, is_self=False)
    return ffn_block(x, p["w1"], p["b1"], p["w2"], p["b2"], p["n3g"], p["n3b"])


def transformer_forward(params, src_tokens, tgt_tokens, num_heads):
    D = params["embed"].shape[1]
    B, S_src = src_tokens.shape
    S_tgt = tgt_tokens.shape[1]

    def kpm(tokens):  # get_key_padding_mask: -inf where token == 2, else 0 (additive)
        return jnp.where(tokens == 2, -jnp.inf, 0.0).astype(jnp.float32)

    src_kpm = kpm(src_tokens)   # (B, S_src)
    tgt_kpm = kpm(tgt_tokens)   # (B, S_tgt)

    # TODO(synk): embedding gather + positional add stay in XLA (gather has no
    # clean small-shape Pallas equivalent); dropout is identity (eval mode).
    src = jnp.take(params["embed"], src_tokens, axis=0) * math.sqrt(D)
    tgt = jnp.take(params["embed"], tgt_tokens, axis=0) * math.sqrt(D)
    # Reproduces the original module's `x + pm[:, x.size(1)]`: a SINGLE positional
    # row (index = seq_len) broadcast over every position (both slots use sin).
    src = src + params["pm"][S_src]
    tgt = tgt + params["pm"][S_tgt]

    mem = src
    n_enc = len(params["enc_layers"])
    for i, lp in enumerate(params["enc_layers"]):
        # final encoder LayerNorm fused into the last layer's FFN finalize
        final = (params["enc_norm_g"], params["enc_norm_b"]) if i == n_enc - 1 else None
        mem = encoder_layer(mem, lp, src_kpm, num_heads, final_norm=final)

    x = tgt
    for lp in params["dec_layers"]:
        x = decoder_layer(x, mem, lp, tgt_kpm, num_heads)

    # final decoder LayerNorm fused into the output-projection kernel
    return out_project_logsoftmax(x, params["dec_norm_g"], params["dec_norm_b"],
                                  params["out_w"], params["out_b"])


# ----------------------------- parameter init ------------------------------

class _KeyGen:
    def __init__(self, key):
        self._key = key

    def __call__(self):
        self._key, sub = jax.random.split(self._key)
        return sub


def _glorot(key, shape):
    fan_in, fan_out = shape
    lim = math.sqrt(6.0 / (fan_in + fan_out))
    return jax.random.uniform(key, shape, jnp.float32, -lim, lim)


def _glorot_bf16(key, shape):
    return _glorot(key, shape).astype(jnp.bfloat16)   # weights live in HBM as bf16


def _init_attn_self(kg, D):
    # fused QKV weight (D, 3D): one matmul instead of three in the kernel
    return {"wqkv": _glorot_bf16(kg(), (D, 3 * D)),
            "bqkv": jnp.zeros((3 * D,), jnp.float32),
            "wo": _glorot_bf16(kg(), (D, D)),
            "bo": jnp.zeros((D,), jnp.float32)}


def _init_attn_cross(kg, D):
    # q and kv projections pre-split (queries come from tgt, keys/values from memory)
    return {"wq": _glorot_bf16(kg(), (D, D)),
            "bq": jnp.zeros((D,), jnp.float32),
            "wkv": _glorot_bf16(kg(), (D, 2 * D)),
            "bkv": jnp.zeros((2 * D,), jnp.float32),
            "wo": _glorot_bf16(kg(), (D, D)),
            "bo": jnp.zeros((D,), jnp.float32)}


def _init_enc_layer(kg, D, F):
    return {"self_attn": _init_attn_self(kg, D),
            "w1": _glorot_bf16(kg(), (D, F)), "b1": jnp.zeros((F,), jnp.float32),
            "w2": _glorot_bf16(kg(), (F, D)), "b2": jnp.zeros((D,), jnp.float32),
            "n1g": jnp.ones((D,), jnp.float32), "n1b": jnp.zeros((D,), jnp.float32),
            "n2g": jnp.ones((D,), jnp.float32), "n2b": jnp.zeros((D,), jnp.float32)}


def _init_dec_layer(kg, D, F):
    p = _init_enc_layer(kg, D, F)
    p["cross_attn"] = _init_attn_cross(kg, D)
    p["n3g"] = jnp.ones((D,), jnp.float32)
    p["n3b"] = jnp.zeros((D,), jnp.float32)
    return p


def make_pm(max_len, D):
    position = np.arange(max_len, dtype=np.float32)[:, None]
    div_term = np.exp(np.arange(0, D, 2, dtype=np.float32) * -(math.log(10000.0) / D))
    pm = np.zeros((max_len, D), np.float32)
    pm[:, 0::2] = np.sin(position * div_term)
    pm[:, 1::2] = np.sin(position * div_term)   # original module uses sin for both
    return jnp.asarray(pm)


def init_params(key, vocab_size, embed_size, num_layers, dim_feedforward, max_len=5000):
    kg = _KeyGen(key)
    D, F = embed_size, dim_feedforward
    return {
        "embed": jax.random.normal(kg(), (vocab_size, D), jnp.float32),  # nn.Embedding ~ N(0,1)
        "pm": make_pm(max_len, D),
        "enc_layers": [_init_enc_layer(kg, D, F) for _ in range(num_layers)],
        "dec_layers": [_init_dec_layer(kg, D, F) for _ in range(num_layers)],
        "enc_norm_g": jnp.ones((D,), jnp.float32), "enc_norm_b": jnp.zeros((D,), jnp.float32),
        "dec_norm_g": jnp.ones((D,), jnp.float32), "dec_norm_b": jnp.zeros((D,), jnp.float32),
        "out_w": _glorot_bf16(kg(), (D, vocab_size)),
        "out_b": jnp.zeros((vocab_size,), jnp.float32),
    }


# ---------------------------------- main ------------------------------------

if __name__ == "__main__":
    vocab_size, embed_size, num_heads, num_layers = 11, 32, 4, 2
    dim_feedforward = 2048  # nn.Transformer default
    B, S_src, S_tgt = 2, 16, 8

    root = jax.random.PRNGKey(0)
    k_params, k_src, k_tgt = jax.random.split(root, 3)
    params = init_params(k_params, vocab_size, embed_size, num_layers, dim_feedforward)

    # token id 2 is the "padding" id (see get_key_padding_mask)
    src = jax.random.randint(k_src, (B, S_src), 3, vocab_size, dtype=jnp.int32)
    tgt = jax.random.randint(k_tgt, (B, S_tgt), 3, vocab_size, dtype=jnp.int32)
    src = src.at[:, -2:].set(2)
    tgt = tgt.at[:, -1].set(2)

    fwd = jax.jit(functools.partial(transformer_forward, num_heads=num_heads))
    out = fwd(params, src, tgt)
    out = jax.block_until_ready(out)

    assert out.shape == (B, S_tgt, vocab_size), out.shape
    assert bool(jnp.isfinite(out).all())
    print("KERNEL_OK")
</pallas_src>

<mosaic_0001>
module attributes {stable_mosaic.version = 11 : i64} {
  func.func @_ffn_ln_kernel(%arg0: i32, %arg1: i32, %arg2: memref<32x32xf32, #tpu.memory_space<vmem>>, %arg3: memref<32x512xbf16, #tpu.memory_space<vmem>>, %arg4: memref<1x512xf32, #tpu.memory_space<vmem>>, %arg5: memref<512x32xbf16, #tpu.memory_space<vmem>>, %arg6: memref<1x32xf32, #tpu.memory_space<vmem>>, %arg7: memref<1x32xf32, #tpu.memory_space<vmem>>, %arg8: memref<1x32xf32, #tpu.memory_space<vmem>>, %arg9: memref<1x32xf32, #tpu.memory_space<vmem>>, %arg10: memref<1x32xf32, #tpu.memory_space<vmem>>, %arg11: memref<32x32xf32, #tpu.memory_space<vmem>>) attributes {dimension_semantics = [#tpu.dimension_semantics<parallel>, #tpu.dimension_semantics<arbitrary>], iteration_bounds = array<i64: 1, 4>, scalar_prefetch = 0 : i64, scratch_operands = 0 : i64, tpu.core_type = #tpu.core_type<tc>, window_params = [{transform_indices = @transform_0, window_bounds = array<i64: 32, 32>}, {transform_indices = @transform_1, window_bounds = array<i64: 32, 512>}, {transform_indices = @transform_2, window_bounds = array<i64: 1, 512>}, {transform_indices = @transform_3, window_bounds = array<i64: 512, 32>}, {pipeline_mode = #tpu.pipeline_mode<synchronous>, transform_indices = @transform_4, window_bounds = array<i64: 1, 32>}, {pipeline_mode = #tpu.pipeline_mode<synchronous>, transform_indices = @transform_5, window_bounds = array<i64: 1, 32>}, {pipeline_mode = #tpu.pipeline_mode<synchronous>, transform_indices = @transform_6, window_bounds = array<i64: 1, 32>}, {pipeline_mode = #tpu.pipeline_mode<synchronous>, transform_indices = @transform_7, window_bounds = array<i64: 1, 32>}, {pipeline_mode = #tpu.pipeline_mode<synchronous>, transform_indices = @transform_8, window_bounds = array<i64: 1, 32>}, {transform_indices = @transform_9, window_bounds = array<i64: 32, 32>}]} {
    %c0 = arith.constant 0 : index
    %c0_0 = arith.constant 0 : index
    %0 = vector.load %arg2[%c0, %c0_0] : memref<32x32xf32, #tpu.memory_space<vmem>>, vector<32x32xf32>
    %c0_i32 = arith.constant 0 : i32
    %1 = arith.cmpi eq, %arg1, %c0_i32 : i32
    %2 = arith.extui %1 : i1 to i32
    %c0_i32_1 = arith.constant 0 : i32
    %3 = arith.cmpi ne, %2, %c0_i32_1 : i32
    scf.if %3 {
      %c0_15 = arith.constant 0 : index
      %c0_16 = arith.constant 0 : index
      %21 = vector.load %arg6[%c0_15, %c0_16] : memref<1x32xf32, #tpu.memory_space<vmem>>, vector<1x32xf32>
      %22 = vector.broadcast %21 : vector<1x32xf32> to vector<32x32xf32>
      %23 = arith.addf %0, %22 : vector<32x32xf32>
      %c0_17 = arith.constant 0 : index
      %c0_18 = arith.constant 0 : index
      %24 = vector.load %arg11[%c0_17, %c0_18] : memref<32x32xf32, #tpu.memory_space<vmem>>, vector<32x32xf32>
      tpu.vector_store %arg11[%c0_17, %c0_18], %23 {strides = array<i32>} : memref<32x32xf32, #tpu.memory_space<vmem>>, vector<32x32xf32>,
    } else {
    }
    %4 = arith.truncf %0 : vector<32x32xf32> to vector<32x32xbf16>
    %c0_2 = arith.constant 0 : index
    %c0_3 = arith.constant 0 : index
    %5 = vector.load %arg3[%c0_2, %c0_3] : memref<32x512xbf16, #tpu.memory_space<vmem>>, vector<32x512xbf16>
    %cst = arith.constant dense<0.000000e+00> : vector<32x512xf32>
    %6 = tpu.matmul %4, %5, %cst {dimension_numbers = #tpu.dot_dimension_numbers<[1], [0], [0], [1], [0, 0, 1, 1], [], []>} : vector<32x32xbf16>, vector<32x512xbf16>, vector<32x512xf32> -> vector<32x512xf32>
    %c0_4 = arith.constant 0 : index
    %c0_5 = arith.constant 0 : index
    %7 = vector.load %arg4[%c0_4, %c0_5] : memref<1x512xf32, #tpu.memory_space<vmem>>, vector<1x512xf32>
    %8 = vector.broadcast %7 : vector<1x512xf32> to vector<32x512xf32>
    %9 = arith.addf %6, %8 : vector<32x512xf32>
    %cst_6 = arith.constant 0.000000e+00 : f32
    %10 = vector.broadcast %cst_6 : f32 to vector<32x512xf32>
    %11 = arith.maximumf %9, %10 : vector<32x512xf32>
    %c0_7 = arith.constant 0 : index
    %c0_8 = arith.constant 0 : index
    %12 = vector.load %arg11[%c0_7, %c0_8] : memref<32x32xf32, #tpu.memory_space<vmem>>, vector<32x32xf32>
    %13 = arith.truncf %11 : vector<32x512xf32> to vector<32x512xbf16>
    %c0_9 = arith.constant 0 : index
    %c0_10 = arith.constant 0 : index
    %14 = vector.load %arg5[%c0_9, %c0_10] : memref<512x32xbf16, #tpu.memory_space<vmem>>, vector<512x32xbf16>
    %cst_11 = arith.constant dense<0.000000e+00> : vector<32x32xf32>
    %15 = tpu.matmul %13, %14, %cst_11 {dimension_numbers = #tpu.dot_dimension_numbers<[1], [0], [0], [1], [0, 0, 1, 1], [], []>} : vector<32x512xbf16>, vector<512x32xbf16>, vector<32x32xf32> -> vector<32x32xf32>
    %16 = arith.addf %12, %15 : vector<32x32xf32>
    %c0_12 = arith.constant 0 : index
    %c0_13 = arith.constant 0 : index
    %17 = vector.load %arg11[%c0_12, %c0_13] : memref<32x32xf32, #tpu.memory_space<vmem>>, vector<32x32xf32>
    tpu.vector_store %arg11[%c0_12, %c0_13], %16 {strides = array<i32>} : memref<32x32xf32, #tpu.memory_space<vmem>>, vector<32x32xf32>,
    %c3_i32 = arith.constant 3 : i32
    %18 = arith.cmpi eq, %arg1, %c3_i32 : i32
    %19 = arith.extui %18 : i1 to i32
    %c0_i32_14 = arith.constant 0 : i32
    %20 = arith.cmpi ne, %19, %c0_i32_14 : i32
    scf.if %20 {
      %c0_15 = arith.constant 0 : index
      %c0_16 = arith.constant 0 : index
      %21 = vector.load %arg11[%c0_15, %c0_16] : memref<32x32xf32, #tpu.memory_space<vmem>>, vector<32x32xf32>
      %c0_17 = arith.constant 0 : index
      %c0_18 = arith.constant 0 : index
      %22 = vector.load %arg7[%c0_17, %c0_18] : memref<1x32xf32, #tpu.memory_space<vmem>>, vector<1x32xf32>
      %c0_19 = arith.constant 0 : index
      %c0_20 = arith.constant 0 : index
      %23 = vector.load %arg8[%c0_19, %c0_20] : memref<1x32xf32, #tpu.memory_space<vmem>>, vector<1x32xf32>
      %cst_21 = arith.constant dense<0.000000e+00> : vector<32xf32>
      %24 = vector.multi_reduction <add>, %21, %cst_21 [1] : vector<32x32xf32> to vector<32xf32>
      %25 = vector.shape_cast %24 : vector<32xf32> to vector<32x1xf32>
      %cst_22 = arith.constant 3.200000e+01 : f32
      %26 = vector.broadcast %cst_22 : f32 to vector<32x1xf32>
      %27 = arith.divf %25, %26 : vector<32x1xf32>
      %28 = vector.broadcast %27 : vector<32x1xf32> to vector<32x32xf32>
      %29 = arith.subf %21, %28 : vector<32x32xf32>
      %30 = arith.mulf %29, %29 : vector<32x32xf32>
      %cst_23 = arith.constant dense<0.000000e+00> : vector<32xf32>
      %31 = vector.multi_reduction <add>, %30, %cst_23 [1] : vector<32x32xf32> to vector<32xf32>
      %32 = vector.shape_cast %31 : vector<32xf32> to vector<32x1xf32>
      %cst_24 = arith.constant 3.200000e+01 : f32
      %33 = vector.broadcast %cst_24 : f32 to vector<32x1xf32>
      %34 = arith.divf %32, %33 : vector<32x1xf32>
      %35 = vector.broadcast %27 : vector<32x1xf32> to vector<32x32xf32>
      %36 = arith.subf %21, %35 : vector<32x32xf32>
      %cst_25 = arith.constant 9.99999974E-6 : f32
      %37 = vector.broadcast %cst_25 : f32 to vector<32x1xf32>
      %38 = arith.addf %34, %37 : vector<32x1xf32>
      %39 = math.rsqrt %38 : vector<32x1xf32>
      %40 = vector.broadcast %39 : vector<32x1xf32> to vector<32x32xf32>
      %41 = arith.mulf %36, %40 : vector<32x32xf32>
      %42 = vector.broadcast %22 : vector<1x32xf32> to vector<32x32xf32>
      %43 = arith.mulf %41, %42 : vector<32x32xf32>
      %44 = vector.broadcast %23 : vector<1x32xf32> to vector<32x32xf32>
      %45 = arith.addf %43, %44 : vector<32x32xf32>
      %c0_26 = arith.constant 0 : index
      %c0_27 = arith.constant 0 : index
      %46 = vector.load %arg9[%c0_26, %c0_27] : memref<1x32xf32, #tpu.memory_space<vmem>>, vector<1x32xf32>
      %c0_28 = arith.constant 0 : index
      %c0_29 = arith.constant 0 : index
      %47 = vector.load %arg10[%c0_28, %c0_29] : memref<1x32xf32, #tpu.memory_space<vmem>>, vector<1x32xf32>
      %cst_30 = arith.constant dense<0.000000e+00> : vector<32xf32>
      %48 = vector.multi_reduction <add>, %45, %cst_30 [1] : vector<32x32xf32> to vector<32xf32>
      %49 = vector.shape_cast %48 : vector<32xf32> to vector<32x1xf32>
      %cst_31 = arith.constant 3.200000e+01 : f32
      %50 = vector.broadcast %cst_31 : f32 to vector<32x1xf32>
      %51 = arith.divf %49, %50 : vector<32x1xf32>
      %52 = vector.broadcast %51 : vector<32x1xf32> to vector<32x32xf32>
      %53 = arith.subf %45, %52 : vector<32x32xf32>
      %54 = arith.mulf %53, %53 : vector<32x32xf32>
      %cst_32 = arith.constant dense<0.000000e+00> : vector<32xf32>
      %55 = vector.multi_reduction <add>, %54, %cst_32 [1] : vector<32x32xf32> to vector<32xf32>
      %56 = vector.shape_cast %55 : vector<32xf32> to vector<32x1xf32>
      %cst_33 = arith.constant 3.200000e+01 : f32
      %57 = vector.broadcast %cst_33 : f32 to vector<32x1xf32>
      %58 = arith.divf %56, %57 : vector<32x1xf32>
      %59 = vector.broadcast %51 : vector<32x1xf32> to vector<32x32xf32>
      %60 = arith.subf %45, %59 : vector<32x32xf32>
      %cst_34 = arith.constant 9.99999974E-6 : f32
      %61 = vector.broadcast %cst_34 : f32 to vector<32x1xf32>
      %62 = arith.addf %58, %61 : vector<32x1xf32>
      %63 = math.rsqrt %62 : vector<32x1xf32>
      %64 = vector.broadcast %63 : vector<32x1xf32> to vector<32x32xf32>
      %65 = arith.mulf %60, %64 : vector<32x32xf32>
      %66 = vector.broadcast %46 : vector<1x32xf32> to vector<32x32xf32>
      %67 = arith.mulf %65, %66 : vector<32x32xf32>
      %68 = vector.broadcast %47 : vector<1x32xf32> to vector<32x32xf32>
      %69 = arith.addf %67, %68 : vector<32x32xf32>
      %c0_35 = arith.constant 0 : index
      %c0_36 = arith.constant 0 : index
      %70 = vector.load %arg11[%c0_35, %c0_36] : memref<32x32xf32, #tpu.memory_space<vmem>>, vector<32x32xf32>
      tpu.vector_store %arg11[%c0_35, %c0_36], %69 {strides = array<i32>} : memref<32x32xf32, #tpu.memory_space<vmem>>, vector<32x32xf32>,
    } else {
    }
    return
  }
  func.func @transform_0(%arg0: i32, %arg1: i32) -> (i32, i32) {
    %c0_i32 = arith.constant 0 : i32
    %c0_i32_0 = arith.constant 0 : i32
    return %arg0, %c0_i32 : i32, i32
  }
  func.func @transform_1(%arg0: i32, %arg1: i32) -> (i32, i32) {
    %c0_i32 = arith.constant 0 : i32
    %c0_i32_0 = arith.constant 0 : i32
    return %c0_i32, %arg1 : i32, i32
  }
  func.func @transform_2(%arg0: i32, %arg1: i32) -> (i32, i32) {
    %c0_i32 = arith.constant 0 : i32
    %c0_i32_0 = arith.constant 0 : i32
    return %c0_i32, %arg1 : i32, i32
  }
  func.func @transform_3(%arg0: i32, %arg1: i32) -> (i32, i32) {
    %c0_i32 = arith.constant 0 : i32
    %c0_i32_0 = arith.constant 0 : i32
    return %arg1, %c0_i32 : i32, i32
  }
  func.func @transform_4(%arg0: i32, %arg1: i32) -> (i32, i32) {
    %c0_i32 = arith.constant 0 : i32
    %c0_i32_0 = arith.constant 0 : i32
    %c0_i32_1 = arith.constant 0 : i32
    return %c0_i32, %c0_i32_0 : i32, i32
  }
  func.func @transform_5(%arg0: i32, %arg1: i32) -> (i32, i32) {
    %c0_i32 = arith.constant 0 : i32
    %c0_i32_0 = arith.constant 0 : i32
    %c0_i32_1 = arith.constant 0 : i32
    return %c0_i32, %c0_i32_0 : i32, i32
  }
  func.func @transform_6(%arg0: i32, %arg1: i32) -> (i32, i32) {
    %c0_i32 = arith.constant 0 : i32
    %c0_i32_0 = arith.constant 0 : i32
    %c0_i32_1 = arith.constant 0 : i32
    return %c0_i32, %c0_i32_0 : i32, i32
  }
  func.func @transform_7(%arg0: i32, %arg1: i32) -> (i32, i32) {
    %c0_i32 = arith.constant 0 : i32
    %c0_i32_0 = arith.constant 0 : i32
    %c0_i32_1 = arith.constant 0 : i32
    return %c0_i32, %c0_i32_0 : i32, i32
  }
  func.func @transform_8(%arg0: i32, %arg1: i32) -> (i32, i32) {
    %c0_i32 = arith.constant 0 : i32
    %c0_i32_0 = arith.constant 0 : i32
    %c0_i32_1 = arith.constant 0 : i32
    return %c0_i32, %c0_i32_0 : i32, i32
  }
  func.func @transform_9(%arg0: i32, %arg1: i32) -> (i32, i32) {
    %c0_i32 = arith.constant 0 : i32
    %c0_i32_0 = arith.constant 0 : i32
    return %arg0, %c0_i32 : i32, i32
  }
}

module attributes {stable_mosaic.version = 11 : i64} {
  func.func @_ffn_ln_kernel(%arg0: i32, %arg1: i32, %arg2: memref<32x32xf32, #tpu.memory_space<vmem>>, %arg3: memref<32x512xbf16, #tpu.memory_space<vmem>>, %arg4: memref<1x512xf32, #tpu.memory_space<vmem>>, %arg5: memref<512x32xbf16, #tpu.memory_space<vmem>>, %arg6: memref<1x32xf32, #tpu.memory_space<vmem>>, %arg7: memref<1x32xf32, #tpu.memory_space<vmem>>, %arg8: memref<1x32xf32, #tpu.memory_space<vmem>>, %arg9: memref<32x32xf32, #tpu.memory_space<vmem>>) attributes {dimension_semantics = [#tpu.dimension_semantics<parallel>, #tpu.dimension_semantics<arbitrary>], iteration_bounds = array<i64: 1, 4>, scalar_prefetch = 0 : i64, scratch_operands = 0 : i64, tpu.core_type = #tpu.core_type<tc>, window_params = [{transform_indices = @transform_0, window_bounds = array<i64: 32, 32>}, {transform_indices = @transform_1, window_bounds = array<i64: 32, 512>}, {transform_indices = @transform_2, window_bounds = array<i64: 1, 512>}, {transform_indices = @transform_3, window_bounds = array<i64: 512, 32>}, {pipeline_mode = #tpu.pipeline_mode<synchronous>, transform_indices = @transform_4, window_bounds = array<i64: 1, 32>}, {pipeline_mode = #tpu.pipeline_mode<synchronous>, transform_indices = @transform_5, window_bounds = array<i64: 1, 32>}, {pipeline_mode = #tpu.pipeline_mode<synchronous>, transform_indices = @transform_6, window_bounds = array<i64: 1, 32>}, {transform_indices = @transform_7, window_bounds = array<i64: 32, 32>}]} {
    %c0 = arith.constant 0 : index
    %c0_0 = arith.constant 0 : index
    %0 = vector.load %arg2[%c0, %c0_0] : memref<32x32xf32, #tpu.memory_space<vmem>>, vector<32x32xf32>
    %c0_i32 = arith.constant 0 : i32
    %1 = arith.cmpi eq, %arg1, %c0_i32 : i32
    %2 = arith.extui %1 : i1 to i32
    %c0_i32_1 = arith.constant 0 : i32
    %3 = arith.cmpi ne, %2, %c0_i32_1 : i32
    scf.if %3 {
      %c0_15 = arith.constant 0 : index
      %c0_16 = arith.constant 0 : index
      %21 = vector.load %arg6[%c0_15, %c0_16] : memref<1x32xf32, #tpu.memory_space<vmem>>, vector<1x32xf32>
      %22 = vector.broadcast %21 : vector<1x32xf32> to vector<32x32xf32>
      %23 = arith.addf %0, %22 : vector<32x32xf32>
      %c0_17 = arith.constant 0 : index
      %c0_18 = arith.constant 0 : index
      %24 = vector.load %arg9[%c0_17, %c0_18] : memref<32x32xf32, #tpu.memory_space<vmem>>, vector<32x32xf32>
      tpu.vector_store %arg9[%c0_17, %c0_18], %23 {strides = array<i32>} : memref<32x32xf32, #tpu.memory_space<vmem>>, vector<32x32xf32>,
    } else {
    }
    %4 = arith.truncf %0 : vector<32x32xf32> to vector<32x32xbf16>
    %c0_2 = arith.constant 0 : index
    %c0_3 = arith.constant 0 : index
    %5 = vector.load %arg3[%c0_2, %c0_3] : memref<32x512xbf16, #tpu.memory_space<vmem>>, vector<32x512xbf16>
    %cst = arith.constant dense<0.000000e+00> : vector<32x512xf32>
    %6 = tpu.matmul %4, %5, %cst {dimension_numbers = #tpu.dot_dimension_numbers<[1], [0], [0], [1], [0, 0, 1, 1], [], []>} : vector<32x32xbf16>, vector<32x512xbf16>, vector<32x512xf32> -> vector<32x512xf32>
    %c0_4 = arith.constant 0 : index
    %c0_5 = arith.constant 0 : index
    %7 = vector.load %arg4[%c0_4, %c0_5] : memref<1x512xf32, #tpu.memory_space<vmem>>, vector<1x512xf32>
    %8 = vector.broadcast %7 : vector<1x512xf32> to vector<32x512xf32>
    %9 = arith.addf %6, %8 : vector<32x512xf32>
    %cst_6 = arith.constant 0.000000e+00 : f32
    %10 = vector.broadcast %cst_6 : f32 to vector<32x512xf32>
    %11 = arith.maximumf %9, %10 : vector<32x512xf32>
    %c0_7 = arith.constant 0 : index
    %c0_8 = arith.constant 0 : index
    %12 = vector.load %arg9[%c0_7, %c0_8] : memref<32x32xf32, #tpu.memory_space<vmem>>, vector<32x32xf32>
    %13 = arith.truncf %11 : vector<32x512xf32> to vector<32x512xbf16>
    %c0_9 = arith.constant 0 : index
    %c0_10 = arith.constant 0 : index
    %14 = vector.load %arg5[%c0_9, %c0_10] : memref<512x32xbf16, #tpu.memory_space<vmem>>, vector<512x32xbf16>
    %cst_11 = arith.constant dense<0.000000e+00> : vector<32x32xf32>
    %15 = tpu.matmul %13, %14, %cst_11 {dimension_numbers = #tpu.dot_dimension_numbers<[1], [0], [0], [1], [0, 0, 1, 1], [], []>} : vector<32x512xbf16>, vector<512x32xbf16>, vector<32x32xf32> -> vector<32x32xf32>
    %16 = arith.addf %12, %15 : vector<32x32xf32>
    %c0_12 = arith.constant 0 : index
    %c0_13 = arith.constant 0 : index
    %17 = vector.load %arg9[%c0_12, %c0_13] : memref<32x32xf32, #tpu.memory_space<vmem>>, vector<32x32xf32>
    tpu.vector_store %arg9[%c0_12, %c0_13], %16 {strides = array<i32>} : memref<32x32xf32, #tpu.memory_space<vmem>>, vector<32x32xf32>,
    %c3_i32 = arith.constant 3 : i32
    %18 = arith.cmpi eq, %arg1, %c3_i32 : i32
    %19 = arith.extui %18 : i1 to i32
    %c0_i32_14 = arith.constant 0 : i32
    %20 = arith.cmpi ne, %19, %c0_i32_14 : i32
    scf.if %20 {
      %c0_15 = arith.constant 0 : index
      %c0_16 = arith.constant 0 : index
      %21 = vector.load %arg9[%c0_15, %c0_16] : memref<32x32xf32, #tpu.memory_space<vmem>>, vector<32x32xf32>
      %c0_17 = arith.constant 0 : index
      %c0_18 = arith.constant 0 : index
      %22 = vector.load %arg7[%c0_17, %c0_18] : memref<1x32xf32, #tpu.memory_space<vmem>>, vector<1x32xf32>
      %c0_19 = arith.constant 0 : index
      %c0_20 = arith.constant 0 : index
      %23 = vector.load %arg8[%c0_19, %c0_20] : memref<1x32xf32, #tpu.memory_space<vmem>>, vector<1x32xf32>
      %cst_21 = arith.constant dense<0.000000e+00> : vector<32xf32>
      %24 = vector.multi_reduction <add>, %21, %cst_21 [1] : vector<32x32xf32> to vector<32xf32>
      %25 = vector.shape_cast %24 : vector<32xf32> to vector<32x1xf32>
      %cst_22 = arith.constant 3.200000e+01 : f32
      %26 = vector.broadcast %cst_22 : f32 to vector<32x1xf32>
      %27 = arith.divf %25, %26 : vector<32x1xf32>
      %28 = vector.broadcast %27 : vector<32x1xf32> to vector<32x32xf32>
      %29 = arith.subf %21, %28 : vector<32x32xf32>
      %30 = arith.mulf %29, %29 : vector<32x32xf32>
      %cst_23 = arith.constant dense<0.000000e+00> : vector<32xf32>
      %31 = vector.multi_reduction <add>, %30, %cst_23 [1] : vector<32x32xf32> to vector<32xf32>
      %32 = vector.shape_cast %31 : vector<32xf32> to vector<32x1xf32>
      %cst_24 = arith.constant 3.200000e+01 : f32
      %33 = vector.broadcast %cst_24 : f32 to vector<32x1xf32>
      %34 = arith.divf %32, %33 : vector<32x1xf32>
      %35 = vector.broadcast %27 : vector<32x1xf32> to vector<32x32xf32>
      %36 = arith.subf %21, %35 : vector<32x32xf32>
      %cst_25 = arith.constant 9.99999974E-6 : f32
      %37 = vector.broadcast %cst_25 : f32 to vector<32x1xf32>
      %38 = arith.addf %34, %37 : vector<32x1xf32>
      %39 = math.rsqrt %38 : vector<32x1xf32>
      %40 = vector.broadcast %39 : vector<32x1xf32> to vector<32x32xf32>
      %41 = arith.mulf %36, %40 : vector<32x32xf32>
      %42 = vector.broadcast %22 : vector<1x32xf32> to vector<32x32xf32>
      %43 = arith.mulf %41, %42 : vector<32x32xf32>
      %44 = vector.broadcast %23 : vector<1x32xf32> to vector<32x32xf32>
      %45 = arith.addf %43, %44 : vector<32x32xf32>
      %c0_26 = arith.constant 0 : index
      %c0_27 = arith.constant 0 : index
      %46 = vector.load %arg9[%c0_26, %c0_27] : memref<32x32xf32, #tpu.memory_space<vmem>>, vector<32x32xf32>
      tpu.vector_store %arg9[%c0_26, %c0_27], %45 {strides = array<i32>} : memref<32x32xf32, #tpu.memory_space<vmem>>, vector<32x32xf32>,
    } else {
    }
    return
  }
  func.func @transform_0(%arg0: i32, %arg1: i32) -> (i32, i32) {
    %c0_i32 = arith.constant 0 : i32
    %c0_i32_0 = arith.constant 0 : i32
    return %arg0, %c0_i32 : i32, i32
  }
  func.func @transform_1(%arg0: i32, %arg1: i32) -> (i32, i32) {
    %c0_i32 = arith.constant 0 : i32
    %c0_i32_0 = arith.constant 0 : i32
    return %c0_i32, %arg1 : i32, i32
  }
  func.func @transform_2(%arg0: i32, %arg1: i32) -> (i32, i32) {
    %c0_i32 = arith.constant 0 : i32
    %c0_i32_0 = arith.constant 0 : i32
    return %c0_i32, %arg1 : i32, i32
  }
  func.func @transform_3(%arg0: i32, %arg1: i32) -> (i32, i32) {
    %c0_i32 = arith.constant 0 : i32
    %c0_i32_0 = arith.constant 0 : i32
    return %arg1, %c0_i32 : i32, i32
  }
  func.func @transform_4(%arg0: i32, %arg1: i32) -> (i32, i32) {
    %c0_i32 = arith.constant 0 : i32
    %c0_i32_0 = arith.constant 0 : i32
    %c0_i32_1 = arith.constant 0 : i32
    return %c0_i32, %c0_i32_0 : i32, i32
  }
  func.func @transform_5(%arg0: i32, %arg1: i32) -> (i32, i32) {
    %c0_i32 = arith.constant 0 : i32
    %c0_i32_0 = arith.constant 0 : i32
    %c0_i32_1 = arith.constant 0 : i32
    return %c0_i32, %c0_i32_0 : i32, i32
  }
  func.func @transform_6(%arg0: i32, %arg1: i32) -> (i32, i32) {
    %c0_i32 = arith.constant 0 : i32
    %c0_i32_0 = arith.constant 0 : i32
    %c0_i32_1 = arith.constant 0 : i32
    return %c0_i32, %c0_i32_0 : i32, i32
  }
  func.func @transform_7(%arg0: i32, %arg1: i32) -> (i32, i32) {
    %c0_i32 = arith.constant 0 : i32
    %c0_i32_0 = arith.constant 0 : i32
    return %arg0, %c0_i32 : i32, i32
  }
}

module attributes {stable_mosaic.version = 11 : i64} {
  func.func @_attn_block_kernel(%arg0: i32, %arg1: memref<1x16x32xf32, #tpu.memory_space<vmem>>, %arg2: memref<1x1x16xf32, #tpu.memory_space<vmem>>, %arg3: memref<32x96xbf16, #tpu.memory_space<vmem>>, %arg4: memref<1x96xf32, #tpu.memory_space<vmem>>, %arg5: memref<32x32xbf16, #tpu.memory_space<vmem>>, %arg6: memref<1x32xf32, #tpu.memory_space<vmem>>, %arg7: memref<1x32xf32, #tpu.memory_space<vmem>>, %arg8: memref<1x32xf32, #tpu.memory_space<vmem>>, %arg9: memref<1x16x32xf32, #tpu.memory_space<vmem>>, %arg10: memref<16x32xf32, #tpu.memory_space<vmem>>) attributes {dimension_semantics = [#tpu.dimension_semantics<parallel>], iteration_bounds = array<i64: 2>, scalar_prefetch = 0 : i64, scratch_operands = 1 : i64, tpu.core_type = #tpu.core_type<tc>, window_params = [{transform_indices = @transform_0, window_bounds = array<i64: 1, 16, 32>}, {transform_indices = @transform_1, window_bounds = array<i64: 1, 1, 16>}, {pipeline_mode = #tpu.pipeline_mode<synchronous>, transform_indices = @transform_2, window_bounds = array<i64: 32, 96>}, {pipeline_mode = #tpu.pipeline_mode<synchronous>, transform_indices = @transform_3, window_bounds = array<i64: 1, 96>}, {pipeline_mode = #tpu.pipeline_mode<synchronous>, transform_indices = @transform_4, window_bounds = array<i64: 32, 32>}, {pipeline_mode = #tpu.pipeline_mode<synchronous>, transform_indices = @transform_5, window_bounds = array<i64: 1, 32>}, {pipeline_mode = #tpu.pipeline_mode<synchronous>, transform_indices = @transform_6, window_bounds = array<i64: 1, 32>}, {pipeline_mode = #tpu.pipeline_mode<synchronous>, transform_indices = @transform_7, window_bounds = array<i64: 1, 32>}, {transform_indices = @transform_8, window_bounds = array<i64: 1, 16, 32>}]} {
    %c0 = arith.constant 0 : index
    %c0_0 = arith.constant 0 : index
    %c0_1 = arith.constant 0 : index
    %0 = vector.load %arg1[%c0, %c0_0, %c0_1] : memref<1x16x32xf32, #tpu.memory_space<vmem>>, vector<1x16x32xf32>
    %1 = vector.shape_cast %0 : vector<1x16x32xf32> to vector<16x32xf32>
    %2 = arith.truncf %1 : vector<16x32xf32> to vector<16x32xbf16>
    %c0_2 = arith.constant 0 : index
    %c0_3 = arith.constant 0 : index
    %3 = vector.load %arg3[%c0_2, %c0_3] : memref<32x96xbf16, #tpu.memory_space<vmem>>, vector<32x96xbf16>
    %cst = arith.constant dense<0.000000e+00> : vector<16x96xf32>
    %4 = tpu.matmul %2, %3, %cst {dimension_numbers = #tpu.dot_dimension_numbers<[1], [0], [0], [1], [0, 0, 1, 1], [], []>} : vector<16x32xbf16>, vector<32x96xbf16>, vector<16x96xf32> -> vector<16x96xf32>
    %c0_4 = arith.constant 0 : index
    %c0_5 = arith.constant 0 : index
    %5 = vector.load %arg4[%c0_4, %c0_5] : memref<1x96xf32, #tpu.memory_space<vmem>>, vector<1x96xf32>
    %6 = vector.broadcast %5 : vector<1x96xf32> to vector<16x96xf32>
    %7 = arith.addf %4, %6 : vector<16x96xf32>
    %8 = vector.extract_strided_slice %7 {offsets = [0, 0], sizes = [16, 32], strides = [1, 1]} : vector<16x96xf32> to vector<16x32xf32>
    %cst_6 = arith.constant 0.353553385 : f32
    %9 = vector.broadcast %cst_6 : f32 to vector<16x32xf32>
    %10 = arith.mulf %8, %9 : vector<16x32xf32>
    %11 = vector.extract_strided_slice %7 {offsets = [0, 32], sizes = [16, 32], strides = [1, 1]} : vector<16x96xf32> to vector<16x32xf32>
    %12 = vector.extract_strided_slice %7 {offsets = [0, 64], sizes = [16, 32], strides = [1, 1]} : vector<16x96xf32> to vector<16x32xf32>
    %c0_7 = arith.constant 0 : index
    %c0_8 = arith.constant 0 : index
    %c0_9 = arith.constant 0 : index
    %13 = vector.load %arg2[%c0_7, %c0_8, %c0_9] : memref<1x1x16xf32, #tpu.memory_space<vmem>>, vector<1x1x16xf32>
    %14 = vector.shape_cast %13 : vector<1x1x16xf32> to vector<1x16xf32>
    %15 = vector.extract_strided_slice %10 {offsets = [0, 0], sizes = [16, 8], strides = [1, 1]} : vector<16x32xf32> to vector<16x8xf32>
    %16 = arith.truncf %15 : vector<16x8xf32> to vector<16x8xbf16>
    %17 = vector.extract_strided_slice %11 {offsets = [0, 0], sizes = [16, 8], strides = [1, 1]} : vector<16x32xf32> to vector<16x8xf32>
    %18 = arith.truncf %17 : vector<16x8xf32> to vector<16x8xbf16>
    %19 = vector.extract_strided_slice %12 {offsets = [0, 0], sizes = [16, 8], strides = [1, 1]} : vector<16x32xf32> to vector<16x8xf32>
    %20 = arith.truncf %19 : vector<16x8xf32> to vector<16x8xbf16>
    %cst_10 = arith.constant dense<0.000000e+00> : vector<16x16xf32>
    %21 = tpu.matmul %16, %18, %cst_10 {dimension_numbers = #tpu.dot_dimension_numbers<[1], [1], [0], [0], [0, 0, 1, 0], [], []>} : vector<16x8xbf16>, vector<16x8xbf16>, vector<16x16xf32> -> vector<16x16xf32>
    %22 = vector.broadcast %14 : vector<1x16xf32> to vector<16x16xf32>
    %23 = arith.addf %21, %22 : vector<16x16xf32>
    %cst_11 = arith.constant dense<0xFF800000> : vector<16xf32>
    %24 = vector.multi_reduction <maximumf>, %23, %cst_11 [1] : vector<16x16xf32> to vector<16xf32>
    %25 = vector.shape_cast %24 : vector<16xf32> to vector<16x1xf32>
    %cst_12 = arith.constant -1.000000e+30 : f32
    %26 = vector.broadcast %cst_12 : f32 to vector<16x1xf32>
    %27 = arith.maximumf %25, %26 : vector<16x1xf32>
    %28 = vector.broadcast %27 : vector<16x1xf32> to vector<16x16xf32>
    %29 = arith.subf %23, %28 : vector<16x16xf32>
    %30 = math.exp %29 : vector<16x16xf32>
    %cst_13 = arith.constant dense<0.000000e+00> : vector<16xf32>
    %31 = vector.multi_reduction <add>, %30, %cst_13 [1] : vector<16x16xf32> to vector<16xf32>
    %32 = vector.shape_cast %31 : vector<16xf32> to vector<16x1xf32>
    %cst_14 = arith.constant 1.000000e-30 : f32
    %33 = vector.broadcast %cst_14 : f32 to vector<16x1xf32>
    %34 = arith.maximumf %32, %33 : vector<16x1xf32>
    %35 = tpu.reciprocal %34 {approx = true} : vector<16x1xf32> -> vector<16x1xf32>
    %36 = arith.truncf %30 : vector<16x16xf32> to vector<16x16xbf16>
    %cst_15 = arith.constant dense<0.000000e+00> : vector<16x8xf32>
    %37 = tpu.matmul %36, %20, %cst_15 {dimension_numbers = #tpu.dot_dimension_numbers<[1], [0], [0], [1], [0, 0, 1, 1], [], []>} : vector<16x16xbf16>, vector<16x8xbf16>, vector<16x8xf32> -> vector<16x8xf32>
    %38 = vector.broadcast %35 : vector<16x1xf32> to vector<16x8xf32>
    %39 = arith.mulf %37, %38 : vector<16x8xf32>
    %c0_16 = arith.constant 0 : index
    %c0_17 = arith.constant 0 : index
    %40 = vector.load %arg10[%c0_16, %c0_17] : memref<16x32xf32, #tpu.memory_space<vmem>>, vector<16x8xf32>
    tpu.vector_store %arg10[%c0_16, %c0_17], %39 {strides = array<i32>} : memref<16x32xf32, #tpu.memory_space<vmem>>, vector<16x8xf32>,
    %41 = vector.extract_strided_slice %10 {offsets = [0, 8], sizes = [16, 8], strides = [1, 1]} : vector<16x32xf32> to vector<16x8xf32>
    %42 = arith.truncf %41 : vector<16x8xf32> to vector<16x8xbf16>
    %43 = vector.extract_strided_slice %11 {offsets = [0, 8], sizes = [16, 8], strides = [1, 1]} : vector<16x32xf32> to vector<16x8xf32>
    %44 = arith.truncf %43 : vector<16x8xf32> to vector<16x8xbf16>
    %45 = vector.extract_strided_slice %12 {offsets = [0, 8], sizes = [16, 8], strides = [1, 1]} : vector<16x32xf32> to vector<16x8xf32>
    %46 = arith.truncf %45 : vector<16x8xf32> to vector<16x8xbf16>
    %cst_18 = arith.constant dense<0.000000e+00> : vector<16x16xf32>
    %47 = tpu.matmul %42, %44, %cst_18 {dimension_numbers = #tpu.dot_dimension_numbers<[1], [1], [0], [0], [0, 0, 1, 0], [], []>} : vector<16x8xbf16>, vector<16x8xbf16>, vector<16x16xf32> -> vector<16x16xf32>
    %48 = vector.broadcast %14 : vector<1x16xf32> to vector<16x16xf32>
    %49 = arith.addf %47, %48 : vector<16x16xf32>
    %cst_19 = arith.constant dense<0xFF800000> : vector<16xf32>
    %50 = vector.multi_reduction <maximumf>, %49, %cst_19 [1] : vector<16x16xf32> to vector<16xf32>
    %51 = vector.shape_cast %50 : vector<16xf32> to vector<16x1xf32>
    %cst_20 = arith.constant -1.000000e+30 : f32
    %52 = vector.broadcast %cst_20 : f32 to vector<16x1xf32>
    %53 = arith.maximumf %51, %52 : vector<16x1xf32>
    %54 = vector.broadcast %53 : vector<16x1xf32> to vector<16x16xf32>
    %55 = arith.subf %49, %54 : vector<16x16xf32>
    %56 = math.exp %55 : vector<16x16xf32>
    %cst_21 = arith.constant dense<0.000000e+00> : vector<16xf32>
    %57 = vector.multi_reduction <add>, %56, %cst_21 [1] : vector<16x16xf32> to vector<16xf32>
    %58 = vector.shape_cast %57 : vector<16xf32> to vector<16x1xf32>
    %cst_22 = arith.constant 1.000000e-30 : f32
    %59 = vector.broadcast %cst_22 : f32 to vector<16x1xf32>
    %60 = arith.maximumf %58, %59 : vector<16x1xf32>
    %61 = tpu.reciprocal %60 {approx = true} : vector<16x1xf32> -> vector<16x1xf32>
    %62 = arith.truncf %56 : vector<16x16xf32> to vector<16x16xbf16>
    %cst_23 = arith.constant dense<0.000000e+00> : vector<16x8xf32>
    %63 = tpu.matmul %62, %46, %cst_23 {dimension_numbers = #tpu.dot_dimension_numbers<[1], [0], [0], [1], [0, 0, 1, 1], [], []>} : vector<16x16xbf16>, vector<16x8xbf16>, vector<16x8xf32> -> vector<16x8xf32>
    %64 = vector.broadcast %61 : vector<16x1xf32> to vector<16x8xf32>
    %65 = arith.mulf %63, %64 : vector<16x8xf32>
    %c0_24 = arith.constant 0 : index
    %c8 = arith.constant 8 : index
    %66 = vector.load %arg10[%c0_24, %c8] : memref<16x32xf32, #tpu.memory_space<vmem>>, vector<16x8xf32>
    tpu.vector_store %arg10[%c0_24, %c8], %65 {strides = array<i32>} : memref<16x32xf32, #tpu.memory_space<vmem>>, vector<16x8xf32>,
    %67 = vector.extract_strided_slice %10 {offsets = [0, 16], sizes = [16, 8], strides = [1, 1]} : vector<16x32xf32> to vector<16x8xf32>
    %68 = arith.truncf %67 : vector<16x8xf32> to vector<16x8xbf16>
    %69 = vector.extract_strided_slice %11 {offsets = [0, 16], sizes = [16, 8], strides = [1, 1]} : vector<16x32xf32> to vector<16x8xf32>
    %70 = arith.truncf %69 : vector<16x8xf32> to vector<16x8xbf16>
    %71 = vector.extract_strided_slice %12 {offsets = [0, 16], sizes = [16, 8], strides = [1, 1]} : vector<16x32xf32> to vector<16x8xf32>
    %72 = arith.truncf %71 : vector<16x8xf32> to vector<16x8xbf16>
    %cst_25 = arith.constant dense<0.000000e+00> : vector<16x16xf32>
    %73 = tpu.matmul %68, %70, %cst_25 {dimension_numbers = #tpu.dot_dimension_numbers<[1], [1], [0], [0], [0, 0, 1, 0], [], []>} : vector<16x8xbf16>, vector<16x8xbf16>, vector<16x16xf32> -> vector<16x16xf32>
    %74 = vector.broadcast %14 : vector<1x16xf32> to vector<16x16xf32>
    %75 = arith.addf %73, %74 : vector<16x16xf32>
    %cst_26 = arith.constant dense<0xFF800000> : vector<16xf32>
    %76 = vector.multi_reduction <maximumf>, %75, %cst_26 [1] : vector<16x16xf32> to vector<16xf32>
    %77 = vector.shape_cast %76 : vector<16xf32> to vector<16x1xf32>
    %cst_27 = arith.constant -1.000000e+30 : f32
    %78 = vector.broadcast %cst_27 : f32 to vector<16x1xf32>
    %79 = arith.maximumf %77, %78 : vector<16x1xf32>
    %80 = vector.broadcast %79 : vector<16x1xf32> to vector<16x16xf32>
    %81 = arith.subf %75, %80 : vector<16x16xf32>
    %82 = math.exp %81 : vector<16x16xf32>
    %cst_28 = arith.constant dense<0.000000e+00> : vector<16xf32>
    %83 = vector.multi_reduction <add>, %82, %cst_28 [1] : vector<16x16xf32> to vector<16xf32>
    %84 = vector.shape_cast %83 : vector<16xf32> to vector<16x1xf32>
    %cst_29 = arith.constant 1.000000e-30 : f32
    %85 = vector.broadcast %cst_29 : f32 to vector<16x1xf32>
    %86 = arith.maximumf %84, %85 : vector<16x1xf32>
    %87 = tpu.reciprocal %86 {approx = true} : vector<16x1xf32> -> vector<16x1xf32>
    %88 = arith.truncf %82 : vector<16x16xf32> to vector<16x16xbf16>
    %cst_30 = arith.constant dense<0.000000e+00> : vector<16x8xf32>
    %89 = tpu.matmul %88, %72, %cst_30 {dimension_numbers = #tpu.dot_dimension_numbers<[1], [0], [0], [1], [0, 0, 1, 1], [], []>} : vector<16x16xbf16>, vector<16x8xbf16>, vector<16x8xf32> -> vector<16x8xf32>
    %90 = vector.broadcast %87 : vector<16x1xf32> to vector<16x8xf32>
    %91 = arith.mulf %89, %90 : vector<16x8xf32>
    %c0_31 = arith.constant 0 : index
    %c16 = arith.constant 16 : index
    %92 = vector.load %arg10[%c0_31, %c16] : memref<16x32xf32, #tpu.memory_space<vmem>>, vector<16x8xf32>
    tpu.vector_store %arg10[%c0_31, %c16], %91 {strides = array<i32>} : memref<16x32xf32, #tpu.memory_space<vmem>>, vector<16x8xf32>,
    %93 = vector.extract_strided_slice %10 {offsets = [0, 24], sizes = [16, 8], strides = [1, 1]} : vector<16x32xf32> to vector<16x8xf32>
    %94 = arith.truncf %93 : vector<16x8xf32> to vector<16x8xbf16>
    %95 = vector.extract_strided_slice %11 {offsets = [0, 24], sizes = [16, 8], strides = [1, 1]} : vector<16x32xf32> to vector<16x8xf32>
    %96 = arith.truncf %95 : vector<16x8xf32> to vector<16x8xbf16>
    %97 = vector.extract_strided_slice %12 {offsets = [0, 24], sizes = [16, 8], strides = [1, 1]} : vector<16x32xf32> to vector<16x8xf32>
    %98 = arith.truncf %97 : vector<16x8xf32> to vector<16x8xbf16>
    %cst_32 = arith.constant dense<0.000000e+00> : vector<16x16xf32>
    %99 = tpu.matmul %94, %96, %cst_32 {dimension_numbers = #tpu.dot_dimension_numbers<[1], [1], [0], [0], [0, 0, 1, 0], [], []>} : vector<16x8xbf16>, vector<16x8xbf16>, vector<16x16xf32> -> vector<16x16xf32>
    %100 = vector.broadcast %14 : vector<1x16xf32> to vector<16x16xf32>
    %101 = arith.addf %99, %100 : vector<16x16xf32>
    %cst_33 = arith.constant dense<0xFF800000> : vector<16xf32>
    %102 = vector.multi_reduction <maximumf>, %101, %cst_33 [1] : vector<16x16xf32> to vector<16xf32>
    %103 = vector.shape_cast %102 : vector<16xf32> to vector<16x1xf32>
    %cst_34 = arith.constant -1.000000e+30 : f32
    %104 = vector.broadcast %cst_34 : f32 to vector<16x1xf32>
    %105 = arith.maximumf %103, %104 : vector<16x1xf32>
    %106 = vector.broadcast %105 : vector<16x1xf32> to vector<16x16xf32>
    %107 = arith.subf %101, %106 : vector<16x16xf32>
    %108 = math.exp %107 : vector<16x16xf32>
    %cst_35 = arith.constant dense<0.000000e+00> : vector<16xf32>
    %109 = vector.multi_reduction <add>, %108, %cst_35 [1] : vector<16x16xf32> to vector<16xf32>
    %110 = vector.shape_cast %109 : vector<16xf32> to vector<16x1xf32>
    %cst_36 = arith.constant 1.000000e-30 : f32
    %111 = vector.broadcast %cst_36 : f32 to vector<16x1xf32>
    %112 = arith.maximumf %110, %111 : vector<16x1xf32>
    %113 = tpu.reciprocal %112 {approx = true} : vector<16x1xf32> -> vector<16x1xf32>
    %114 = arith.truncf %108 : vector<16x16xf32> to vector<16x16xbf16>
    %cst_37 = arith.constant dense<0.000000e+00> : vector<16x8xf32>
    %115 = tpu.matmul %114, %98, %cst_37 {dimension_numbers = #tpu.dot_dimension_numbers<[1], [0], [0], [1], [0, 0, 1, 1], [], []>} : vector<16x16xbf16>, vector<16x8xbf16>, vector<16x8xf32> -> vector<16x8xf32>
    %116 = vector.broadcast %113 : vector<16x1xf32> to vector<16x8xf32>
    %117 = arith.mulf %115, %116 : vector<16x8xf32>
    %c0_38 = arith.constant 0 : index
    %c24 = arith.constant 24 : index
    %118 = vector.load %arg10[%c0_38, %c24] : memref<16x32xf32, #tpu.memory_space<vmem>>, vector<16x8xf32>
    tpu.vector_store %arg10[%c0_38, %c24], %117 {strides = array<i32>} : memref<16x32xf32, #tpu.memory_space<vmem>>, vector<16x8xf32>,
    %c0_39 = arith.constant 0 : index
    %c0_40 = arith.constant 0 : index
    %119 = vector.load %arg10[%c0_39, %c0_40] : memref<16x32xf32, #tpu.memory_space<vmem>>, vector<16x32xf32>
    %120 = arith.truncf %119 : vector<16x32xf32> to vector<16x32xbf16>
    %c0_41 = arith.constant 0 : index
    %c0_42 = arith.constant 0 : index
    %121 = vector.load %arg5[%c0_41, %c0_42] : memref<32x32xbf16, #tpu.memory_space<vmem>>, vector<32x32xbf16>
    %cst_43 = arith.constant dense<0.000000e+00> : vector<16x32xf32>
    %122 = tpu.matmul %120, %121, %cst_43 {dimension_numbers = #tpu.dot_dimension_numbers<[1], [0], [0], [1], [0, 0, 1, 1], [], []>} : vector<16x32xbf16>, vector<32x32xbf16>, vector<16x32xf32> -> vector<16x32xf32>
    %c0_44 = arith.constant 0 : index
    %c0_45 = arith.constant 0 : index
    %123 = vector.load %arg6[%c0_44, %c0_45] : memref<1x32xf32, #tpu.memory_space<vmem>>, vector<1x32xf32>
    %124 = vector.broadcast %123 : vector<1x32xf32> to vector<16x32xf32>
    %125 = arith.addf %122, %124 : vector<16x32xf32>
    %126 = arith.addf %1, %125 : vector<16x32xf32>
    %c0_46 = arith.constant 0 : index
    %c0_47 = arith.constant 0 : index
    %127 = vector.load %arg7[%c0_46, %c0_47] : memref<1x32xf32, #tpu.memory_space<vmem>>, vector<1x32xf32>
    %c0_48 = arith.constant 0 : index
    %c0_49 = arith.constant 0 : index
    %128 = vector.load %arg8[%c0_48, %c0_49] : memref<1x32xf32, #tpu.memory_space<vmem>>, vector<1x32xf32>
    %cst_50 = arith.constant dense<0.000000e+00> : vector<16xf32>
    %129 = vector.multi_reduction <add>, %126, %cst_50 [1] : vector<16x32xf32> to vector<16xf32>
    %130 = vector.shape_cast %129 : vector<16xf32> to vector<16x1xf32>
    %cst_51 = arith.constant 3.200000e+01 : f32
    %131 = vector.broadcast %cst_51 : f32 to vector<16x1xf32>
    %132 = arith.divf %130, %131 : vector<16x1xf32>
    %133 = vector.broadcast %132 : vector<16x1xf32> to vector<16x32xf32>
    %134 = arith.subf %126, %133 : vector<16x32xf32>
    %135 = arith.mulf %134, %134 : vector<16x32xf32>
    %cst_52 = arith.constant dense<0.000000e+00> : vector<16xf32>
    %136 = vector.multi_reduction <add>, %135, %cst_52 [1] : vector<16x32xf32> to vector<16xf32>
    %137 = vector.shape_cast %136 : vector<16xf32> to vector<16x1xf32>
    %cst_53 = arith.constant 3.200000e+01 : f32
    %138 = vector.broadcast %cst_53 : f32 to vector<16x1xf32>
    %139 = arith.divf %137, %138 : vector<16x1xf32>
    %140 = vector.broadcast %132 : vector<16x1xf32> to vector<16x32xf32>
    %141 = arith.subf %126, %140 : vector<16x32xf32>
    %cst_54 = arith.constant 9.99999974E-6 : f32
    %142 = vector.broadcast %cst_54 : f32 to vector<16x1xf32>
    %143 = arith.addf %139, %142 : vector<16x1xf32>
    %144 = math.rsqrt %143 : vector<16x1xf32>
    %145 = vector.broadcast %144 : vector<16x1xf32> to vector<16x32xf32>
    %146 = arith.mulf %141, %145 : vector<16x32xf32>
    %147 = vector.broadcast %127 : vector<1x32xf32> to vector<16x32xf32>
    %148 = arith.mulf %146, %147 : vector<16x32xf32>
    %149 = vector.broadcast %128 : vector<1x32xf32> to vector<16x32xf32>
    %150 = arith.addf %148, %149 : vector<16x32xf32>
    %c0_55 = arith.constant 0 : index
    %c0_56 = arith.constant 0 : index
    %c0_57 = arith.constant 0 : index
    %151 = vector.load %arg9[%c0_55, %c0_56, %c0_57] : memref<1x16x32xf32, #tpu.memory_space<vmem>>, vector<1x16x32xf32>
    %152 = vector.shape_cast %151 : vector<1x16x32xf32> to vector<16x32xf32>
    %153 = vector.shape_cast %150 : vector<16x32xf32> to vector<1x16x32xf32>
    tpu.vector_store %arg9[%c0_55, %c0_56, %c0_57], %153 {strides = array<i32>} : memref<1x16x32xf32, #tpu.memory_space<vmem>>, vector<1x16x32xf32>,
    return
  }
  func.func @transform_0(%arg0: i32) -> (i32, i32, i32) {
    %c0_i32 = arith.constant 0 : i32
    %c0_i32_0 = arith.constant 0 : i32
    %c0_i32_1 = arith.constant 0 : i32
    return %arg0, %c0_i32, %c0_i32_0 : i32, i32, i32
  }
  func.func @transform_1(%arg0: i32) -> (i32, i32, i32) {
    %c0_i32 = arith.constant 0 : i32
    %c0_i32_0 = arith.constant 0 : i32
    %c0_i32_1 = arith.constant 0 : i32
    return %arg0, %c0_i32, %c0_i32_0 : i32, i32, i32
  }
  func.func @transform_2(%arg0: i32) -> (i32, i32) {
    %c0_i32 = arith.constant 0 : i32
    %c0_i32_0 = arith.constant 0 : i32
    %c0_i32_1 = arith.constant 0 : i32
    return %c0_i32, %c0_i32_0 : i32, i32
  }
  func.func @transform_3(%arg0: i32) -> (i32, i32) {
    %c0_i32 = arith.constant 0 : i32
    %c0_i32_0 = arith.constant 0 : i32
    %c0_i32_1 = arith.constant 0 : i32
    return %c0_i32, %c0_i32_0 : i32, i32
  }
  func.func @transform_4(%arg0: i32) -> (i32, i32) {
    %c0_i32 = arith.constant 0 : i32
    %c0_i32_0 = arith.constant 0 : i32
    %c0_i32_1 = arith.constant 0 : i32
    return %c0_i32, %c0_i32_0 : i32, i32
  }
  func.func @transform_5(%arg0: i32) -> (i32, i32) {
    %c0_i32 = arith.constant 0 : i32
    %c0_i32_0 = arith.constant 0 : i32
    %c0_i32_1 = arith.constant 0 : i32
    return %c0_i32, %c0_i32_0 : i32, i32
  }
  func.func @transform_6(%arg0: i32) -> (i32, i32) {
    %c0_i32 = arith.constant 0 : i32
    %c0_i32_0 = arith.constant 0 : i32
    %c0_i32_1 = arith.constant 0 : i32
    return %c0_i32, %c0_i32_0 : i32, i32
  }
  func.func @transform_7(%arg0: i32) -> (i32, i32) {
    %c0_i32 = arith.constant 0 : i32
    %c0_i32_0 = arith.constant 0 : i32
    %c0_i32_1 = arith.constant 0 : i32
    return %c0_i32, %c0_i32_0 : i32, i32
  }
  func.func @transform_8(%arg0: i32) -> (i32, i32, i32) {
    %c0_i32 = arith.constant 0 : i32
    %c0_i32_0 = arith.constant 0 : i32
    %c0_i32_1 = arith.constant 0 : i32
    return %arg0, %c0_i32, %c0_i32_0 : i32, i32, i32
  }
}

module attributes {stable_mosaic.version = 11 : i64} {
  func.func @_attn_block_kernel(%arg0: i32, %arg1: memref<1x8x32xf32, #tpu.memory_space<vmem>>, %arg2: memref<1x16x32xf32, #tpu.memory_space<vmem>>, %arg3: memref<32x32xbf16, #tpu.memory_space<vmem>>, %arg4: memref<1x32xf32, #tpu.memory_space<vmem>>, %arg5: memref<32x64xbf16, #tpu.memory_space<vmem>>, %arg6: memref<1x64xf32, #tpu.memory_space<vmem>>, %arg7: memref<32x32xbf16, #tpu.memory_space<vmem>>, %arg8: memref<1x32xf32, #tpu.memory_space<vmem>>, %arg9: memref<1x32xf32, #tpu.memory_space<vmem>>, %arg10: memref<1x32xf32, #tpu.memory_space<vmem>>, %arg11: memref<1x8x32xf32, #tpu.memory_space<vmem>>, %arg12: memref<8x32xf32, #tpu.memory_space<vmem>>) attributes {dimension_semantics = [#tpu.dimension_semantics<parallel>], iteration_bounds = array<i64: 2>, scalar_prefetch = 0 : i64, scratch_operands = 1 : i64, tpu.core_type = #tpu.core_type<tc>, window_params = [{transform_indices = @transform_0, window_bounds = array<i64: 1, 8, 32>}, {transform_indices = @transform_1, window_bounds = array<i64: 1, 16, 32>}, {pipeline_mode = #tpu.pipeline_mode<synchronous>, transform_indices = @transform_2, window_bounds = array<i64: 32, 32>}, {pipeline_mode = #tpu.pipeline_mode<synchronous>, transform_indices = @transform_3, window_bounds = array<i64: 1, 32>}, {pipeline_mode = #tpu.pipeline_mode<synchronous>, transform_indices = @transform_4, window_bounds = array<i64: 32, 64>}, {pipeline_mode = #tpu.pipeline_mode<synchronous>, transform_indices = @transform_5, window_bounds = array<i64: 1, 64>}, {pipeline_mode = #tpu.pipeline_mode<synchronous>, transform_indices = @transform_6, window_bounds = array<i64: 32, 32>}, {pipeline_mode = #tpu.pipeline_mode<synchronous>, transform_indices = @transform_7, window_bounds = array<i64: 1, 32>}, {pipeline_mode = #tpu.pipeline_mode<synchronous>, transform_indices = @transform_8, window_bounds = array<i64: 1, 32>}, {pipeline_mode = #tpu.pipeline_mode<synchronous>, transform_indices = @transform_9, window_bounds = array<i64: 1, 32>}, {transform_indices = @transform_10, window_bounds = array<i64: 1, 8, 32>}]} {
    %c0 = arith.constant 0 : index
    %c0_0 = arith.constant 0 : index
    %c0_1 = arith.constant 0 : index
    %0 = vector.load %arg1[%c0, %c0_0, %c0_1] : memref<1x8x32xf32, #tpu.memory_space<vmem>>, vector<1x8x32xf32>
    %1 = vector.shape_cast %0 : vector<1x8x32xf32> to vector<8x32xf32>
    %c0_2 = arith.constant 0 : index
    %c0_3 = arith.constant 0 : index
    %c0_4 = arith.constant 0 : index
    %2 = vector.load %arg2[%c0_2, %c0_3, %c0_4] : memref<1x16x32xf32, #tpu.memory_space<vmem>>, vector<1x16x32xf32>
    %3 = vector.shape_cast %2 : vector<1x16x32xf32> to vector<16x32xf32>
    %4 = arith.truncf %1 : vector<8x32xf32> to vector<8x32xbf16>
    %c0_5 = arith.constant 0 : index
    %c0_6 = arith.constant 0 : index
    %5 = vector.load %arg3[%c0_5, %c0_6] : memref<32x32xbf16, #tpu.memory_space<vmem>>, vector<32x32xbf16>
    %cst = arith.constant dense<0.000000e+00> : vector<8x32xf32>
    %6 = tpu.matmul %4, %5, %cst {dimension_numbers = #tpu.dot_dimension_numbers<[1], [0], [0], [1], [0, 0, 1, 1], [], []>} : vector<8x32xbf16>, vector<32x32xbf16>, vector<8x32xf32> -> vector<8x32xf32>
    %c0_7 = arith.constant 0 : index
    %c0_8 = arith.constant 0 : index
    %7 = vector.load %arg4[%c0_7, %c0_8] : memref<1x32xf32, #tpu.memory_space<vmem>>, vector<1x32xf32>
    %8 = vector.broadcast %7 : vector<1x32xf32> to vector<8x32xf32>
    %9 = arith.addf %6, %8 : vector<8x32xf32>
    %cst_9 = arith.constant 0.353553385 : f32
    %10 = vector.broadcast %cst_9 : f32 to vector<8x32xf32>
    %11 = arith.mulf %9, %10 : vector<8x32xf32>
    %12 = arith.truncf %3 : vector<16x32xf32> to vector<16x32xbf16>
    %c0_10 = arith.constant 0 : index
    %c0_11 = arith.constant 0 : index
    %13 = vector.load %arg5[%c0_10, %c0_11] : memref<32x64xbf16, #tpu.memory_space<vmem>>, vector<32x64xbf16>
    %cst_12 = arith.constant dense<0.000000e+00> : vector<16x64xf32>
    %14 = tpu.matmul %12, %13, %cst_12 {dimension_numbers = #tpu.dot_dimension_numbers<[1], [0], [0], [1], [0, 0, 1, 1], [], []>} : vector<16x32xbf16>, vector<32x64xbf16>, vector<16x64xf32> -> vector<16x64xf32>
    %c0_13 = arith.constant 0 : index
    %c0_14 = arith.constant 0 : index
    %15 = vector.load %arg6[%c0_13, %c0_14] : memref<1x64xf32, #tpu.memory_space<vmem>>, vector<1x64xf32>
    %16 = vector.broadcast %15 : vector<1x64xf32> to vector<16x64xf32>
    %17 = arith.addf %14, %16 : vector<16x64xf32>
    %18 = vector.extract_strided_slice %17 {offsets = [0, 0], sizes = [16, 32], strides = [1, 1]} : vector<16x64xf32> to vector<16x32xf32>
    %19 = vector.extract_strided_slice %17 {offsets = [0, 32], sizes = [16, 32], strides = [1, 1]} : vector<16x64xf32> to vector<16x32xf32>
    %20 = vector.extract_strided_slice %11 {offsets = [0, 0], sizes = [8, 8], strides = [1, 1]} : vector<8x32xf32> to vector<8x8xf32>
    %21 = arith.truncf %20 : vector<8x8xf32> to vector<8x8xbf16>
    %22 = vector.extract_strided_slice %18 {offsets = [0, 0], sizes = [16, 8], strides = [1, 1]} : vector<16x32xf32> to vector<16x8xf32>
    %23 = arith.truncf %22 : vector<16x8xf32> to vector<16x8xbf16>
    %24 = vector.extract_strided_slice %19 {offsets = [0, 0], sizes = [16, 8], strides = [1, 1]} : vector<16x32xf32> to vector<16x8xf32>
    %25 = arith.truncf %24 : vector<16x8xf32> to vector<16x8xbf16>
    %cst_15 = arith.constant dense<0.000000e+00> : vector<8x16xf32>
    %26 = tpu.matmul %21, %23, %cst_15 {dimension_numbers = #tpu.dot_dimension_numbers<[1], [1], [0], [0], [0, 0, 1, 0], [], []>} : vector<8x8xbf16>, vector<16x8xbf16>, vector<8x16xf32> -> vector<8x16xf32>
    %cst_16 = arith.constant dense<0xFF800000> : vector<8xf32>
    %27 = vector.multi_reduction <maximumf>, %26, %cst_16 [1] : vector<8x16xf32> to vector<8xf32>
    %28 = vector.shape_cast %27 : vector<8xf32> to vector<8x1xf32>
    %cst_17 = arith.constant -1.000000e+30 : f32
    %29 = vector.broadcast %cst_17 : f32 to vector<8x1xf32>
    %30 = arith.maximumf %28, %29 : vector<8x1xf32>
    %31 = vector.broadcast %30 : vector<8x1xf32> to vector<8x16xf32>
    %32 = arith.subf %26, %31 : vector<8x16xf32>
    %33 = math.exp %32 : vector<8x16xf32>
    %cst_18 = arith.constant dense<0.000000e+00> : vector<8xf32>
    %34 = vector.multi_reduction <add>, %33, %cst_18 [1] : vector<8x16xf32> to vector<8xf32>
    %35 = vector.shape_cast %34 : vector<8xf32> to vector<8x1xf32>
    %cst_19 = arith.constant 1.000000e-30 : f32
    %36 = vector.broadcast %cst_19 : f32 to vector<8x1xf32>
    %37 = arith.maximumf %35, %36 : vector<8x1xf32>
    %38 = tpu.reciprocal %37 {approx = true} : vector<8x1xf32> -> vector<8x1xf32>
    %39 = arith.truncf %33 : vector<8x16xf32> to vector<8x16xbf16>
    %cst_20 = arith.constant dense<0.000000e+00> : vector<8x8xf32>
    %40 = tpu.matmul %39, %25, %cst_20 {dimension_numbers = #tpu.dot_dimension_numbers<[1], [0], [0], [1], [0, 0, 1, 1], [], []>} : vector<8x16xbf16>, vector<16x8xbf16>, vector<8x8xf32> -> vector<8x8xf32>
    %41 = vector.broadcast %38 : vector<8x1xf32> to vector<8x8xf32>
    %42 = arith.mulf %40, %41 : vector<8x8xf32>
    %c0_21 = arith.constant 0 : index
    %c0_22 = arith.constant 0 : index
    %43 = vector.load %arg12[%c0_21, %c0_22] : memref<8x32xf32, #tpu.memory_space<vmem>>, vector<8x8xf32>
    tpu.vector_store %arg12[%c0_21, %c0_22], %42 {strides = array<i32>} : memref<8x32xf32, #tpu.memory_space<vmem>>, vector<8x8xf32>,
    %44 = vector.extract_strided_slice %11 {offsets = [0, 8], sizes = [8, 8], strides = [1, 1]} : vector<8x32xf32> to vector<8x8xf32>
    %45 = arith.truncf %44 : vector<8x8xf32> to vector<8x8xbf16>
    %46 = vector.extract_strided_slice %18 {offsets = [0, 8], sizes = [16, 8], strides = [1, 1]} : vector<16x32xf32> to vector<16x8xf32>
    %47 = arith.truncf %46 : vector<16x8xf32> to vector<16x8xbf16>
    %48 = vector.extract_strided_slice %19 {offsets = [0, 8], sizes = [16, 8], strides = [1, 1]} : vector<16x32xf32> to vector<16x8xf32>
    %49 = arith.truncf %48 : vector<16x8xf32> to vector<16x8xbf16>
    %cst_23 = arith.constant dense<0.000000e+00> : vector<8x16xf32>
    %50 = tpu.matmul %45, %47, %cst_23 {dimension_numbers = #tpu.dot_dimension_numbers<[1], [1], [0], [0], [0, 0, 1, 0], [], []>} : vector<8x8xbf16>, vector<16x8xbf16>, vector<8x16xf32> -> vector<8x16xf32>
    %cst_24 = arith.constant dense<0xFF800000> : vector<8xf32>
    %51 = vector.multi_reduction <maximumf>, %50, %cst_24 [1] : vector<8x16xf32> to vector<8xf32>
    %52 = vector.shape_cast %51 : vector<8xf32> to vector<8x1xf32>
    %cst_25 = arith.constant -1.000000e+30 : f32
    %53 = vector.broadcast %cst_25 : f32 to vector<8x1xf32>
    %54 = arith.maximumf %52, %53 : vector<8x1xf32>
    %55 = vector.broadcast %54 : vector<8x1xf32> to vector<8x16xf32>
    %56 = arith.subf %50, %55 : vector<8x16xf32>
    %57 = math.exp %56 : vector<8x16xf32>
    %cst_26 = arith.constant dense<0.000000e+00> : vector<8xf32>
    %58 = vector.multi_reduction <add>, %57, %cst_26 [1] : vector<8x16xf32> to vector<8xf32>
    %59 = vector.shape_cast %58 : vector<8xf32> to vector<8x1xf32>
    %cst_27 = arith.constant 1.000000e-30 : f32
    %60 = vector.broadcast %cst_27 : f32 to vector<8x1xf32>
    %61 = arith.maximumf %59, %60 : vector<8x1xf32>
    %62 = tpu.reciprocal %61 {approx = true} : vector<8x1xf32> -> vector<8x1xf32>
    %63 = arith.truncf %57 : vector<8x16xf32> to vector<8x16xbf16>
    %cst_28 = arith.constant dense<0.000000e+00> : vector<8x8xf32>
    %64 = tpu.matmul %63, %49, %cst_28 {dimension_numbers = #tpu.dot_dimension_numbers<[1], [0], [0], [1], [0, 0, 1, 1], [], []>} : vector<8x16xbf16>, vector<16x8xbf16>, vector<8x8xf32> -> vector<8x8xf32>
    %65 = vector.broadcast %62 : vector<8x1xf32> to vector<8x8xf32>
    %66 = arith.mulf %64, %65 : vector<8x8xf32>
    %c0_29 = arith.constant 0 : index
    %c8 = arith.constant 8 : index
    %67 = vector.load %arg12[%c0_29, %c8] : memref<8x32xf32, #tpu.memory_space<vmem>>, vector<8x8xf32>
    tpu.vector_store %arg12[%c0_29, %c8], %66 {strides = array<i32>} : memref<8x32xf32, #tpu.memory_space<vmem>>, vector<8x8xf32>,
    %68 = vector.extract_strided_slice %11 {offsets = [0, 16], sizes = [8, 8], strides = [1, 1]} : vector<8x32xf32> to vector<8x8xf32>
    %69 = arith.truncf %68 : vector<8x8xf32> to vector<8x8xbf16>
    %70 = vector.extract_strided_slice %18 {offsets = [0, 16], sizes = [16, 8], strides = [1, 1]} : vector<16x32xf32> to vector<16x8xf32>
    %71 = arith.truncf %70 : vector<16x8xf32> to vector<16x8xbf16>
    %72 = vector.extract_strided_slice %19 {offsets = [0, 16], sizes = [16, 8], strides = [1, 1]} : vector<16x32xf32> to vector<16x8xf32>
    %73 = arith.truncf %72 : vector<16x8xf32> to vector<16x8xbf16>
    %cst_30 = arith.constant dense<0.000000e+00> : vector<8x16xf32>
    %74 = tpu.matmul %69, %71, %cst_30 {dimension_numbers = #tpu.dot_dimension_numbers<[1], [1], [0], [0], [0, 0, 1, 0], [], []>} : vector<8x8xbf16>, vector<16x8xbf16>, vector<8x16xf32> -> vector<8x16xf32>
    %cst_31 = arith.constant dense<0xFF800000> : vector<8xf32>
    %75 = vector.multi_reduction <maximumf>, %74, %cst_31 [1] : vector<8x16xf32> to vector<8xf32>
    %76 = vector.shape_cast %75 : vector<8xf32> to vector<8x1xf32>
    %cst_32 = arith.constant -1.000000e+30 : f32
    %77 = vector.broadcast %cst_32 : f32 to vector<8x1xf32>
    %78 = arith.maximumf %76, %77 : vector<8x1xf32>
    %79 = vector.broadcast %78 : vector<8x1xf32> to vector<8x16xf32>
    %80 = arith.subf %74, %79 : vector<8x16xf32>
    %81 = math.exp %80 : vector<8x16xf32>
    %cst_33 = arith.constant dense<0.000000e+00> : vector<8xf32>
    %82 = vector.multi_reduction <add>, %81, %cst_33 [1] : vector<8x16xf32> to vector<8xf32>
    %83 = vector.shape_cast %82 : vector<8xf32> to vector<8x1xf32>
    %cst_34 = arith.constant 1.000000e-30 : f32
    %84 = vector.broadcast %cst_34 : f32 to vector<8x1xf32>
    %85 = arith.maximumf %83, %84 : vector<8x1xf32>
    %86 = tpu.reciprocal %85 {approx = true} : vector<8x1xf32> -> vector<8x1xf32>
    %87 = arith.truncf %81 : vector<8x16xf32> to vector<8x16xbf16>
    %cst_35 = arith.constant dense<0.000000e+00> : vector<8x8xf32>
    %88 = tpu.matmul %87, %73, %cst_35 {dimension_numbers = #tpu.dot_dimension_numbers<[1], [0], [0], [1], [0, 0, 1, 1], [], []>} : vector<8x16xbf16>, vector<16x8xbf16>, vector<8x8xf32> -> vector<8x8xf32>
    %89 = vector.broadcast %86 : vector<8x1xf32> to vector<8x8xf32>
    %90 = arith.mulf %88, %89 : vector<8x8xf32>
    %c0_36 = arith.constant 0 : index
    %c16 = arith.constant 16 : index
    %91 = vector.load %arg12[%c0_36, %c16] : memref<8x32xf32, #tpu.memory_space<vmem>>, vector<8x8xf32>
    tpu.vector_store %arg12[%c0_36, %c16], %90 {strides = array<i32>} : memref<8x32xf32, #tpu.memory_space<vmem>>, vector<8x8xf32>,
    %92 = vector.extract_strided_slice %11 {offsets = [0, 24], sizes = [8, 8], strides = [1, 1]} : vector<8x32xf32> to vector<8x8xf32>
    %93 = arith.truncf %92 : vector<8x8xf32> to vector<8x8xbf16>
    %94 = vector.extract_strided_slice %18 {offsets = [0, 24], sizes = [16, 8], strides = [1, 1]} : vector<16x32xf32> to vector<16x8xf32>
    %95 = arith.truncf %94 : vector<16x8xf32> to vector<16x8xbf16>
    %96 = vector.extract_strided_slice %19 {offsets = [0, 24], sizes = [16, 8], strides = [1, 1]} : vector<16x32xf32> to vector<16x8xf32>
    %97 = arith.truncf %96 : vector<16x8xf32> to vector<16x8xbf16>
    %cst_37 = arith.constant dense<0.000000e+00> : vector<8x16xf32>
    %98 = tpu.matmul %93, %95, %cst_37 {dimension_numbers = #tpu.dot_dimension_numbers<[1], [1], [0], [0], [0, 0, 1, 0], [], []>} : vector<8x8xbf16>, vector<16x8xbf16>, vector<8x16xf32> -> vector<8x16xf32>
    %cst_38 = arith.constant dense<0xFF800000> : vector<8xf32>
    %99 = vector.multi_reduction <maximumf>, %98, %cst_38 [1] : vector<8x16xf32> to vector<8xf32>
    %100 = vector.shape_cast %99 : vector<8xf32> to vector<8x1xf32>
    %cst_39 = arith.constant -1.000000e+30 : f32
    %101 = vector.broadcast %cst_39 : f32 to vector<8x1xf32>
    %102 = arith.maximumf %100, %101 : vector<8x1xf32>
    %103 = vector.broadcast %102 : vector<8x1xf32> to vector<8x16xf32>
    %104 = arith.subf %98, %103 : vector<8x16xf32>
    %105 = math.exp %104 : vector<8x16xf32>
    %cst_40 = arith.constant dense<0.000000e+00> : vector<8xf32>
    %106 = vector.multi_reduction <add>, %105, %cst_40 [1] : vector<8x16xf32> to vector<8xf32>
    %107 = vector.shape_cast %106 : vector<8xf32> to vector<8x1xf32>
    %cst_41 = arith.constant 1.000000e-30 : f32
    %108 = vector.broadcast %cst_41 : f32 to vector<8x1xf32>
    %109 = arith.maximumf %107, %108 : vector<8x1xf32>
    %110 = tpu.reciprocal %109 {approx = true} : vector<8x1xf32> -> vector<8x1xf32>
    %111 = arith.truncf %105 : vector<8x16xf32> to vector<8x16xbf16>
    %cst_42 = arith.constant dense<0.000000e+00> : vector<8x8xf32>
    %112 = tpu.matmul %111, %97, %cst_42 {dimension_numbers = #tpu.dot_dimension_numbers<[1], [0], [0], [1], [0, 0, 1, 1], [], []>} : vector<8x16xbf16>, vector<16x8xbf16>, vector<8x8xf32> -> vector<8x8xf32>
    %113 = vector.broadcast %110 : vector<8x1xf32> to vector<8x8xf32>
    %114 = arith.mulf %112, %113 : vector<8x8xf32>
    %c0_43 = arith.constant 0 : index
    %c24 = arith.constant 24 : index
    %115 = vector.load %arg12[%c0_43, %c24] : memref<8x32xf32, #tpu.memory_space<vmem>>, vector<8x8xf32>
    tpu.vector_store %arg12[%c0_43, %c24], %114 {strides = array<i32>} : memref<8x32xf32, #tpu.memory_space<vmem>>, vector<8x8xf32>,
    %c0_44 = arith.constant 0 : index
    %c0_45 = arith.constant 0 : index
    %116 = vector.load %arg12[%c0_44, %c0_45] : memref<8x32xf32, #tpu.memory_space<vmem>>, vector<8x32xf32>
    %117 = arith.truncf %116 : vector<8x32xf32> to vector<8x32xbf16>
    %c0_46 = arith.constant 0 : index
    %c0_47 = arith.constant 0 : index
    %118 = vector.load %arg7[%c0_46, %c0_47] : memref<32x32xbf16, #tpu.memory_space<vmem>>, vector<32x32xbf16>
    %cst_48 = arith.constant dense<0.000000e+00> : vector<8x32xf32>
    %119 = tpu.matmul %117, %118, %cst_48 {dimension_numbers = #tpu.dot_dimension_numbers<[1], [0], [0], [1], [0, 0, 1, 1], [], []>} : vector<8x32xbf16>, vector<32x32xbf16>, vector<8x32xf32> -> vector<8x32xf32>
    %c0_49 = arith.constant 0 : index
    %c0_50 = arith.constant 0 : index
    %120 = vector.load %arg8[%c0_49, %c0_50] : memref<1x32xf32, #tpu.memory_space<vmem>>, vector<1x32xf32>
    %121 = vector.broadcast %120 : vector<1x32xf32> to vector<8x32xf32>
    %122 = arith.addf %119, %121 : vector<8x32xf32>
    %123 = arith.addf %1, %122 : vector<8x32xf32>
    %c0_51 = arith.constant 0 : index
    %c0_52 = arith.constant 0 : index
    %124 = vector.load %arg9[%c0_51, %c0_52] : memref<1x32xf32, #tpu.memory_space<vmem>>, vector<1x32xf32>
    %c0_53 = arith.constant 0 : index
    %c0_54 = arith.constant 0 : index
    %125 = vector.load %arg10[%c0_53, %c0_54] : memref<1x32xf32, #tpu.memory_space<vmem>>, vector<1x32xf32>
    %cst_55 = arith.constant dense<0.000000e+00> : vector<8xf32>
    %126 = vector.multi_reduction <add>, %123, %cst_55 [1] : vector<8x32xf32> to vector<8xf32>
    %127 = vector.shape_cast %126 : vector<8xf32> to vector<8x1xf32>
    %cst_56 = arith.constant 3.200000e+01 : f32
    %128 = vector.broadcast %cst_56 : f32 to vector<8x1xf32>
    %129 = arith.divf %127, %128 : vector<8x1xf32>
    %130 = vector.broadcast %129 : vector<8x1xf32> to vector<8x32xf32>
    %131 = arith.subf %123, %130 : vector<8x32xf32>
    %132 = arith.mulf %131, %131 : vector<8x32xf32>
    %cst_57 = arith.constant dense<0.000000e+00> : vector<8xf32>
    %133 = vector.multi_reduction <add>, %132, %cst_57 [1] : vector<8x32xf32> to vector<8xf32>
    %134 = vector.shape_cast %133 : vector<8xf32> to vector<8x1xf32>
    %cst_58 = arith.constant 3.200000e+01 : f32
    %135 = vector.broadcast %cst_58 : f32 to vector<8x1xf32>
    %136 = arith.divf %134, %135 : vector<8x1xf32>
    %137 = vector.broadcast %129 : vector<8x1xf32> to vector<8x32xf32>
    %138 = arith.subf %123, %137 : vector<8x32xf32>
    %cst_59 = arith.constant 9.99999974E-6 : f32
    %139 = vector.broadcast %cst_59 : f32 to vector<8x1xf32>
    %140 = arith.addf %136, %139 : vector<8x1xf32>
    %141 = math.rsqrt %140 : vector<8x1xf32>
    %142 = vector.broadcast %141 : vector<8x1xf32> to vector<8x32xf32>
    %143 = arith.mulf %138, %142 : vector<8x32xf32>
    %144 = vector.broadcast %124 : vector<1x32xf32> to vector<8x32xf32>
    %145 = arith.mulf %143, %144 : vector<8x32xf32>
    %146 = vector.broadcast %125 : vector<1x32xf32> to vector<8x32xf32>
    %147 = arith.addf %145, %146 : vector<8x32xf32>
    %c0_60 = arith.constant 0 : index
    %c0_61 = arith.constant 0 : index
    %c0_62 = arith.constant 0 : index
    %148 = vector.load %arg11[%c0_60, %c0_61, %c0_62] : memref<1x8x32xf32, #tpu.memory_space<vmem>>, vector<1x8x32xf32>
    %149 = vector.shape_cast %148 : vector<1x8x32xf32> to vector<8x32xf32>
    %150 = vector.shape_cast %147 : vector<8x32xf32> to vector<1x8x32xf32>
    tpu.vector_store %arg11[%c0_60, %c0_61, %c0_62], %150 {strides = array<i32>} : memref<1x8x32xf32, #tpu.memory_space<vmem>>, vector<1x8x32xf32>,
    return
  }
  func.func @transform_0(%arg0: i32) -> (i32, i32, i32) {
    %c0_i32 = arith.constant 0 : i32
    %c0_i32_0 = arith.constant 0 : i32
    %c0_i32_1 = arith.constant 0 : i32
    return %arg0, %c0_i32, %c0_i32_0 : i32, i32, i32
  }
  func.func @transform_1(%arg0: i32) -> (i32, i32, i32) {
    %c0_i32 = arith.constant 0 : i32
    %c0_i32_0 = arith.constant 0 : i32
    %c0_i32_1 = arith.constant 0 : i32
    return %arg0, %c0_i32, %c0_i32_0 : i32, i32, i32
  }
  func.func @transform_2(%arg0: i32) -> (i32, i32) {
    %c0_i32 = arith.constant 0 : i32
    %c0_i32_0 = arith.constant 0 : i32
    %c0_i32_1 = arith.constant 0 : i32
    return %c0_i32, %c0_i32_0 : i32, i32
  }
  func.func @transform_3(%arg0: i32) -> (i32, i32) {
    %c0_i32 = arith.constant 0 : i32
    %c0_i32_0 = arith.constant 0 : i32
    %c0_i32_1 = arith.constant 0 : i32
    return %c0_i32, %c0_i32_0 : i32, i32
  }
  func.func @transform_4(%arg0: i32) -> (i32, i32) {
    %c0_i32 = arith.constant 0 : i32
    %c0_i32_0 = arith.constant 0 : i32
    %c0_i32_1 = arith.constant 0 : i32
    return %c0_i32, %c0_i32_0 : i32, i32
  }
  func.func @transform_5(%arg0: i32) -> (i32, i32) {
    %c0_i32 = arith.constant 0 : i32
    %c0_i32_0 = arith.constant 0 : i32
    %c0_i32_1 = arith.constant 0 : i32
    return %c0_i32, %c0_i32_0 : i32, i32
  }
  func.func @transform_6(%arg0: i32) -> (i32, i32) {
    %c0_i32 = arith.constant 0 : i32
    %c0_i32_0 = arith.constant 0 : i32
    %c0_i32_1 = arith.constant 0 : i32
    return %c0_i32, %c0_i32_0 : i32, i32
  }
  func.func @transform_7(%arg0: i32) -> (i32, i32) {
    %c0_i32 = arith.constant 0 : i32
    %c0_i32_0 = arith.constant 0 : i32
    %c0_i32_1 = arith.constant 0 : i32
    return %c0_i32, %c0_i32_0 : i32, i32
  }
  func.func @transform_8(%arg0: i32) -> (i32, i32) {
    %c0_i32 = arith.constant 0 : i32
    %c0_i32_0 = arith.constant 0 : i32
    %c0_i32_1 = arith.constant 0 : i32
    return %c0_i32, %c0_i32_0 : i32, i32
  }
  func.func @transform_9(%arg0: i32) -> (i32, i32) {
    %c0_i32 = arith.constant 0 : i32
    %c0_i32_0 = arith.constant 0 : i32
    %c0_i32_1 = arith.constant 0 : i32
    return %c0_i32, %c0_i32_0 : i32, i32
  }
  func.func @transform_10(%arg0: i32) -> (i32, i32, i32) {
    %c0_i32 = arith.constant 0 : i32
    %c0_i32_0 = arith.constant 0 : i32
    %c0_i32_1 = arith.constant 0 : i32
    return %arg0, %c0_i32, %c0_i32_0 : i32, i32, i32
  }
}

module attributes {stable_mosaic.version = 11 : i64} {
  func.func @_ffn_ln_kernel(%arg0: i32, %arg1: i32, %arg2: memref<16x32xf32, #tpu.memory_space<vmem>>, %arg3: memref<32x512xbf16, #tpu.memory_space<vmem>>, %arg4: memref<1x512xf32, #tpu.memory_space<vmem>>, %arg5: memref<512x32xbf16, #tpu.memory_space<vmem>>, %arg6: memref<1x32xf32, #tpu.memory_space<vmem>>, %arg7: memref<1x32xf32, #tpu.memory_space<vmem>>, %arg8: memref<1x32xf32, #tpu.memory_space<vmem>>, %arg9: memref<16x32xf32, #tpu.memory_space<vmem>>) attributes {dimension_semantics = [#tpu.dimension_semantics<parallel>, #tpu.dimension_semantics<arbitrary>], iteration_bounds = array<i64: 1, 4>, scalar_prefetch = 0 : i64, scratch_operands = 0 : i64, tpu.core_type = #tpu.core_type<tc>, window_params = [{transform_indices = @transform_0, window_bounds = array<i64: 16, 32>}, {transform_indices = @transform_1, window_bounds = array<i64: 32, 512>}, {transform_indices = @transform_2, window_bounds = array<i64: 1, 512>}, {transform_indices = @transform_3, window_bounds = array<i64: 512, 32>}, {pipeline_mode = #tpu.pipeline_mode<synchronous>, transform_indices = @transform_4, window_bounds = array<i64: 1, 32>}, {pipeline_mode = #tpu.pipeline_mode<synchronous>, transform_indices = @transform_5, window_bounds = array<i64: 1, 32>}, {pipeline_mode = #tpu.pipeline_mode<synchronous>, transform_indices = @transform_6, window_bounds = array<i64: 1, 32>}, {transform_indices = @transform_7, window_bounds = array<i64: 16, 32>}]} {
    %c0 = arith.constant 0 : index
    %c0_0 = arith.constant 0 : index
    %0 = vector.load %arg2[%c0, %c0_0] : memref<16x32xf32, #tpu.memory_space<vmem>>, vector<16x32xf32>
    %c0_i32 = arith.constant 0 : i32
    %1 = arith.cmpi eq, %arg1, %c0_i32 : i32
    %2 = arith.extui %1 : i1 to i32
    %c0_i32_1 = arith.constant 0 : i32
    %3 = arith.cmpi ne, %2, %c0_i32_1 : i32
    scf.if %3 {
      %c0_15 = arith.constant 0 : index
      %c0_16 = arith.constant 0 : index
      %21 = vector.load %arg6[%c0_15, %c0_16] : memref<1x32xf32, #tpu.memory_space<vmem>>, vector<1x32xf32>
      %22 = vector.broadcast %21 : vector<1x32xf32> to vector<16x32xf32>
      %23 = arith.addf %0, %22 : vector<16x32xf32>
      %c0_17 = arith.constant 0 : index
      %c0_18 = arith.constant 0 : index
      %24 = vector.load %arg9[%c0_17, %c0_18] : memref<16x32xf32, #tpu.memory_space<vmem>>, vector<16x32xf32>
      tpu.vector_store %arg9[%c0_17, %c0_18], %23 {strides = array<i32>} : memref<16x32xf32, #tpu.memory_space<vmem>>, vector<16x32xf32>,
    } else {
    }
    %4 = arith.truncf %0 : vector<16x32xf32> to vector<16x32xbf16>
    %c0_2 = arith.constant 0 : index
    %c0_3 = arith.constant 0 : index
    %5 = vector.load %arg3[%c0_2, %c0_3] : memref<32x512xbf16, #tpu.memory_space<vmem>>, vector<32x512xbf16>
    %cst = arith.constant dense<0.000000e+00> : vector<16x512xf32>
    %6 = tpu.matmul %4, %5, %cst {dimension_numbers = #tpu.dot_dimension_numbers<[1], [0], [0], [1], [0, 0, 1, 1], [], []>} : vector<16x32xbf16>, vector<32x512xbf16>, vector<16x512xf32> -> vector<16x512xf32>
    %c0_4 = arith.constant 0 : index
    %c0_5 = arith.constant 0 : index
    %7 = vector.load %arg4[%c0_4, %c0_5] : memref<1x512xf32, #tpu.memory_space<vmem>>, vector<1x512xf32>
    %8 = vector.broadcast %7 : vector<1x512xf32> to vector<16x512xf32>
    %9 = arith.addf %6, %8 : vector<16x512xf32>
    %cst_6 = arith.constant 0.000000e+00 : f32
    %10 = vector.broadcast %cst_6 : f32 to vector<16x512xf32>
    %11 = arith.maximumf %9, %10 : vector<16x512xf32>
    %c0_7 = arith.constant 0 : index
    %c0_8 = arith.constant 0 : index
    %12 = vector.load %arg9[%c0_7, %c0_8] : memref<16x32xf32, #tpu.memory_space<vmem>>, vector<16x32xf32>
    %13 = arith.truncf %11 : vector<16x512xf32> to vector<16x512xbf16>
    %c0_9 = arith.constant 0 : index
    %c0_10 = arith.constant 0 : index
    %14 = vector.load %arg5[%c0_9, %c0_10] : memref<512x32xbf16, #tpu.memory_space<vmem>>, vector<512x32xbf16>
    %cst_11 = arith.constant dense<0.000000e+00> : vector<16x32xf32>
    %15 = tpu.matmul %13, %14, %cst_11 {dimension_numbers = #tpu.dot_dimension_numbers<[1], [0], [0], [1], [0, 0, 1, 1], [], []>} : vector<16x512xbf16>, vector<512x32xbf16>, vector<16x32xf32> -> vector<16x32xf32>
    %16 = arith.addf %12, %15 : vector<16x32xf32>
    %c0_12 = arith.constant 0 : index
    %c0_13 = arith.constant 0 : index
    %17 = vector.load %arg9[%c0_12, %c0_13] : memref<16x32xf32, #tpu.memory_space<vmem>>, vector<16x32xf32>
    tpu.vector_store %arg9[%c0_12, %c0_13], %16 {strides = array<i32>} : memref<16x32xf32, #tpu.memory_space<vmem>>, vector<16x32xf32>,
    %c3_i32 = arith.constant 3 : i32
    %18 = arith.cmpi eq, %arg1, %c3_i32 : i32
    %19 = arith.extui %18 : i1 to i32
    %c0_i32_14 = arith.constant 0 : i32
    %20 = arith.cmpi ne, %19, %c0_i32_14 : i32
    scf.if %20 {
      %c0_15 = arith.constant 0 : index
      %c0_16 = arith.constant 0 : index
      %21 = vector.load %arg9[%c0_15, %c0_16] : memref<16x32xf32, #tpu.memory_space<vmem>>, vector<16x32xf32>
      %c0_17 = arith.constant 0 : index
      %c0_18 = arith.constant 0 : index
      %22 = vector.load %arg7[%c0_17, %c0_18] : memref<1x32xf32, #tpu.memory_space<vmem>>, vector<1x32xf32>
      %c0_19 = arith.constant 0 : index
      %c0_20 = arith.constant 0 : index
      %23 = vector.load %arg8[%c0_19, %c0_20] : memref<1x32xf32, #tpu.memory_space<vmem>>, vector<1x32xf32>
      %cst_21 = arith.constant dense<0.000000e+00> : vector<16xf32>
      %24 = vector.multi_reduction <add>, %21, %cst_21 [1] : vector<16x32xf32> to vector<16xf32>
      %25 = vector.shape_cast %24 : vector<16xf32> to vector<16x1xf32>
      %cst_22 = arith.constant 3.200000e+01 : f32
      %26 = vector.broadcast %cst_22 : f32 to vector<16x1xf32>
      %27 = arith.divf %25, %26 : vector<16x1xf32>
      %28 = vector.broadcast %27 : vector<16x1xf32> to vector<16x32xf32>
      %29 = arith.subf %21, %28 : vector<16x32xf32>
      %30 = arith.mulf %29, %29 : vector<16x32xf32>
      %cst_23 = arith.constant dense<0.000000e+00> : vector<16xf32>
      %31 = vector.multi_reduction <add>, %30, %cst_23 [1] : vector<16x32xf32> to vector<16xf32>
      %32 = vector.shape_cast %31 : vector<16xf32> to vector<16x1xf32>
      %cst_24 = arith.constant 3.200000e+01 : f32
      %33 = vector.broadcast %cst_24 : f32 to vector<16x1xf32>
      %34 = arith.divf %32, %33 : vector<16x1xf32>
      %35 = vector.broadcast %27 : vector<16x1xf32> to vector<16x32xf32>
      %36 = arith.subf %21, %35 : vector<16x32xf32>
      %cst_25 = arith.constant 9.99999974E-6 : f32
      %37 = vector.broadcast %cst_25 : f32 to vector<16x1xf32>
      %38 = arith.addf %34, %37 : vector<16x1xf32>
      %39 = math.rsqrt %38 : vector<16x1xf32>
      %40 = vector.broadcast %39 : vector<16x1xf32> to vector<16x32xf32>
      %41 = arith.mulf %36, %40 : vector<16x32xf32>
      %42 = vector.broadcast %22 : vector<1x32xf32> to vector<16x32xf32>
      %43 = arith.mulf %41, %42 : vector<16x32xf32>
      %44 = vector.broadcast %23 : vector<1x32xf32> to vector<16x32xf32>
      %45 = arith.addf %43, %44 : vector<16x32xf32>
      %c0_26 = arith.constant 0 : index
      %c0_27 = arith.constant 0 : index
      %46 = vector.load %arg9[%c0_26, %c0_27] : memref<16x32xf32, #tpu.memory_space<vmem>>, vector<16x32xf32>
      tpu.vector_store %arg9[%c0_26, %c0_27], %45 {strides = array<i32>} : memref<16x32xf32, #tpu.memory_space<vmem>>, vector<16x32xf32>,
    } else {
    }
    return
  }
  func.func @transform_0(%arg0: i32, %arg1: i32) -> (i32, i32) {
    %c0_i32 = arith.constant 0 : i32
    %c0_i32_0 = arith.constant 0 : i32
    return %arg0, %c0_i32 : i32, i32
  }
  func.func @transform_1(%arg0: i32, %arg1: i32) -> (i32, i32) {
    %c0_i32 = arith.constant 0 : i32
    %c0_i32_0 = arith.constant 0 : i32
    return %c0_i32, %arg1 : i32, i32
  }
  func.func @transform_2(%arg0: i32, %arg1: i32) -> (i32, i32) {
    %c0_i32 = arith.constant 0 : i32
    %c0_i32_0 = arith.constant 0 : i32
    return %c0_i32, %arg1 : i32, i32
  }
  func.func @transform_3(%arg0: i32, %arg1: i32) -> (i32, i32) {
    %c0_i32 = arith.constant 0 : i32
    %c0_i32_0 = arith.constant 0 : i32
    return %arg1, %c0_i32 : i32, i32
  }
  func.func @transform_4(%arg0: i32, %arg1: i32) -> (i32, i32) {
    %c0_i32 = arith.constant 0 : i32
    %c0_i32_0 = arith.constant 0 : i32
    %c0_i32_1 = arith.constant 0 : i32
    return %c0_i32, %c0_i32_0 : i32, i32
  }
  func.func @transform_5(%arg0: i32, %arg1: i32) -> (i32, i32) {
    %c0_i32 = arith.constant 0 : i32
    %c0_i32_0 = arith.constant 0 : i32
    %c0_i32_1 = arith.constant 0 : i32
    return %c0_i32, %c0_i32_0 : i32, i32
  }
  func.func @transform_6(%arg0: i32, %arg1: i32) -> (i32, i32) {
    %c0_i32 = arith.constant 0 : i32
    %c0_i32_0 = arith.constant 0 : i32
    %c0_i32_1 = arith.constant 0 : i32
    return %c0_i32, %c0_i32_0 : i32, i32
  }
  func.func @transform_7(%arg0: i32, %arg1: i32) -> (i32, i32) {
    %c0_i32 = arith.constant 0 : i32
    %c0_i32_0 = arith.constant 0 : i32
    return %arg0, %c0_i32 : i32, i32
  }
}

module attributes {stable_mosaic.version = 11 : i64} {
  func.func @_attn_block_kernel(%arg0: i32, %arg1: memref<1x8x32xf32, #tpu.memory_space<vmem>>, %arg2: memref<1x1x8xf32, #tpu.memory_space<vmem>>, %arg3: memref<32x96xbf16, #tpu.memory_space<vmem>>, %arg4: memref<1x96xf32, #tpu.memory_space<vmem>>, %arg5: memref<32x32xbf16, #tpu.memory_space<vmem>>, %arg6: memref<1x32xf32, #tpu.memory_space<vmem>>, %arg7: memref<1x32xf32, #tpu.memory_space<vmem>>, %arg8: memref<1x32xf32, #tpu.memory_space<vmem>>, %arg9: memref<1x8x32xf32, #tpu.memory_space<vmem>>, %arg10: memref<8x32xf32, #tpu.memory_space<vmem>>) attributes {dimension_semantics = [#tpu.dimension_semantics<parallel>], iteration_bounds = array<i64: 2>, scalar_prefetch = 0 : i64, scratch_operands = 1 : i64, tpu.core_type = #tpu.core_type<tc>, window_params = [{transform_indices = @transform_0, window_bounds = array<i64: 1, 8, 32>}, {transform_indices = @transform_1, window_bounds = array<i64: 1, 1, 8>}, {pipeline_mode = #tpu.pipeline_mode<synchronous>, transform_indices = @transform_2, window_bounds = array<i64: 32, 96>}, {pipeline_mode = #tpu.pipeline_mode<synchronous>, transform_indices = @transform_3, window_bounds = array<i64: 1, 96>}, {pipeline_mode = #tpu.pipeline_mode<synchronous>, transform_indices = @transform_4, window_bounds = array<i64: 32, 32>}, {pipeline_mode = #tpu.pipeline_mode<synchronous>, transform_indices = @transform_5, window_bounds = array<i64: 1, 32>}, {pipeline_mode = #tpu.pipeline_mode<synchronous>, transform_indices = @transform_6, window_bounds = array<i64: 1, 32>}, {pipeline_mode = #tpu.pipeline_mode<synchronous>, transform_indices = @transform_7, window_bounds = array<i64: 1, 32>}, {transform_indices = @transform_8, window_bounds = array<i64: 1, 8, 32>}]} {
    %c0 = arith.constant 0 : index
    %c0_0 = arith.constant 0 : index
    %c0_1 = arith.constant 0 : index
    %0 = vector.load %arg1[%c0, %c0_0, %c0_1] : memref<1x8x32xf32, #tpu.memory_space<vmem>>, vector<1x8x32xf32>
    %1 = vector.shape_cast %0 : vector<1x8x32xf32> to vector<8x32xf32>
    %2 = arith.truncf %1 : vector<8x32xf32> to vector<8x32xbf16>
    %c0_2 = arith.constant 0 : index
    %c0_3 = arith.constant 0 : index
    %3 = vector.load %arg3[%c0_2, %c0_3] : memref<32x96xbf16, #tpu.memory_space<vmem>>, vector<32x96xbf16>
    %cst = arith.constant dense<0.000000e+00> : vector<8x96xf32>
    %4 = tpu.matmul %2, %3, %cst {dimension_numbers = #tpu.dot_dimension_numbers<[1], [0], [0], [1], [0, 0, 1, 1], [], []>} : vector<8x32xbf16>, vector<32x96xbf16>, vector<8x96xf32> -> vector<8x96xf32>
    %c0_4 = arith.constant 0 : index
    %c0_5 = arith.constant 0 : index
    %5 = vector.load %arg4[%c0_4, %c0_5] : memref<1x96xf32, #tpu.memory_space<vmem>>, vector<1x96xf32>
    %6 = vector.broadcast %5 : vector<1x96xf32> to vector<8x96xf32>
    %7 = arith.addf %4, %6 : vector<8x96xf32>
    %8 = vector.extract_strided_slice %7 {offsets = [0, 0], sizes = [8, 32], strides = [1, 1]} : vector<8x96xf32> to vector<8x32xf32>
    %cst_6 = arith.constant 0.353553385 : f32
    %9 = vector.broadcast %cst_6 : f32 to vector<8x32xf32>
    %10 = arith.mulf %8, %9 : vector<8x32xf32>
    %11 = vector.extract_strided_slice %7 {offsets = [0, 32], sizes = [8, 32], strides = [1, 1]} : vector<8x96xf32> to vector<8x32xf32>
    %12 = vector.extract_strided_slice %7 {offsets = [0, 64], sizes = [8, 32], strides = [1, 1]} : vector<8x96xf32> to vector<8x32xf32>
    %c0_7 = arith.constant 0 : index
    %c0_8 = arith.constant 0 : index
    %c0_9 = arith.constant 0 : index
    %13 = vector.load %arg2[%c0_7, %c0_8, %c0_9] : memref<1x1x8xf32, #tpu.memory_space<vmem>>, vector<1x1x8xf32>
    %14 = vector.shape_cast %13 : vector<1x1x8xf32> to vector<1x8xf32>
    %15 = tpu.iota {dimensions = array<i32: 0>} : vector<8x8xi32>
    %16 = tpu.iota {dimensions = array<i32: 1>} : vector<8x8xi32>
    %17 = arith.cmpi sge, %15, %16 : vector<8x8xi32>
    %cst_10 = arith.constant 0.000000e+00 : f32
    %cst_11 = arith.constant 0xFF800000 : f32
    %18 = vector.broadcast %cst_10 : f32 to vector<8x8xf32>
    %19 = vector.broadcast %cst_11 : f32 to vector<8x8xf32>
    %20 = arith.select %17, %18, %19 : vector<8x8xi1>, vector<8x8xf32>
    %21 = vector.broadcast %14 : vector<1x8xf32> to vector<8x8xf32>
    %22 = arith.addf %21, %20 : vector<8x8xf32>
    %23 = vector.extract_strided_slice %10 {offsets = [0, 0], sizes = [8, 8], strides = [1, 1]} : vector<8x32xf32> to vector<8x8xf32>
    %24 = arith.truncf %23 : vector<8x8xf32> to vector<8x8xbf16>
    %25 = vector.extract_strided_slice %11 {offsets = [0, 0], sizes = [8, 8], strides = [1, 1]} : vector<8x32xf32> to vector<8x8xf32>
    %26 = arith.truncf %25 : vector<8x8xf32> to vector<8x8xbf16>
    %27 = vector.extract_strided_slice %12 {offsets = [0, 0], sizes = [8, 8], strides = [1, 1]} : vector<8x32xf32> to vector<8x8xf32>
    %28 = arith.truncf %27 : vector<8x8xf32> to vector<8x8xbf16>
    %cst_12 = arith.constant dense<0.000000e+00> : vector<8x8xf32>
    %29 = tpu.matmul %24, %26, %cst_12 {dimension_numbers = #tpu.dot_dimension_numbers<[1], [1], [0], [0], [0, 0, 1, 0], [], []>} : vector<8x8xbf16>, vector<8x8xbf16>, vector<8x8xf32> -> vector<8x8xf32>
    %30 = arith.addf %29, %22 : vector<8x8xf32>
    %cst_13 = arith.constant dense<0xFF800000> : vector<8xf32>
    %31 = vector.multi_reduction <maximumf>, %30, %cst_13 [1] : vector<8x8xf32> to vector<8xf32>
    %32 = vector.shape_cast %31 : vector<8xf32> to vector<8x1xf32>
    %cst_14 = arith.constant -1.000000e+30 : f32
    %33 = vector.broadcast %cst_14 : f32 to vector<8x1xf32>
    %34 = arith.maximumf %32, %33 : vector<8x1xf32>
    %35 = vector.broadcast %34 : vector<8x1xf32> to vector<8x8xf32>
    %36 = arith.subf %30, %35 : vector<8x8xf32>
    %37 = math.exp %36 : vector<8x8xf32>
    %cst_15 = arith.constant dense<0.000000e+00> : vector<8xf32>
    %38 = vector.multi_reduction <add>, %37, %cst_15 [1] : vector<8x8xf32> to vector<8xf32>
    %39 = vector.shape_cast %38 : vector<8xf32> to vector<8x1xf32>
    %cst_16 = arith.constant 1.000000e-30 : f32
    %40 = vector.broadcast %cst_16 : f32 to vector<8x1xf32>
    %41 = arith.maximumf %39, %40 : vector<8x1xf32>
    %42 = tpu.reciprocal %41 {approx = true} : vector<8x1xf32> -> vector<8x1xf32>
    %43 = arith.truncf %37 : vector<8x8xf32> to vector<8x8xbf16>
    %cst_17 = arith.constant dense<0.000000e+00> : vector<8x8xf32>
    %44 = tpu.matmul %43, %28, %cst_17 {dimension_numbers = #tpu.dot_dimension_numbers<[1], [0], [0], [1], [0, 0, 1, 1], [], []>} : vector<8x8xbf16>, vector<8x8xbf16>, vector<8x8xf32> -> vector<8x8xf32>
    %45 = vector.broadcast %42 : vector<8x1xf32> to vector<8x8xf32>
    %46 = arith.mulf %44, %45 : vector<8x8xf32>
    %c0_18 = arith.constant 0 : index
    %c0_19 = arith.constant 0 : index
    %47 = vector.load %arg10[%c0_18, %c0_19] : memref<8x32xf32, #tpu.memory_space<vmem>>, vector<8x8xf32>
    tpu.vector_store %arg10[%c0_18, %c0_19], %46 {strides = array<i32>} : memref<8x32xf32, #tpu.memory_space<vmem>>, vector<8x8xf32>,
    %48 = vector.extract_strided_slice %10 {offsets = [0, 8], sizes = [8, 8], strides = [1, 1]} : vector<8x32xf32> to vector<8x8xf32>
    %49 = arith.truncf %48 : vector<8x8xf32> to vector<8x8xbf16>
    %50 = vector.extract_strided_slice %11 {offsets = [0, 8], sizes = [8, 8], strides = [1, 1]} : vector<8x32xf32> to vector<8x8xf32>
    %51 = arith.truncf %50 : vector<8x8xf32> to vector<8x8xbf16>
    %52 = vector.extract_strided_slice %12 {offsets = [0, 8], sizes = [8, 8], strides = [1, 1]} : vector<8x32xf32> to vector<8x8xf32>
    %53 = arith.truncf %52 : vector<8x8xf32> to vector<8x8xbf16>
    %cst_20 = arith.constant dense<0.000000e+00> : vector<8x8xf32>
    %54 = tpu.matmul %49, %51, %cst_20 {dimension_numbers = #tpu.dot_dimension_numbers<[1], [1], [0], [0], [0, 0, 1, 0], [], []>} : vector<8x8xbf16>, vector<8x8xbf16>, vector<8x8xf32> -> vector<8x8xf32>
    %55 = arith.addf %54, %22 : vector<8x8xf32>
    %cst_21 = arith.constant dense<0xFF800000> : vector<8xf32>
    %56 = vector.multi_reduction <maximumf>, %55, %cst_21 [1] : vector<8x8xf32> to vector<8xf32>
    %57 = vector.shape_cast %56 : vector<8xf32> to vector<8x1xf32>
    %cst_22 = arith.constant -1.000000e+30 : f32
    %58 = vector.broadcast %cst_22 : f32 to vector<8x1xf32>
    %59 = arith.maximumf %57, %58 : vector<8x1xf32>
    %60 = vector.broadcast %59 : vector<8x1xf32> to vector<8x8xf32>
    %61 = arith.subf %55, %60 : vector<8x8xf32>
    %62 = math.exp %61 : vector<8x8xf32>
    %cst_23 = arith.constant dense<0.000000e+00> : vector<8xf32>
    %63 = vector.multi_reduction <add>, %62, %cst_23 [1] : vector<8x8xf32> to vector<8xf32>
    %64 = vector.shape_cast %63 : vector<8xf32> to vector<8x1xf32>
    %cst_24 = arith.constant 1.000000e-30 : f32
    %65 = vector.broadcast %cst_24 : f32 to vector<8x1xf32>
    %66 = arith.maximumf %64, %65 : vector<8x1xf32>
    %67 = tpu.reciprocal %66 {approx = true} : vector<8x1xf32> -> vector<8x1xf32>
    %68 = arith.truncf %62 : vector<8x8xf32> to vector<8x8xbf16>
    %cst_25 = arith.constant dense<0.000000e+00> : vector<8x8xf32>
    %69 = tpu.matmul %68, %53, %cst_25 {dimension_numbers = #tpu.dot_dimension_numbers<[1], [0], [0], [1], [0, 0, 1, 1], [], []>} : vector<8x8xbf16>, vector<8x8xbf16>, vector<8x8xf32> -> vector<8x8xf32>
    %70 = vector.broadcast %67 : vector<8x1xf32> to vector<8x8xf32>
    %71 = arith.mulf %69, %70 : vector<8x8xf32>
    %c0_26 = arith.constant 0 : index
    %c8 = arith.constant 8 : index
    %72 = vector.load %arg10[%c0_26, %c8] : memref<8x32xf32, #tpu.memory_space<vmem>>, vector<8x8xf32>
    tpu.vector_store %arg10[%c0_26, %c8], %71 {strides = array<i32>} : memref<8x32xf32, #tpu.memory_space<vmem>>, vector<8x8xf32>,
    %73 = vector.extract_strided_slice %10 {offsets = [0, 16], sizes = [8, 8], strides = [1, 1]} : vector<8x32xf32> to vector<8x8xf32>
    %74 = arith.truncf %73 : vector<8x8xf32> to vector<8x8xbf16>
    %75 = vector.extract_strided_slice %11 {offsets = [0, 16], sizes = [8, 8], strides = [1, 1]} : vector<8x32xf32> to vector<8x8xf32>
    %76 = arith.truncf %75 : vector<8x8xf32> to vector<8x8xbf16>
    %77 = vector.extract_strided_slice %12 {offsets = [0, 16], sizes = [8, 8], strides = [1, 1]} : vector<8x32xf32> to vector<8x8xf32>
    %78 = arith.truncf %77 : vector<8x8xf32> to vector<8x8xbf16>
    %cst_27 = arith.constant dense<0.000000e+00> : vector<8x8xf32>
    %79 = tpu.matmul %74, %76, %cst_27 {dimension_numbers = #tpu.dot_dimension_numbers<[1], [1], [0], [0], [0, 0, 1, 0], [], []>} : vector<8x8xbf16>, vector<8x8xbf16>, vector<8x8xf32> -> vector<8x8xf32>
    %80 = arith.addf %79, %22 : vector<8x8xf32>
    %cst_28 = arith.constant dense<0xFF800000> : vector<8xf32>
    %81 = vector.multi_reduction <maximumf>, %80, %cst_28 [1] : vector<8x8xf32> to vector<8xf32>
    %82 = vector.shape_cast %81 : vector<8xf32> to vector<8x1xf32>
    %cst_29 = arith.constant -1.000000e+30 : f32
    %83 = vector.broadcast %cst_29 : f32 to vector<8x1xf32>
    %84 = arith.maximumf %82, %83 : vector<8x1xf32>
    %85 = vector.broadcast %84 : vector<8x1xf32> to vector<8x8xf32>
    %86 = arith.subf %80, %85 : vector<8x8xf32>
    %87 = math.exp %86 : vector<8x8xf32>
    %cst_30 = arith.constant dense<0.000000e+00> : vector<8xf32>
    %88 = vector.multi_reduction <add>, %87, %cst_30 [1] : vector<8x8xf32> to vector<8xf32>
    %89 = vector.shape_cast %88 : vector<8xf32> to vector<8x1xf32>
    %cst_31 = arith.constant 1.000000e-30 : f32
    %90 = vector.broadcast %cst_31 : f32 to vector<8x1xf32>
    %91 = arith.maximumf %89, %90 : vector<8x1xf32>
    %92 = tpu.reciprocal %91 {approx = true} : vector<8x1xf32> -> vector<8x1xf32>
    %93 = arith.truncf %87 : vector<8x8xf32> to vector<8x8xbf16>
    %cst_32 = arith.constant dense<0.000000e+00> : vector<8x8xf32>
    %94 = tpu.matmul %93, %78, %cst_32 {dimension_numbers = #tpu.dot_dimension_numbers<[1], [0], [0], [1], [0, 0, 1, 1], [], []>} : vector<8x8xbf16>, vector<8x8xbf16>, vector<8x8xf32> -> vector<8x8xf32>
    %95 = vector.broadcast %92 : vector<8x1xf32> to vector<8x8xf32>
    %96 = arith.mulf %94, %95 : vector<8x8xf32>
    %c0_33 = arith.constant 0 : index
    %c16 = arith.constant 16 : index
    %97 = vector.load %arg10[%c0_33, %c16] : memref<8x32xf32, #tpu.memory_space<vmem>>, vector<8x8xf32>
    tpu.vector_store %arg10[%c0_33, %c16], %96 {strides = array<i32>} : memref<8x32xf32, #tpu.memory_space<vmem>>, vector<8x8xf32>,
    %98 = vector.extract_strided_slice %10 {offsets = [0, 24], sizes = [8, 8], strides = [1, 1]} : vector<8x32xf32> to vector<8x8xf32>
    %99 = arith.truncf %98 : vector<8x8xf32> to vector<8x8xbf16>
    %100 = vector.extract_strided_slice %11 {offsets = [0, 24], sizes = [8, 8], strides = [1, 1]} : vector<8x32xf32> to vector<8x8xf32>
    %101 = arith.truncf %100 : vector<8x8xf32> to vector<8x8xbf16>
    %102 = vector.extract_strided_slice %12 {offsets = [0, 24], sizes = [8, 8], strides = [1, 1]} : vector<8x32xf32> to vector<8x8xf32>
    %103 = arith.truncf %102 : vector<8x8xf32> to vector<8x8xbf16>
    %cst_34 = arith.constant dense<0.000000e+00> : vector<8x8xf32>
    %104 = tpu.matmul %99, %101, %cst_34 {dimension_numbers = #tpu.dot_dimension_numbers<[1], [1], [0], [0], [0, 0, 1, 0], [], []>} : vector<8x8xbf16>, vector<8x8xbf16>, vector<8x8xf32> -> vector<8x8xf32>
    %105 = arith.addf %104, %22 : vector<8x8xf32>
    %cst_35 = arith.constant dense<0xFF800000> : vector<8xf32>
    %106 = vector.multi_reduction <maximumf>, %105, %cst_35 [1] : vector<8x8xf32> to vector<8xf32>
    %107 = vector.shape_cast %106 : vector<8xf32> to vector<8x1xf32>
    %cst_36 = arith.constant -1.000000e+30 : f32
    %108 = vector.broadcast %cst_36 : f32 to vector<8x1xf32>
    %109 = arith.maximumf %107, %108 : vector<8x1xf32>
    %110 = vector.broadcast %109 : vector<8x1xf32> to vector<8x8xf32>
    %111 = arith.subf %105, %110 : vector<8x8xf32>
    %112 = math.exp %111 : vector<8x8xf32>
    %cst_37 = arith.constant dense<0.000000e+00> : vector<8xf32>
    %113 = vector.multi_reduction <add>, %112, %cst_37 [1] : vector<8x8xf32> to vector<8xf32>
    %114 = vector.shape_cast %113 : vector<8xf32> to vector<8x1xf32>
    %cst_38 = arith.constant 1.000000e-30 : f32
    %115 = vector.broadcast %cst_38 : f32 to vector<8x1xf32>
    %116 = arith.maximumf %114, %115 : vector<8x1xf32>
    %117 = tpu.reciprocal %116 {approx = true} : vector<8x1xf32> -> vector<8x1xf32>
    %118 = arith.truncf %112 : vector<8x8xf32> to vector<8x8xbf16>
    %cst_39 = arith.constant dense<0.000000e+00> : vector<8x8xf32>
    %119 = tpu.matmul %118, %103, %cst_39 {dimension_numbers = #tpu.dot_dimension_numbers<[1], [0], [0], [1], [0, 0, 1, 1], [], []>} : vector<8x8xbf16>, vector<8x8xbf16>, vector<8x8xf32> -> vector<8x8xf32>
    %120 = vector.broadcast %117 : vector<8x1xf32> to vector<8x8xf32>
    %121 = arith.mulf %119, %120 : vector<8x8xf32>
    %c0_40 = arith.constant 0 : index
    %c24 = arith.constant 24 : index
    %122 = vector.load %arg10[%c0_40, %c24] : memref<8x32xf32, #tpu.memory_space<vmem>>, vector<8x8xf32>
    tpu.vector_store %arg10[%c0_40, %c24], %121 {strides = array<i32>} : memref<8x32xf32, #tpu.memory_space<vmem>>, vector<8x8xf32>,
    %c0_41 = arith.constant 0 : index
    %c0_42 = arith.constant 0 : index
    %123 = vector.load %arg10[%c0_41, %c0_42] : memref<8x32xf32, #tpu.memory_space<vmem>>, vector<8x32xf32>
    %124 = arith.truncf %123 : vector<8x32xf32> to vector<8x32xbf16>
    %c0_43 = arith.constant 0 : index
    %c0_44 = arith.constant 0 : index
    %125 = vector.load %arg5[%c0_43, %c0_44] : memref<32x32xbf16, #tpu.memory_space<vmem>>, vector<32x32xbf16>
    %cst_45 = arith.constant dense<0.000000e+00> : vector<8x32xf32>
    %126 = tpu.matmul %124, %125, %cst_45 {dimension_numbers = #tpu.dot_dimension_numbers<[1], [0], [0], [1], [0, 0, 1, 1], [], []>} : vector<8x32xbf16>, vector<32x32xbf16>, vector<8x32xf32> -> vector<8x32xf32>
    %c0_46 = arith.constant 0 : index
    %c0_47 = arith.constant 0 : index
    %127 = vector.load %arg6[%c0_46, %c0_47] : memref<1x32xf32, #tpu.memory_space<vmem>>, vector<1x32xf32>
    %128 = vector.broadcast %127 : vector<1x32xf32> to vector<8x32xf32>
    %129 = arith.addf %126, %128 : vector<8x32xf32>
    %130 = arith.addf %1, %129 : vector<8x32xf32>
    %c0_48 = arith.constant 0 : index
    %c0_49 = arith.constant 0 : index
    %131 = vector.load %arg7[%c0_48, %c0_49] : memref<1x32xf32, #tpu.memory_space<vmem>>, vector<1x32xf32>
    %c0_50 = arith.constant 0 : index
    %c0_51 = arith.constant 0 : index
    %132 = vector.load %arg8[%c0_50, %c0_51] : memref<1x32xf32, #tpu.memory_space<vmem>>, vector<1x32xf32>
    %cst_52 = arith.constant dense<0.000000e+00> : vector<8xf32>
    %133 = vector.multi_reduction <add>, %130, %cst_52 [1] : vector<8x32xf32> to vector<8xf32>
    %134 = vector.shape_cast %133 : vector<8xf32> to vector<8x1xf32>
    %cst_53 = arith.constant 3.200000e+01 : f32
    %135 = vector.broadcast %cst_53 : f32 to vector<8x1xf32>
    %136 = arith.divf %134, %135 : vector<8x1xf32>
    %137 = vector.broadcast %136 : vector<8x1xf32> to vector<8x32xf32>
    %138 = arith.subf %130, %137 : vector<8x32xf32>
    %139 = arith.mulf %138, %138 : vector<8x32xf32>
    %cst_54 = arith.constant dense<0.000000e+00> : vector<8xf32>
    %140 = vector.multi_reduction <add>, %139, %cst_54 [1] : vector<8x32xf32> to vector<8xf32>
    %141 = vector.shape_cast %140 : vector<8xf32> to vector<8x1xf32>
    %cst_55 = arith.constant 3.200000e+01 : f32
    %142 = vector.broadcast %cst_55 : f32 to vector<8x1xf32>
    %143 = arith.divf %141, %142 : vector<8x1xf32>
    %144 = vector.broadcast %136 : vector<8x1xf32> to vector<8x32xf32>
    %145 = arith.subf %130, %144 : vector<8x32xf32>
    %cst_56 = arith.constant 9.99999974E-6 : f32
    %146 = vector.broadcast %cst_56 : f32 to vector<8x1xf32>
    %147 = arith.addf %143, %146 : vector<8x1xf32>
    %148 = math.rsqrt %147 : vector<8x1xf32>
    %149 = vector.broadcast %148 : vector<8x1xf32> to vector<8x32xf32>
    %150 = arith.mulf %145, %149 : vector<8x32xf32>
    %151 = vector.broadcast %131 : vector<1x32xf32> to vector<8x32xf32>
    %152 = arith.mulf %150, %151 : vector<8x32xf32>
    %153 = vector.broadcast %132 : vector<1x32xf32> to vector<8x32xf32>
    %154 = arith.addf %152, %153 : vector<8x32xf32>
    %c0_57 = arith.constant 0 : index
    %c0_58 = arith.constant 0 : index
    %c0_59 = arith.constant 0 : index
    %155 = vector.load %arg9[%c0_57, %c0_58, %c0_59] : memref<1x8x32xf32, #tpu.memory_space<vmem>>, vector<1x8x32xf32>
    %156 = vector.shape_cast %155 : vector<1x8x32xf32> to vector<8x32xf32>
    %157 = vector.shape_cast %154 : vector<8x32xf32> to vector<1x8x32xf32>
    tpu.vector_store %arg9[%c0_57, %c0_58, %c0_59], %157 {strides = array<i32>} : memref<1x8x32xf32, #tpu.memory_space<vmem>>, vector<1x8x32xf32>,
    return
  }
  func.func @transform_0(%arg0: i32) -> (i32, i32, i32) {
    %c0_i32 = arith.constant 0 : i32
    %c0_i32_0 = arith.constant 0 : i32
    %c0_i32_1 = arith.constant 0 : i32
    return %arg0, %c0_i32, %c0_i32_0 : i32, i32, i32
  }
  func.func @transform_1(%arg0: i32) -> (i32, i32, i32) {
    %c0_i32 = arith.constant 0 : i32
    %c0_i32_0 = arith.constant 0 : i32
    %c0_i32_1 = arith.constant 0 : i32
    return %arg0, %c0_i32, %c0_i32_0 : i32, i32, i32
  }
  func.func @transform_2(%arg0: i32) -> (i32, i32) {
    %c0_i32 = arith.constant 0 : i32
    %c0_i32_0 = arith.constant 0 : i32
    %c0_i32_1 = arith.constant 0 : i32
    return %c0_i32, %c0_i32_0 : i32, i32
  }
  func.func @transform_3(%arg0: i32) -> (i32, i32) {
    %c0_i32 = arith.constant 0 : i32
    %c0_i32_0 = arith.constant 0 : i32
    %c0_i32_1 = arith.constant 0 : i32
    return %c0_i32, %c0_i32_0 : i32, i32
  }
  func.func @transform_4(%arg0: i32) -> (i32, i32) {
    %c0_i32 = arith.constant 0 : i32
    %c0_i32_0 = arith.constant 0 : i32
    %c0_i32_1 = arith.constant 0 : i32
    return %c0_i32, %c0_i32_0 : i32, i32
  }
  func.func @transform_5(%arg0: i32) -> (i32, i32) {
    %c0_i32 = arith.constant 0 : i32
    %c0_i32_0 = arith.constant 0 : i32
    %c0_i32_1 = arith.constant 0 : i32
    return %c0_i32, %c0_i32_0 : i32, i32
  }
  func.func @transform_6(%arg0: i32) -> (i32, i32) {
    %c0_i32 = arith.constant 0 : i32
    %c0_i32_0 = arith.constant 0 : i32
    %c0_i32_1 = arith.constant 0 : i32
    return %c0_i32, %c0_i32_0 : i32, i32
  }
  func.func @transform_7(%arg0: i32) -> (i32, i32) {
    %c0_i32 = arith.constant 0 : i32
    %c0_i32_0 = arith.constant 0 : i32
    %c0_i32_1 = arith.constant 0 : i32
    return %c0_i32, %c0_i32_0 : i32, i32
  }
  func.func @transform_8(%arg0: i32) -> (i32, i32, i32) {
    %c0_i32 = arith.constant 0 : i32
    %c0_i32_0 = arith.constant 0 : i32
    %c0_i32_1 = arith.constant 0 : i32
    return %arg0, %c0_i32, %c0_i32_0 : i32, i32, i32
  }
}

module attributes {stable_mosaic.version = 11 : i64} {
  func.func @_out_logsoftmax_kernel(%arg0: i32, %arg1: memref<1x8x32xf32, #tpu.memory_space<vmem>>, %arg2: memref<1x32xf32, #tpu.memory_space<vmem>>, %arg3: memref<1x32xf32, #tpu.memory_space<vmem>>, %arg4: memref<32x128xbf16, #tpu.memory_space<vmem>>, %arg5: memref<1x128xf32, #tpu.memory_space<vmem>>, %arg6: memref<1x8x128xf32, #tpu.memory_space<vmem>>) attributes {dimension_semantics = [#tpu.dimension_semantics<parallel>], iteration_bounds = array<i64: 2>, scalar_prefetch = 0 : i64, scratch_operands = 0 : i64, tpu.core_type = #tpu.core_type<tc>, window_params = [{transform_indices = @transform_0, window_bounds = array<i64: 1, 8, 32>}, {pipeline_mode = #tpu.pipeline_mode<synchronous>, transform_indices = @transform_1, window_bounds = array<i64: 1, 32>}, {pipeline_mode = #tpu.pipeline_mode<synchronous>, transform_indices = @transform_2, window_bounds = array<i64: 1, 32>}, {pipeline_mode = #tpu.pipeline_mode<synchronous>, transform_indices = @transform_3, window_bounds = array<i64: 32, 128>}, {pipeline_mode = #tpu.pipeline_mode<synchronous>, transform_indices = @transform_4, window_bounds = array<i64: 1, 128>}, {transform_indices = @transform_5, window_bounds = array<i64: 1, 8, 128>}]} {
    %c0 = arith.constant 0 : index
    %c0_0 = arith.constant 0 : index
    %c0_1 = arith.constant 0 : index
    %0 = vector.load %arg1[%c0, %c0_0, %c0_1] : memref<1x8x32xf32, #tpu.memory_space<vmem>>, vector<1x8x32xf32>
    %1 = vector.shape_cast %0 : vector<1x8x32xf32> to vector<8x32xf32>
    %c0_2 = arith.constant 0 : index
    %c0_3 = arith.constant 0 : index
    %2 = vector.load %arg2[%c0_2, %c0_3] : memref<1x32xf32, #tpu.memory_space<vmem>>, vector<1x32xf32>
    %c0_4 = arith.constant 0 : index
    %c0_5 = arith.constant 0 : index
    %3 = vector.load %arg3[%c0_4, %c0_5] : memref<1x32xf32, #tpu.memory_space<vmem>>, vector<1x32xf32>
    %cst = arith.constant dense<0.000000e+00> : vector<8xf32>
    %4 = vector.multi_reduction <add>, %1, %cst [1] : vector<8x32xf32> to vector<8xf32>
    %5 = vector.shape_cast %4 : vector<8xf32> to vector<8x1xf32>
    %cst_6 = arith.constant 3.200000e+01 : f32
    %6 = vector.broadcast %cst_6 : f32 to vector<8x1xf32>
    %7 = arith.divf %5, %6 : vector<8x1xf32>
    %8 = vector.broadcast %7 : vector<8x1xf32> to vector<8x32xf32>
    %9 = arith.subf %1, %8 : vector<8x32xf32>
    %10 = arith.mulf %9, %9 : vector<8x32xf32>
    %cst_7 = arith.constant dense<0.000000e+00> : vector<8xf32>
    %11 = vector.multi_reduction <add>, %10, %cst_7 [1] : vector<8x32xf32> to vector<8xf32>
    %12 = vector.shape_cast %11 : vector<8xf32> to vector<8x1xf32>
    %cst_8 = arith.constant 3.200000e+01 : f32
    %13 = vector.broadcast %cst_8 : f32 to vector<8x1xf32>
    %14 = arith.divf %12, %13 : vector<8x1xf32>
    %15 = vector.broadcast %7 : vector<8x1xf32> to vector<8x32xf32>
    %16 = arith.subf %1, %15 : vector<8x32xf32>
    %cst_9 = arith.constant 9.99999974E-6 : f32
    %17 = vector.broadcast %cst_9 : f32 to vector<8x1xf32>
    %18 = arith.addf %14, %17 : vector<8x1xf32>
    %19 = math.rsqrt %18 : vector<8x1xf32>
    %20 = vector.broadcast %19 : vector<8x1xf32> to vector<8x32xf32>
    %21 = arith.mulf %16, %20 : vector<8x32xf32>
    %22 = vector.broadcast %2 : vector<1x32xf32> to vector<8x32xf32>
    %23 = arith.mulf %21, %22 : vector<8x32xf32>
    %24 = vector.broadcast %3 : vector<1x32xf32> to vector<8x32xf32>
    %25 = arith.addf %23, %24 : vector<8x32xf32>
    %26 = arith.truncf %25 : vector<8x32xf32> to vector<8x32xbf16>
    %c0_10 = arith.constant 0 : index
    %c0_11 = arith.constant 0 : index
    %27 = vector.load %arg4[%c0_10, %c0_11] : memref<32x128xbf16, #tpu.memory_space<vmem>>, vector<32x128xbf16>
    %cst_12 = arith.constant dense<0.000000e+00> : vector<8x128xf32>
    %28 = tpu.matmul %26, %27, %cst_12 {dimension_numbers = #tpu.dot_dimension_numbers<[1], [0], [0], [1], [0, 0, 1, 1], [], []>} : vector<8x32xbf16>, vector<32x128xbf16>, vector<8x128xf32> -> vector<8x128xf32>
    %c0_13 = arith.constant 0 : index
    %c0_14 = arith.constant 0 : index
    %29 = vector.load %arg5[%c0_13, %c0_14] : memref<1x128xf32, #tpu.memory_space<vmem>>, vector<1x128xf32>
    %30 = vector.broadcast %29 : vector<1x128xf32> to vector<8x128xf32>
    %31 = arith.addf %28, %30 : vector<8x128xf32>
    %cst_15 = arith.constant dense<0xFF800000> : vector<8xf32>
    %32 = vector.multi_reduction <maximumf>, %31, %cst_15 [1] : vector<8x128xf32> to vector<8xf32>
    %33 = vector.shape_cast %32 : vector<8xf32> to vector<8x1xf32>
    %34 = vector.broadcast %33 : vector<8x1xf32> to vector<8x128xf32>
    %35 = arith.subf %31, %34 : vector<8x128xf32>
    %36 = math.exp %35 : vector<8x128xf32>
    %cst_16 = arith.constant dense<0.000000e+00> : vector<8xf32>
    %37 = vector.multi_reduction <add>, %36, %cst_16 [1] : vector<8x128xf32> to vector<8xf32>
    %38 = vector.shape_cast %37 : vector<8xf32> to vector<8x1xf32>
    %39 = math.log %38 : vector<8x1xf32>
    %40 = vector.broadcast %39 : vector<8x1xf32> to vector<8x128xf32>
    %41 = arith.subf %35, %40 : vector<8x128xf32>
    %c0_17 = arith.constant 0 : index
    %c0_18 = arith.constant 0 : index
    %c0_19 = arith.constant 0 : index
    %42 = vector.load %arg6[%c0_17, %c0_18, %c0_19] : memref<1x8x128xf32, #tpu.memory_space<vmem>>, vector<1x8x128xf32>
    %43 = vector.shape_cast %42 : vector<1x8x128xf32> to vector<8x128xf32>
    %44 = vector.shape_cast %41 : vector<8x128xf32> to vector<1x8x128xf32>
    tpu.vector_store %arg6[%c0_17, %c0_18, %c0_19], %44 {strides = array<i32>} : memref<1x8x128xf32, #tpu.memory_space<vmem>>, vector<1x8x128xf32>,
    return
  }
  func.func @transform_0(%arg0: i32) -> (i32, i32, i32) {
    %c0_i32 = arith.constant 0 : i32
    %c0_i32_0 = arith.constant 0 : i32
    %c0_i32_1 = arith.constant 0 : i32
    return %arg0, %c0_i32, %c0_i32_0 : i32, i32, i32
  }
  func.func @transform_1(%arg0: i32) -> (i32, i32) {
    %c0_i32 = arith.constant 0 : i32
    %c0_i32_0 = arith.constant 0 : i32
    %c0_i32_1 = arith.constant 0 : i32
    return %c0_i32, %c0_i32_0 : i32, i32
  }
  func.func @transform_2(%arg0: i32) -> (i32, i32) {
    %c0_i32 = arith.constant 0 : i32
    %c0_i32_0 = arith.constant 0 : i32
    %c0_i32_1 = arith.constant 0 : i32
    return %c0_i32, %c0_i32_0 : i32, i32
  }
  func.func @transform_3(%arg0: i32) -> (i32, i32) {
    %c0_i32 = arith.constant 0 : i32
    %c0_i32_0 = arith.constant 0 : i32
    %c0_i32_1 = arith.constant 0 : i32
    return %c0_i32, %c0_i32_0 : i32, i32
  }
  func.func @transform_4(%arg0: i32) -> (i32, i32) {
    %c0_i32 = arith.constant 0 : i32
    %c0_i32_0 = arith.constant 0 : i32
    %c0_i32_1 = arith.constant 0 : i32
    return %c0_i32, %c0_i32_0 : i32, i32
  }
  func.func @transform_5(%arg0: i32) -> (i32, i32, i32) {
    %c0_i32 = arith.constant 0 : i32
    %c0_i32_0 = arith.constant 0 : i32
    %c0_i32_1 = arith.constant 0 : i32
    return %arg0, %c0_i32, %c0_i32_0 : i32, i32, i32
  }
}

</mosaic_0001>

<bundles_post_ra>
// kernel: transformer_forward.12
= control target key start
LH: loop header
LB: loop body
LE: loop exit
PB: predicated region body
PF: predicated region fallthrough
CT: control target
= control target key end

     0   :  { %s1477_s24 = smov 0   ;;  %s1479_s25 = smov 0   ;;  %s1695_s0 = inlined_call_operand.vmem [shape: f32[32,32], index: 0, kind: input, shape index: {}]   ;;  %s1696_s1 = inlined_call_operand.vmem [shape: bf16[32,2048], index: 1, kind: input, shape index: {}]   ;;  %s1697_s2 = inlined_call_operand.vmem [shape: f32[1,2048], index: 2, kind: input, shape index: {}]   ;;  %s1698_s3 = inlined_call_operand.vmem [shape: bf16[2048,32], index: 3, kind: input, shape index: {}]   ;;  %s1699_s4 = inlined_call_operand.vmem [shape: f32[1,32], index: 4, kind: input, shape index: {}]   ;;  %s1700_s5 = inlined_call_operand.vmem [shape: f32[1,32], index: 5, kind: input, shape index: {}]   ;;  %s1701_s6 = inlined_call_operand.vmem [shape: f32[1,32], index: 6, kind: input, shape index: {}]   ;;  %s1702_s7 = inlined_call_operand.vmem [shape: f32[32,32], index: 7, kind: output, shape index: {}]  }
   0x1   :  { %s1481_s26 = smov 0   ;;  %s1483_s27 = smov 0  }
   0x2   :  { %s1485_s28 = smov 0  }
   0x3 LB: > { %s26_s29 = sadd.s32 1, %s1430_s27  ;;  %p69_p1 = scmp.ne.s32.totalorder %s1422_s25, %s1418_s24  ;;  %s1434_s28 = sphi %s1485_s28, %s17_s28   ;;  %s1430_s27 = sphi %s1483_s27, %s1706_s27   ;;  %s1426_s26 = sphi %s1481_s26, %s1705_s26   ;;  %s1422_s25 = sphi %s1479_s25, %s1704_s25   ;;  %s1418_s24 = sphi %s1477_s24, %s1703_s24  }
   0x4   : > { %p27_p0 = scmp.ge.s32.totalorder %s26_s29, 4  ;;  %p70_p2 = scmp.eq.s32.totalorder %s1434_s28, 0 }
   0x5   : > { %s62_s8 = sadd.s32 1, %s1422_s25  ;;  %p1184_p5 = scmp.ge.s32.totalorder %s1434_s28, 4 }
   0x6   : > { %s1708_s29 = smov (%p27_p0, %s26_s29), 0  ;;  %p71_p3 = por %p70_p2, %p69_p1 }
   0x7   : > { %s59_s30 = ssub.s32 %s1430_s27, %s1708_s29  ;;  %254 = sbr.rel (%p1184_p5) target bundleno = 22 (0x16), region = 32 }
   0x8   : > { %p60_p4 = scmp.eq.s32.totalorder %s59_s30, 0 }
   0xa   : > { %s1512_s9 = scalar_select %p60_p4, %s1422_s25, %s62_s8  }
   0xe   : > { %257 = sbr.rel (!%p71_p3) target bundleno = 22 (0x16), region = 36  ;;  %s259_s10 = sand.u32 (%p71_p3), 1, %s1422_s25  }
   0xf   : > { %s1246_s11 = sshll.u32 (%p71_p3), %s1430_s27, 4  ;;  %s1185_s12 = sshll.u32 (%p71_p3), %s259_s10, 6 }
  0x10   : > { %s264_s15 = scalar_lea.vmem (%p71_p3), %s1696_s1, %s1246_s11  ;;  %s261_s16 = scalar_lea.vmem (%p71_p3), [#allocation2], %s1185_s12 }
  0x11   : > { %v277_v0 = vld [vmem:[%s264_s15] sm:$0xff] (%p71_p3)  ;;  %v279_v1 = vld [vmem:[%s264_s15 + $0x8] sm:$0xff] (%p71_p3) }
  0x12   : > { %v281_v2 = vld [vmem:[%s264_s15 + $0x40] sm:$0xff] (%p71_p3)  ;;  %278 = vst [vmem:[%s261_s16] sm:$0xff] (%p71_p3), %v277_v0  ;;  %280 = vst [vmem:[%s261_s16 + $0x8] sm:$0xff] (%p71_p3), %v279_v1  ;;  %v283_v3 = vld [vmem:[%s264_s15 + $0x48] sm:$0xff] (%p71_p3) }
  0x13   : > { %282 = vst [vmem:[%s261_s16 + $0x10] sm:$0xff] (%p71_p3), %v281_v2  ;;  %v285_v4 = vld [vmem:[%s264_s15 + $0x80] sm:$0xff] (%p71_p3)  ;;  %v287_v5 = vld [vmem:[%s264_s15 + $0x88] sm:$0xff] (%p71_p3)  ;;  %284 = vst [vmem:[%s261_s16 + $0x18] sm:$0xff] (%p71_p3), %v283_v3 }
  0x14   : > { %286 = vst [vmem:[%s261_s16 + $0x20] sm:$0xff] (%p71_p3), %v285_v4  ;;  %288 = vst [vmem:[%s261_s16 + $0x28] sm:$0xff] (%p71_p3), %v287_v5  ;;  %v289_v6 = vld [vmem:[%s264_s15 + $0xc0] sm:$0xff] (%p71_p3)  ;;  %v291_v7 = vld [vmem:[%s264_s15 + $0xc8] sm:$0xff] (%p71_p3) }
  0x15   : > { %290 = vst [vmem:[%s261_s16 + $0x30] sm:$0xff] %v289_v6  ;;  %292 = vst [vmem:[%s261_s16 + $0x38] sm:$0xff] %v291_v7 }
  0x16 PF: > { %p1188_p6 = scmp.ge.s32.totalorder %s1434_s28, 1  ;;  %p314_p7 = scmp.lt.s32.totalorder %s1434_s28, 5 }
  0x18   : > { %p315_p8 = pnand %p1188_p6, %p314_p7 }
  0x19   : > { %s321_s17 = sand.u32 (!%p315_p8), 1, %s1418_s24   ;;  %s1190_s18 = sshll.u32 (!%p315_p8), %s1426_s26, 2  ;;  %v391_v8 = vld [vmem:[%s1695_s0] sm:$0xff] (!%p315_p8)  ;;  %v392_v9 = vld [vmem:[%s1695_s0 + $0x8] sm:$0xff] (!%p315_p8)  ;;  %v1533_v10 = vld [vmem:[%s1695_s0 + $0x10] sm:$0xff] (!%p315_p8) }
  0x1a   : > { %318 = sbr.rel (%p315_p8) target bundleno = 827 (0x33b), region = 67  ;;  %s1189_s8 = sshll.u32 (!%p315_p8), %s321_s17, 6  ;;  %v394_v11 = vld [vmem:[%s1695_s0 + $0x18] sm:$0xff] (!%p315_p8) }
  0x1b   : > { %p374_p9 = scmp.lt.s32.totalorder (!%p315_p8), %s1190_s18, 15  ;;  %s1191_s24 = sshll.u32 (!%p315_p8), %s1426_s26, 6 }
  0x1c   : > { %p379_p10 = scmp.lt.s32.totalorder (!%p315_p8), %s1191_s24, 255  ;;  %s323_s20 = scalar_lea.vmem (!%p315_p8), [#allocation2], %s1189_s8 }
  0x1d   : > { %p1193_p11 = scmp.ne.s32.totalorder (!%p315_p8), %s1426_s26, 0 }
  0x21   : > { %s1710_s18 = smov (!%p374_p9, %s1190_s18), 15  ;;  %s1712_s24 = smov (!%p379_p10, %s1191_s24), 255 }
  0x22   : > { %s376_s14 = scalar_lea.vmem %s1697_s2, %s1710_s18  ;;  %s1192_s15 = sshll.u32 %s1712_s24, 2  ;;  %v1194_v12 = vld [vmem:[%s1699_s4] ss:$0 sm:$0xff] (!%p1193_p11)  ;;  %vm410_vm0 = vcmask (!%p1193_p11), 261120  }
  0x23   : > { %s1548_s17 = scalar_lea.vmem %s1698_s3, %s1192_s15  ;;  %398 = sbr.rel (%p1193_p11) target bundleno = 42 (0x2a), region = 75  ;;  %v406_v13 = vadd.f32 (!%p1193_p11), %v1194_v12, %v391_v8  ;;  %v407_v14 = vadd.f32 (!%p1193_p11), %v1194_v12, %v392_v9  ;;  %v408_v15 = vadd.f32 (!%p1193_p11), %v1194_v12, %v1533_v10  ;;  %v409_v16 = vadd.f32 (!%p1193_p11), %v1194_v12, %v394_v11 }
  0x25   : > { %411 = vst.msk [vmem:[%s1702_s7] sm:$0xff] (!%p1193_p11), %vm410_vm0, %v406_v13  ;;  %412 = vst.msk [vmem:[%s1702_s7 + $0x8] sm:$0xff] (!%p1193_p11), %vm410_vm0, %v407_v14 }
  0x26   : > { %413 = vst.msk [vmem:[%s1702_s7 + $0x10] sm:$0xff] (!%p1193_p11), %vm410_vm0, %v408_v15  ;;  %414 = vst.msk [vmem:[%s1702_s7 + $0x18] sm:$0xff] (!%p1193_p11), %vm410_vm0, %v409_v16 }
  0x2a PF: > { %v1344_v17 = vld [vmem:[%s323_s20 + $0x4] ss:$16 sps:$4 sm:$0xff]   ;;  %v1346_v18 = vld [vmem:[%s323_s20 + $0xc] ss:$16 sps:$4 sm:$0xff]   ;;  %v1436_v19 = vmov 0   ;;  %v415_v27 = vpack.c.bf16 %v392_v9, %v391_v8  ;;  %vm487_vm1 = vcmask 261120   ;;  %v416_v36 = vpack.c.bf16 %v394_v11, %v1533_v10 }
  0x2b   : > { %526 = vmatprep.mubr.bf16.mxu0 %v1436_v19  ;;  %579 = vmatprep.mubr.bf16.mxu1 %v1436_v19  ;;  %v1348_v20 = vld [vmem:[%s323_s20] ss:$16 sps:$4 sm:$0xff]   ;;  %v1349_v21 = vld [vmem:[%s323_s20 + $0x8] ss:$16 sps:$4 sm:$0xff]   ;;  %v1350_v22 = vld [vmem:[%s323_s20 + $0x24] ss:$16 sps:$4 sm:$0xff]   ;;  %v427_v60 = vlaneseq }
  0x2c   : > { %494 = vmatprep.subr.bf16.mxu0 %v1344_v17  ;;  %547 = vmatprep.subr.bf16.mxu1 %v1346_v18  ;;  %v1352_v23 = vld [vmem:[%s323_s20 + $0x2c] ss:$16 sps:$4 sm:$0xff]   ;;  %v1354_v24 = vld [vmem:[%s323_s20 + $0x20] ss:$16 sps:$4 sm:$0xff]   ;;  %v1355_v25 = vld [vmem:[%s323_s20 + $0x28] ss:$16 sps:$4 sm:$0xff]  }
  0x2d   : > { %495 = vmatpush1.bf16.msra.mxu0 %v1348_v20  ;;  %548 = vmatpush1.bf16.msra.mxu1 %v1349_v21  ;;  %v1356_v26 = vld [vmem:[%s1548_s17 + $0x40] sm:$0xff]   ;;  %v1360_v31 = vld [vmem:[%s1548_s17 + $0x48] sm:$0xff]   ;;  %v1364_v35 = vld [vmem:[%s1548_s17 + $0x50] sm:$0xff]   ;;  %v428_v61 = vshrl.u32 %v427_v60, 7  ;;  %p1239_p12 = scmp.ne.s32.totalorder %s1426_s26, 3 }
  0x2e   : > { %496 = vmatprep.subr.bf16.mxu0 %v1350_v22  ;;  %549 = vmatprep.subr.bf16.mxu1 %v1352_v23  ;;  %v1357_v28 = vld [vmem:[%s1548_s17 + $0xc0] sm:$0xff]   ;;  %v1361_v32 = vld [vmem:[%s1548_s17 + $0xc8] sm:$0xff]   ;;  %v1365_v37 = vld [vmem:[%s1548_s17 + $0xd0] sm:$0xff]  }
  0x2f   : > { %v1358_v29 = vld [vmem:[%s1548_s17] sm:$0xff]   ;;  %v1362_v33 = vld [vmem:[%s1548_s17 + $0x8] sm:$0xff]   ;;  %v1366_v38 = vld [vmem:[%s1548_s17 + $0x10] sm:$0xff]   ;;  %v429_v62 = vsub.s32 0, %v428_v61  ;;  %v437_v63 = vsub.s32 2, %v428_v61  ;;  %v433_v1 = vsub.s32 1, %v428_v61 }
  0x30   : > { %v1359_v30 = vld [vmem:[%s1548_s17 + $0x80] sm:$0xff]   ;;  %v1363_v34 = vld [vmem:[%s1548_s17 + $0x88] sm:$0xff]   ;;  %v1367_v39 = vld [vmem:[%s1548_s17 + $0x90] sm:$0xff]   ;;  %v441_v2 = vsub.s32 3, %v428_v61 }
  0x31   : > { %497 = vmatpush1.bf16.msra.mxu0 %v1354_v24  ;;  %550 = vmatpush1.bf16.msra.mxu1 %v1355_v25  ;;  %v1368_v40 = vld [vmem:[%s1548_s17 + $0x58] sm:$0xff]   ;;  %v1372_v44 = vld [vmem:[%s1548_s17 + $0x60] sm:$0xff]   ;;  %v1376_v48 = vld [vmem:[%s1548_s17 + $0x68] sm:$0xff]  }
  0x32   : > { %1247 = vmatprep.subr.bf16.mxu0 %v1356_v26  ;;  %1275 = vmatprep.subr.bf16.mxu1 %v1357_v28  ;;  %v1369_v41 = vld [vmem:[%s1548_s17 + $0xd8] sm:$0xff]   ;;  %v1373_v45 = vld [vmem:[%s1548_s17 + $0xe0] sm:$0xff]   ;;  %v1377_v49 = vld [vmem:[%s1548_s17 + $0xe8] sm:$0xff]  }
  0x33   : > { %v1370_v42 = vld [vmem:[%s1548_s17 + $0x18] sm:$0xff]   ;;  %v1374_v46 = vld [vmem:[%s1548_s17 + $0x20] sm:$0xff]   ;;  %v1378_v50 = vld [vmem:[%s1548_s17 + $0x28] sm:$0xff]  }
  0x34   : > { %1203 = vmatmul.mubr.msk.bf16.vlgmr.msra.gmra.mrb[0].mxu0 %vm487_vm1, %v415_v27  ;;  %1205 = vmatmul.mubr.msk.bf16.vlgmr.msra.gmra.mrb[0].mxu1 %vm487_vm1, %v415_v27  ;;  %v1371_v43 = vld [vmem:[%s1548_s17 + $0x98] sm:$0xff]   ;;  %v1375_v47 = vld [vmem:[%s1548_s17 + $0xa0] sm:$0xff]   ;;  %v1379_v51 = vld [vmem:[%s1548_s17 + $0xa8] sm:$0xff]  }
  0x35   : > { %536 = vmatprep.mubr.bf16.mxu0 %v1436_v19  ;;  %589 = vmatprep.mubr.bf16.mxu1 %v1436_v19  ;;  %v1380_v52 = vld [vmem:[%s1548_s17 + $0x70] sm:$0xff]   ;;  %v1384_v56 = vld [vmem:[%s1548_s17 + $0x78] sm:$0xff]   ;;  %v425_v0 = vld [vmem:[%s376_s14] sm:$0xf] }
  0x36   : > { %1248 = vmatpush3.bf16.msra.mxu0 %v1358_v29  ;;  %1276 = vmatpush3.bf16.msra.mxu1 %v1359_v30  ;;  %v1381_v53 = vld [vmem:[%s1548_s17 + $0xf0] sm:$0xff]   ;;  %v1385_v57 = vld [vmem:[%s1548_s17 + $0xf8] sm:$0xff]   ;;  %v430_v3 = vrot.slane %v425_v0, %v429_v62  ;;  %v438_v4 = vrot.slane %v425_v0, %v437_v63  ;;  %v434_v5 = vrot.slane %v425_v0, %v433_v1 }
  0x37   : > { %1249 = vmatprep.subr.bf16.mxu0 %v1360_v31  ;;  %1277 = vmatprep.subr.bf16.mxu1 %v1361_v32  ;;  %v1382_v54 = vld [vmem:[%s1548_s17 + $0x30] sm:$0xff]   ;;  %v1386_v58 = vld [vmem:[%s1548_s17 + $0x38] sm:$0xff]   ;;  %v442_v6 = vrot.slane %v425_v0, %v441_v2 }
  0x38   : > { %v1383_v55 = vld [vmem:[%s1548_s17 + $0xb0] sm:$0xff]   ;;  %v1387_v59 = vld [vmem:[%s1548_s17 + $0xb8] sm:$0xff]  }
  0x3a   : > { %1250 = vmatpush3.bf16.msra.mxu0 %v1362_v33  ;;  %1278 = vmatpush3.bf16.msra.mxu1 %v1363_v34 }
  0x3b   : > { %1251 = vmatprep.subr.bf16.mxu0 %v1364_v35  ;;  %1279 = vmatprep.subr.bf16.mxu1 %v1365_v37 }
  0x3c   : > { %1204 = vmatmul.mubr.msk.bf16.gmra.mrb[4].mxu0 %vm487_vm1, %v416_v36  ;;  %1206 = vmatmul.mubr.msk.bf16.gmra.mrb[4].mxu1 %vm487_vm1, %v416_v36 }
  0x3e   : > { %1252 = vmatpush3.bf16.msra.mxu0 %v1366_v38  ;;  %1280 = vmatpush3.bf16.msra.mxu1 %v1367_v39 }
  0x3f   : > { %1253 = vmatprep.subr.bf16.mxu0 %v1368_v40  ;;  %1281 = vmatprep.subr.bf16.mxu1 %v1369_v41 }
  0x42   : > { %1254 = vmatpush3.bf16.msra.mxu0 %v1370_v42  ;;  %1282 = vmatpush3.bf16.msra.mxu1 %v1371_v43 }
  0x43   : > { %1255 = vmatprep.subr.bf16.mxu0 %v1372_v44  ;;  %1283 = vmatprep.subr.bf16.mxu1 %v1373_v45 }
  0x46   : > { %1256 = vmatpush3.bf16.msra.mxu0 %v1374_v46  ;;  %1284 = vmatpush3.bf16.msra.mxu1 %v1375_v47 }
  0x47   : > { %1257 = vmatprep.subr.bf16.mxu0 %v1376_v48  ;;  %1285 = vmatprep.subr.bf16.mxu1 %v1377_v49 }
  0x4a   : > { %1258 = vmatpush3.bf16.msra.mxu0 %v1378_v50  ;;  %1286 = vmatpush3.bf16.msra.mxu1 %v1379_v51 }
  0x4b   : > { %1259 = vmatprep.subr.bf16.mxu0 %v1380_v52  ;;  %1287 = vmatprep.subr.bf16.mxu1 %v1381_v53 }
  0x4e   : > { %1260 = vmatpush3.bf16.msra.mxu0 %v1382_v54  ;;  %1288 = vmatpush3.bf16.msra.mxu1 %v1383_v55 }
  0x4f   : > { %1261 = vmatprep.subr.bf16.mxu0 %v1384_v56  ;;  %1289 = vmatprep.subr.bf16.mxu1 %v1385_v57 }
  0x52   : > { %1262 = vmatpush3.bf16.msra.mxu0 %v1386_v58  ;;  %1290 = vmatpush3.bf16.msra.mxu1 %v1387_v59 }
 0x107   : > { %v528_v7 = vpop.f32.mrb[0].mxu0  ;;  %v581_v8 = vpop.f32.mrb[0].mxu1 }
 0x108   : > { %v529_v9 = vadd.f32 %v528_v7, %v430_v3  ;;  %v582_v10 = vadd.f32 %v581_v8, %v438_v4  ;;  %v530_v11 = vpop.f32.mrb[1].mxu0  ;;  %v583_v12 = vpop.f32.mrb[1].mxu1  ;;  %v616_v7 = vld [vmem:[%s1702_s7] sm:$0xff] }
 0x109   : > { %v531_v13 = vadd.f32 %v530_v11, %v434_v5  ;;  %v584_v14 = vadd.f32 %v583_v12, %v442_v6  ;;  %v532_v15 = vpop.f32.mrb[2].mxu0  ;;  %v585_v16 = vpop.f32.mrb[2].mxu1 }
 0x10a   : > { %v533_v17 = vadd.f32 %v532_v15, %v430_v3  ;;  %v586_v18 = vadd.f32 %v585_v16, %v438_v4  ;;  %v534_v19 = vpop.f32.mrb[3].mxu0  ;;  %v587_v20 = vpop.f32.mrb[3].mxu1  ;;  %v600_v23 = vmax.f32 %v529_v9, 0.0  ;;  %v602_v24 = vmax.f32 %v582_v10, 0.0 }
 0x10b   : > { %v535_v21 = vadd.f32 %v534_v19, %v434_v5  ;;  %v588_v22 = vadd.f32 %v587_v20, %v442_v6  ;;  %v601_v27 = vmax.f32 %v531_v13, 0.0  ;;  %v603_v28 = vmax.f32 %v584_v14, 0.0  ;;  %v617_v13 = vld [vmem:[%s1702_s7 + $0x8] sm:$0xff] }
 0x10c   : > { %v604_v25 = vmax.f32 %v533_v17, 0.0  ;;  %v606_v26 = vmax.f32 %v586_v18, 0.0 }
 0x10d   : > { %v605_v29 = vmax.f32 %v535_v21, 0.0  ;;  %v607_v30 = vmax.f32 %v588_v22, 0.0 }
 0x10e   : > { %v620_v31 = vpack.c.bf16 %v604_v25, %v600_v23  ;;  %v622_v32 = vpack.c.bf16 %v606_v26, %v602_v24  ;;  %v618_v25 = vld [vmem:[%s1702_s7 + $0x10] sm:$0xff] }
 0x10f   : > { %v621_v33 = vpack.c.bf16 %v605_v29, %v601_v27  ;;  %v623_v34 = vpack.c.bf16 %v607_v30, %v603_v28  ;;  %v538_v35 = vpop.f32.mrb[4].mxu0  ;;  %v591_v36 = vpop.f32.mrb[4].mxu1 }
 0x110   : > { %v539_v37 = vadd.f32 %v538_v35, %v430_v3  ;;  %v592_v38 = vadd.f32 %v591_v36, %v438_v4  ;;  %v540_v39 = vpop.f32.mrb[5].mxu0  ;;  %v593_v40 = vpop.f32.mrb[5].mxu1 }
 0x111   : > { %v541_v41 = vadd.f32 %v540_v39, %v434_v5  ;;  %v594_v42 = vadd.f32 %v593_v40, %v442_v6  ;;  %v542_v43 = vpop.f32.mrb[6].mxu0  ;;  %v595_v44 = vpop.f32.mrb[6].mxu1  ;;  %916 = vmatprep.mubr.bf16.mxu0 %v621_v33  ;;  %965 = vmatprep.mubr.bf16.mxu1 %v623_v34 }
 0x112   : > { %v543_v45 = vadd.f32 %v542_v43, %v430_v3  ;;  %v596_v46 = vadd.f32 %v595_v44, %v438_v4  ;;  %v544_v47 = vpop.f32.mrb[7].mxu0  ;;  %v597_v48 = vpop.f32.mrb[7].mxu1  ;;  %917 = vmatmul.mubr.bf16.vlgmr.msra.gmra.mrb[8].mxu0 %v620_v31  ;;  %966 = vmatmul.mubr.bf16.vlgmr.msra.gmra.mrb[8].mxu1 %v622_v32  ;;  %v608_v51 = vmax.f32 %v539_v37, 0.0  ;;  %v610_v52 = vmax.f32 %v592_v38, 0.0  ;;  %v619_v31 = vld [vmem:[%s1702_s7 + $0x18] sm:$0xff] }
 0x113   : > { %v545_v49 = vadd.f32 %v544_v47, %v434_v5  ;;  %v598_v50 = vadd.f32 %v597_v48, %v442_v6  ;;  %v609_v55 = vmax.f32 %v541_v41, 0.0  ;;  %v611_v56 = vmax.f32 %v594_v42, 0.0 }
 0x114   : > { %v612_v53 = vmax.f32 %v543_v45, 0.0  ;;  %v614_v54 = vmax.f32 %v596_v46, 0.0 }
 0x115   : > { %v613_v57 = vmax.f32 %v545_v49, 0.0  ;;  %v615_v58 = vmax.f32 %v598_v50, 0.0 }
 0x116   : > { %v624_v59 = vpack.c.bf16 %v612_v53, %v608_v51  ;;  %v626_v60 = vpack.c.bf16 %v614_v54, %v610_v52 }
 0x117   : > { %v625_v61 = vpack.c.bf16 %v613_v57, %v609_v55  ;;  %v627_v62 = vpack.c.bf16 %v615_v58, %v611_v56 }
 0x119   : > { %924 = vmatprep.mubr.bf16.mxu0 %v625_v61  ;;  %973 = vmatprep.mubr.bf16.mxu1 %v627_v62 }
 0x11a   : > { %925 = vmatmul.mubr.bf16.gmra.mrb[12].mxu0 %v624_v59  ;;  %974 = vmatmul.mubr.bf16.gmra.mrb[12].mxu1 %v626_v60 }
 0x1e5   : > { %v1263_v63 = vpop.f32.mrb[8].mxu0  ;;  %v1291_v0 = vpop.f32.mrb[8].mxu1 }
 0x1e6   : > { %v1264_v1 = vpop.f32.mrb[9].mxu0  ;;  %v1292_v2 = vpop.f32.mrb[9].mxu1 }
 0x1e7   : > { %v1265_v3 = vadd.f32 %v1264_v1, %v1263_v63  ;;  %v1293_v4 = vadd.f32 %v1292_v2, %v1291_v0  ;;  %v1266_v5 = vpop.f32.mrb[10].mxu0  ;;  %v1294_v6 = vpop.f32.mrb[10].mxu1 }
 0x1e8   : > { %v1267_v8 = vpop.f32.mrb[11].mxu0  ;;  %v1295_v9 = vpop.f32.mrb[11].mxu1 }
 0x1e9   : > { %v968_v10 = vadd.f32 %v1293_v4, %v1265_v3  ;;  %v1268_v11 = vadd.f32 %v1267_v8, %v1266_v5  ;;  %v1296_v12 = vadd.f32 %v1295_v9, %v1294_v6 }
 0x1eb   : > { %v982_v14 = vadd.f32 %v968_v10, %v616_v7  ;;  %v971_v15 = vadd.f32 %v1296_v12, %v1268_v11  ;;  %v1240_v12 = vld [vmem:[%s1700_s5] ss:$0 sm:$0xff] (!%p1239_p12) }
 0x1ed   : > { %986 = vst.msk [vmem:[%s1702_s7] sm:$0xff] %vm487_vm1, %v982_v14  ;;  %v983_v16 = vadd.f32 %v971_v15, %v617_v13  ;;  %v1269_v17 = vpop.f32.mrb[12].mxu0  ;;  %v1297_v18 = vpop.f32.mrb[12].mxu1  ;;  %v1241_v14 = vld [vmem:[%s1701_s6] ss:$0 sm:$0xff] (!%p1239_p12) }
 0x1ee   : > { %v1270_v19 = vpop.f32.mrb[13].mxu0  ;;  %v1298_v20 = vpop.f32.mrb[13].mxu1 }
 0x1ef   : > { %987 = vst.msk [vmem:[%s1702_s7 + $0x8] sm:$0xff] %vm487_vm1, %v983_v16  ;;  %v1271_v21 = vadd.f32 %v1270_v19, %v1269_v17  ;;  %v1299_v22 = vadd.f32 %v1298_v20, %v1297_v18  ;;  %v1272_v23 = vpop.f32.mrb[14].mxu0  ;;  %v1300_v24 = vpop.f32.mrb[14].mxu1 }
 0x1f0   : > { %v1273_v26 = vpop.f32.mrb[15].mxu0  ;;  %v1301_v27 = vpop.f32.mrb[15].mxu1 }
 0x1f1   : > { %v976_v28 = vadd.f32 %v1299_v22, %v1271_v21  ;;  %v1274_v29 = vadd.f32 %v1273_v26, %v1272_v23  ;;  %v1302_v30 = vadd.f32 %v1301_v27, %v1300_v24  ;;  %993 = sbr.rel (%p1239_p12) target bundleno = 827 (0x33b), region = 79 }
 0x1f3   : > { %v984_v32 = vadd.f32 %v976_v28, %v618_v25  ;;  %v979_v33 = vadd.f32 %v1302_v30, %v1274_v29 }
 0x1f4   : > { %v994_v35 = vld [vmem:[%s1702_s7] sm:$0xff] (!%p1239_p12) }
 0x1f5   : > { %988 = vst.msk [vmem:[%s1702_s7 + $0x10] sm:$0xff] %vm487_vm1, %v984_v32  ;;  %v985_v34 = vadd.f32 %v979_v33, %v619_v31  ;;  %v1000_v38 = vsel (!%p1239_p12), %vm487_vm1, %v994_v35, 0.0 }
 0x1f6   : > { %v995_v37 = vld [vmem:[%s1702_s7 + $0x8] sm:$0xff] (!%p1239_p12)  ;;  %1001 = vadd.xlane.f32.xlu0 (!%p1239_p12), %v1000_v38 }
 0x1f7   : > { %989 = vst.msk [vmem:[%s1702_s7 + $0x18] sm:$0xff] %vm487_vm1, %v985_v34  ;;  %v1003_v41 = vsel (!%p1239_p12), %vm487_vm1, %v995_v37, 0.0 }
 0x1fa   : > { %1004 = vadd.xlane.f32.xlu0 %v1003_v41 }
 0x1fc   : > { %v996_v36 = vld [vmem:[%s1702_s7 + $0x10] sm:$0xff] }
 0x1fd   : > { %v1006_v39 = vsel %vm487_vm1, %v996_v36, 0.0 }
 0x1fe   : > { %v997_v40 = vld [vmem:[%s1702_s7 + $0x18] sm:$0xff]  ;;  %1007 = vadd.xlane.f32.xlu1 %v1006_v39 }
 0x1ff   : > { %v1009_v42 = vsel %vm487_vm1, %v997_v40, 0.0 }
 0x202   : > { %1010 = vadd.xlane.f32.xlu1 %v1009_v42 }
 0x283   : > { %v1002_v43 = vpop.xlane.xlu0 %1001 }
 0x284   : > { %v1013_v45 = vmul.f32 0.03125, %v1002_v43 }
 0x286   : > { %v1017_v47 = vsub.f32 %v994_v35, %v1013_v45 }
 0x287   : > { %v1005_v49 = vpop.xlane.xlu0 %1004 }
 0x288   : > { %v1014_v51 = vmul.f32 0.03125, %v1005_v49  ;;  %v1021_v53 = vmul.f32 %v1017_v47, %v1017_v47 }
 0x28a   : > { %v1018_v55 = vsub.f32 %v995_v37, %v1014_v51  ;;  %v1025_v57 = vsel %vm487_vm1, %v1021_v53, 0.0 }
 0x28b   : > { %v1008_v44 = vpop.xlane.xlu1 %1007  ;;  %1026 = vadd.xlane.f32.xlu0 %v1025_v57 }
 0x28c   : > { %v1015_v46 = vmul.f32 0.03125, %v1008_v44  ;;  %v1022_v59 = vmul.f32 %v1018_v55, %v1018_v55 }
 0x28e   : > { %v1019_v48 = vsub.f32 %v996_v36, %v1015_v46  ;;  %v1028_v61 = vsel %vm487_vm1, %v1022_v59, 0.0 }
 0x28f   : > { %v1011_v50 = vpop.xlane.xlu1 %1010  ;;  %1029 = vadd.xlane.f32.xlu1 %v1028_v61 }
 0x290   : > { %v1016_v52 = vmul.f32 0.03125, %v1011_v50  ;;  %v1023_v54 = vmul.f32 %v1019_v48, %v1019_v48 }
 0x292   : > { %v1020_v56 = vsub.f32 %v997_v40, %v1016_v52  ;;  %v1031_v58 = vsel %vm487_vm1, %v1023_v54, 0.0 }
 0x293   : > { %1032 = vadd.xlane.f32.xlu0 %v1031_v58 }
 0x294   : > { %v1024_v60 = vmul.f32 %v1020_v56, %v1020_v56 }
 0x296   : > { %v1034_v62 = vsel %vm487_vm1, %v1024_v60, 0.0 }
 0x297   : > { %1035 = vadd.xlane.f32.xlu1 %v1034_v62 }
 0x318   : > { %v1027_v63 = vpop.xlane.xlu0 %1026 }
 0x319   : > { %v1037_v0 = vmul.f32 0.03125, %v1027_v63 }
 0x31b   : > { %v1041_v1 = vadd.f32 1e-05, %v1037_v0 }
 0x31c   : > { %v1030_v2 = vpop.xlane.xlu1 %1029 }
 0x31d   : > { %1388 = vrsqrt.f32 %v1041_v1  ;;  %v1038_v4 = vmul.f32 0.03125, %v1030_v2 }
 0x31f   : > { %v1042_v6 = vadd.f32 1e-05, %v1038_v4 }
 0x320   : > { %v1033_v3 = vpop.xlane.xlu0 %1032 }
 0x321   : > { %v1039_v5 = vmul.f32 0.03125, %v1033_v3  ;;  %1390 = vrsqrt.f32 %v1042_v6 }
 0x323   : > { %v1043_v7 = vadd.f32 1e-05, %v1039_v5 }
 0x324   : > { %v1036_v8 = vpop.xlane.xlu1 %1035 }
 0x325   : > { %v1040_v9 = vmul.f32 0.03125, %v1036_v8  ;;  %1392 = vrsqrt.f32 %v1043_v7 }
 0x327   : > { %v1044_v10 = vadd.f32 1e-05, %v1040_v9  ;;  %v1389_v11 = vpop.eup %1388 }
 0x328   : > { %v1049_v13 = vmul.f32 %v1389_v11, %v1017_v47 }
 0x329   : > { %1394 = vrsqrt.f32 %v1044_v10 }
 0x32a   : > { %v1059_v15 = vmul.f32 %v1240_v12, %v1049_v13 }
 0x32b   : > { %v1391_v16 = vpop.eup %1390 }
 0x32c   : > { %v1069_v18 = vadd.f32 %v1241_v14, %v1059_v15  ;;  %v1050_v19 = vmul.f32 %v1391_v16, %v1018_v55 }
 0x32e   : > { %1073 = vst.msk [vmem:[%s1702_s7] sm:$0xff] %vm487_vm1, %v1069_v18  ;;  %v1060_v21 = vmul.f32 %v1240_v12, %v1050_v19 }
 0x32f   : > { %v1393_v17 = vpop.eup %1392 }
 0x330   : > { %v1051_v20 = vmul.f32 %v1393_v17, %v1019_v48  ;;  %v1070_v24 = vadd.f32 %v1241_v14, %v1060_v21 }
 0x332   : > { %v1061_v23 = vmul.f32 %v1240_v12, %v1051_v20  ;;  %1074 = vst.msk [vmem:[%s1702_s7 + $0x8] sm:$0xff] %vm487_vm1, %v1070_v24 }
 0x333   : > { %v1395_v22 = vpop.eup %1394 }
 0x334   : > { %v1052_v25 = vmul.f32 %v1395_v22, %v1020_v56  ;;  %v1071_v26 = vadd.f32 %v1241_v14, %v1061_v23 }
 0x336   : > { %v1062_v27 = vmul.f32 %v1240_v12, %v1052_v25  ;;  %1075 = vst.msk [vmem:[%s1702_s7 + $0x10] sm:$0xff] %vm487_vm1, %v1071_v26 }
 0x338   : > { %v1072_v28 = vadd.f32 %v1241_v14, %v1062_v27 }
 0x33a   : > { %1076 = vst.msk [vmem:[%s1702_s7 + $0x18] sm:$0xff] %vm487_vm1, %v1072_v28 }
 0x33b PF: > { %s17_s28 = sadd.s32 1, %s1434_s28   ;;  %s1703_s24 = smov %s1422_s25 }
 0x33c   : > { %p14_p13 = scmp.ge.s32.totalorder %s17_s28, 6   ;;  %s1704_s25 = smov %s1512_s9 }
 0x33d   : > { %s1705_s26 = smov %s1430_s27  ;;  %s1706_s27 = smov %s1708_s29 }
 0x33e   :  { %16 = sbr.rel (!%p14_p13) target bundleno = 3 (0x3), region = 123 }

// kernel: transformer_forward.14
= control target key start
LH: loop header
LB: loop body
LE: loop exit
PB: predicated region body
PF: predicated region fallthrough
CT: control target
= control target key end

     0   :  { %s1625_s30 = smov 0   ;;  %s1627_s10 = smov 0   ;;  %s1857_s0 = inlined_call_operand.vmem [shape: f32[32,32], index: 0, kind: input, shape index: {}]   ;;  %s1858_s1 = inlined_call_operand.vmem [shape: bf16[32,2048], index: 1, kind: input, shape index: {}]   ;;  %s1859_s2 = inlined_call_operand.vmem [shape: f32[1,2048], index: 2, kind: input, shape index: {}]   ;;  %s1860_s3 = inlined_call_operand.vmem [shape: bf16[2048,32], index: 3, kind: input, shape index: {}]   ;;  %s1861_s4 = inlined_call_operand.vmem [shape: f32[1,32], index: 4, kind: input, shape index: {}]   ;;  %s1862_s5 = inlined_call_operand.vmem [shape: f32[1,32], index: 5, kind: input, shape index: {}]   ;;  %s1863_s6 = inlined_call_operand.vmem [shape: f32[1,32], index: 6, kind: input, shape index: {}]   ;;  %s1864_s7 = inlined_call_operand.vmem [shape: f32[1,32], index: 7, kind: input, shape index: {}]   ;;  %s1865_s8 = inlined_call_operand.vmem [shape: f32[1,32], index: 8, kind: input, shape index: {}]   ;;  %s1866_s9 = inlined_call_operand.vmem [shape: f32[32,32], index: 9, kind: output, shape index: {}]  }
   0x1   :  { %s1629_s11 = smov 0   ;;  %s1631_s12 = smov 0  }
   0x2   :  { %s1633_s13 = smov 0  }
   0x3 LB: > { %s28_s14 = sadd.s32 1, %s1568_s12  ;;  %p71_p1 = scmp.ne.s32.totalorder %s1560_s10, %s1556_s30  ;;  %s1572_s13 = sphi %s1633_s13, %s19_s13   ;;  %s1568_s12 = sphi %s1631_s12, %s1870_s12   ;;  %s1564_s11 = sphi %s1629_s11, %s1869_s11   ;;  %s1560_s10 = sphi %s1627_s10, %s1868_s10   ;;  %s1556_s30 = sphi %s1625_s30, %s1867_s30  }
   0x4   : > { %p29_p0 = scmp.ge.s32.totalorder %s28_s14, 4  ;;  %p72_p2 = scmp.eq.s32.totalorder %s1572_s13, 0 }
   0x5   : > { %s64_s16 = sadd.s32 1, %s1560_s10  ;;  %p1312_p5 = scmp.ge.s32.totalorder %s1572_s13, 4 }
   0x6   : > { %s1872_s14 = smov (%p29_p0, %s28_s14), 0  ;;  %p73_p3 = por %p72_p2, %p71_p1 }
   0x7   : > { %s61_s15 = ssub.s32 %s1568_s12, %s1872_s14  ;;  %304 = sbr.rel (%p1312_p5) target bundleno = 22 (0x16), region = 40 }
   0x8   : > { %p62_p4 = scmp.eq.s32.totalorder %s61_s15, 0 }
   0xa   : > { %s1660_s17 = scalar_select %p62_p4, %s1560_s10, %s64_s16  }
   0xe   : > { %307 = sbr.rel (!%p73_p3) target bundleno = 22 (0x16), region = 44  ;;  %s309_s18 = sand.u32 (%p73_p3), 1, %s1560_s10  }
   0xf   : > { %s1376_s19 = sshll.u32 (%p73_p3), %s1568_s12, 4  ;;  %s1313_s20 = sshll.u32 (%p73_p3), %s309_s18, 6 }
  0x10   : > { %s314_s23 = scalar_lea.vmem (%p73_p3), %s1858_s1, %s1376_s19  ;;  %s311_s24 = scalar_lea.vmem (%p73_p3), [#allocation2], %s1313_s20 }
  0x11   : > { %v327_v0 = vld [vmem:[%s314_s23] sm:$0xff] (%p73_p3)  ;;  %v329_v1 = vld [vmem:[%s314_s23 + $0x8] sm:$0xff] (%p73_p3) }
  0x12   : > { %v331_v2 = vld [vmem:[%s314_s23 + $0x40] sm:$0xff] (%p73_p3)  ;;  %328 = vst [vmem:[%s311_s24] sm:$0xff] (%p73_p3), %v327_v0  ;;  %330 = vst [vmem:[%s311_s24 + $0x8] sm:$0xff] (%p73_p3), %v329_v1  ;;  %v333_v3 = vld [vmem:[%s314_s23 + $0x48] sm:$0xff] (%p73_p3) }
  0x13   : > { %332 = vst [vmem:[%s311_s24 + $0x10] sm:$0xff] (%p73_p3), %v331_v2  ;;  %v335_v4 = vld [vmem:[%s314_s23 + $0x80] sm:$0xff] (%p73_p3)  ;;  %v337_v5 = vld [vmem:[%s314_s23 + $0x88] sm:$0xff] (%p73_p3)  ;;  %334 = vst [vmem:[%s311_s24 + $0x18] sm:$0xff] (%p73_p3), %v333_v3 }
  0x14   : > { %336 = vst [vmem:[%s311_s24 + $0x20] sm:$0xff] (%p73_p3), %v335_v4  ;;  %338 = vst [vmem:[%s311_s24 + $0x28] sm:$0xff] (%p73_p3), %v337_v5  ;;  %v339_v6 = vld [vmem:[%s314_s23 + $0xc0] sm:$0xff] (%p73_p3)  ;;  %v341_v7 = vld [vmem:[%s314_s23 + $0xc8] sm:$0xff] (%p73_p3) }
  0x15   : > { %340 = vst [vmem:[%s311_s24 + $0x30] sm:$0xff] %v339_v6  ;;  %342 = vst [vmem:[%s311_s24 + $0x38] sm:$0xff] %v341_v7 }
  0x16 PF: > { %p1316_p6 = scmp.ge.s32.totalorder %s1572_s13, 1  ;;  %p364_p7 = scmp.lt.s32.totalorder %s1572_s13, 5 }
  0x18   : > { %p365_p8 = pnand %p1316_p6, %p364_p7 }
  0x19   : > { %s371_s25 = sand.u32 (!%p365_p8), 1, %s1556_s30   ;;  %s1318_s26 = sshll.u32 (!%p365_p8), %s1564_s11, 2  ;;  %v445_v8 = vld [vmem:[%s1857_s0] sm:$0xff] (!%p365_p8)  ;;  %v446_v9 = vld [vmem:[%s1857_s0 + $0x8] sm:$0xff] (!%p365_p8)  ;;  %v1681_v10 = vld [vmem:[%s1857_s0 + $0x10] sm:$0xff] (!%p365_p8) }
  0x1a   : > { %368 = sbr.rel (%p365_p8) target bundleno = 1140 (0x474), region = 75  ;;  %s1317_s19 = sshll.u32 (!%p365_p8), %s371_s25, 6  ;;  %v448_v11 = vld [vmem:[%s1857_s0 + $0x18] sm:$0xff] (!%p365_p8) }
  0x1b   : > { %p428_p9 = scmp.lt.s32.totalorder (!%p365_p8), %s1318_s26, 15  ;;  %s1319_s30 = sshll.u32 (!%p365_p8), %s1564_s11, 6 }
  0x1c   : > { %p433_p10 = scmp.lt.s32.totalorder (!%p365_p8), %s1319_s30, 255  ;;  %s373_s15 = scalar_lea.vmem (!%p365_p8), [#allocation2], %s1317_s19 }
  0x1d   : > { %p1321_p11 = scmp.ne.s32.totalorder (!%p365_p8), %s1564_s11, 0 }
  0x21   : > { %s1874_s26 = smov (!%p428_p9, %s1318_s26), 15  ;;  %s1876_s30 = smov (!%p433_p10, %s1319_s30), 255 }
  0x22   : > { %s430_s24 = scalar_lea.vmem %s1859_s2, %s1874_s26  ;;  %s1320_s27 = sshll.u32 %s1876_s30, 2  ;;  %v1322_v12 = vld [vmem:[%s1861_s4] ss:$0 sm:$0xff] (!%p1321_p11)  ;;  %vm464_vm0 = vcmask (!%p1321_p11), 261120  }
  0x23   : > { %s1696_s25 = scalar_lea.vmem %s1860_s3, %s1320_s27  ;;  %452 = sbr.rel (%p1321_p11) target bundleno = 42 (0x2a), region = 83  ;;  %v460_v13 = vadd.f32 (!%p1321_p11), %v1322_v12, %v445_v8  ;;  %v461_v14 = vadd.f32 (!%p1321_p11), %v1322_v12, %v446_v9  ;;  %v462_v15 = vadd.f32 (!%p1321_p11), %v1322_v12, %v1681_v10  ;;  %v463_v16 = vadd.f32 (!%p1321_p11), %v1322_v12, %v448_v11 }
  0x25   : > { %465 = vst.msk [vmem:[%s1866_s9] sm:$0xff] (!%p1321_p11), %vm464_vm0, %v460_v13  ;;  %466 = vst.msk [vmem:[%s1866_s9 + $0x8] sm:$0xff] (!%p1321_p11), %vm464_vm0, %v461_v14 }
  0x26   : > { %467 = vst.msk [vmem:[%s1866_s9 + $0x10] sm:$0xff] (!%p1321_p11), %vm464_vm0, %v462_v15  ;;  %468 = vst.msk [vmem:[%s1866_s9 + $0x18] sm:$0xff] (!%p1321_p11), %vm464_vm0, %v463_v16 }
  0x2a PF: > { %v1474_v17 = vld [vmem:[%s373_s15 + $0x4] ss:$16 sps:$4 sm:$0xff]   ;;  %v1476_v18 = vld [vmem:[%s373_s15 + $0xc] ss:$16 sps:$4 sm:$0xff]   ;;  %v1574_v19 = vmov 0   ;;  %v469_v27 = vpack.c.bf16 %v446_v9, %v445_v8  ;;  %vm541_vm1 = vcmask 261120   ;;  %v470_v36 = vpack.c.bf16 %v448_v11, %v1681_v10 }
  0x2b   : > { %580 = vmatprep.mubr.bf16.mxu0 %v1574_v19  ;;  %633 = vmatprep.mubr.bf16.mxu1 %v1574_v19  ;;  %v1478_v20 = vld [vmem:[%s373_s15] ss:$16 sps:$4 sm:$0xff]   ;;  %v1479_v21 = vld [vmem:[%s373_s15 + $0x8] ss:$16 sps:$4 sm:$0xff]   ;;  %v1480_v22 = vld [vmem:[%s373_s15 + $0x24] ss:$16 sps:$4 sm:$0xff]   ;;  %v481_v60 = vlaneseq }
  0x2c   : > { %548 = vmatprep.subr.bf16.mxu0 %v1474_v17  ;;  %601 = vmatprep.subr.bf16.mxu1 %v1476_v18  ;;  %v1482_v23 = vld [vmem:[%s373_s15 + $0x2c] ss:$16 sps:$4 sm:$0xff]   ;;  %v1484_v24 = vld [vmem:[%s373_s15 + $0x20] ss:$16 sps:$4 sm:$0xff]   ;;  %v1485_v25 = vld [vmem:[%s373_s15 + $0x28] ss:$16 sps:$4 sm:$0xff]  }
  0x2d   : > { %549 = vmatpush1.bf16.msra.mxu0 %v1478_v20  ;;  %602 = vmatpush1.bf16.msra.mxu1 %v1479_v21  ;;  %v1486_v26 = vld [vmem:[%s1696_s25 + $0x40] sm:$0xff]   ;;  %v1490_v31 = vld [vmem:[%s1696_s25 + $0x48] sm:$0xff]   ;;  %v1494_v35 = vld [vmem:[%s1696_s25 + $0x50] sm:$0xff]   ;;  %v482_v61 = vshrl.u32 %v481_v60, 7  ;;  %p1367_p12 = scmp.ne.s32.totalorder %s1564_s11, 3 }
  0x2e   : > { %550 = vmatprep.subr.bf16.mxu0 %v1480_v22  ;;  %603 = vmatprep.subr.bf16.mxu1 %v1482_v23  ;;  %v1487_v28 = vld [vmem:[%s1696_s25 + $0xc0] sm:$0xff]   ;;  %v1491_v32 = vld [vmem:[%s1696_s25 + $0xc8] sm:$0xff]   ;;  %v1495_v37 = vld [vmem:[%s1696_s25 + $0xd0] sm:$0xff]  }
  0x2f   : > { %v1488_v29 = vld [vmem:[%s1696_s25] sm:$0xff]   ;;  %v1492_v33 = vld [vmem:[%s1696_s25 + $0x8] sm:$0xff]   ;;  %v1496_v38 = vld [vmem:[%s1696_s25 + $0x10] sm:$0xff]   ;;  %v483_v62 = vsub.s32 0, %v482_v61  ;;  %v491_v63 = vsub.s32 2, %v482_v61  ;;  %v487_v1 = vsub.s32 1, %v482_v61 }
  0x30   : > { %v1489_v30 = vld [vmem:[%s1696_s25 + $0x80] sm:$0xff]   ;;  %v1493_v34 = vld [vmem:[%s1696_s25 + $0x88] sm:$0xff]   ;;  %v1497_v39 = vld [vmem:[%s1696_s25 + $0x90] sm:$0xff]   ;;  %v495_v2 = vsub.s32 3, %v482_v61 }
  0x31   : > { %551 = vmatpush1.bf16.msra.mxu0 %v1484_v24  ;;  %604 = vmatpush1.bf16.msra.mxu1 %v1485_v25  ;;  %v1498_v40 = vld [vmem:[%s1696_s25 + $0x58] sm:$0xff]   ;;  %v1502_v44 = vld [vmem:[%s1696_s25 + $0x60] sm:$0xff]   ;;  %v1506_v48 = vld [vmem:[%s1696_s25 + $0x68] sm:$0xff]  }
  0x32   : > { %1377 = vmatprep.subr.bf16.mxu0 %v1486_v26  ;;  %1405 = vmatprep.subr.bf16.mxu1 %v1487_v28  ;;  %v1499_v41 = vld [vmem:[%s1696_s25 + $0xd8] sm:$0xff]   ;;  %v1503_v45 = vld [vmem:[%s1696_s25 + $0xe0] sm:$0xff]   ;;  %v1507_v49 = vld [vmem:[%s1696_s25 + $0xe8] sm:$0xff]  }
  0x33   : > { %v1500_v42 = vld [vmem:[%s1696_s25 + $0x18] sm:$0xff]   ;;  %v1504_v46 = vld [vmem:[%s1696_s25 + $0x20] sm:$0xff]   ;;  %v1508_v50 = vld [vmem:[%s1696_s25 + $0x28] sm:$0xff]  }
  0x34   : > { %1331 = vmatmul.mubr.msk.bf16.vlgmr.msra.gmra.mrb[0].mxu0 %vm541_vm1, %v469_v27  ;;  %1333 = vmatmul.mubr.msk.bf16.vlgmr.msra.gmra.mrb[0].mxu1 %vm541_vm1, %v469_v27  ;;  %v1501_v43 = vld [vmem:[%s1696_s25 + $0x98] sm:$0xff]   ;;  %v1505_v47 = vld [vmem:[%s1696_s25 + $0xa0] sm:$0xff]   ;;  %v1509_v51 = vld [vmem:[%s1696_s25 + $0xa8] sm:$0xff]  }
  0x35   : > { %590 = vmatprep.mubr.bf16.mxu0 %v1574_v19  ;;  %643 = vmatprep.mubr.bf16.mxu1 %v1574_v19  ;;  %v1510_v52 = vld [vmem:[%s1696_s25 + $0x70] sm:$0xff]   ;;  %v1514_v56 = vld [vmem:[%s1696_s25 + $0x78] sm:$0xff]   ;;  %v479_v0 = vld [vmem:[%s430_s24] sm:$0xf] }
  0x36   : > { %1378 = vmatpush3.bf16.msra.mxu0 %v1488_v29  ;;  %1406 = vmatpush3.bf16.msra.mxu1 %v1489_v30  ;;  %v1511_v53 = vld [vmem:[%s1696_s25 + $0xf0] sm:$0xff]   ;;  %v1515_v57 = vld [vmem:[%s1696_s25 + $0xf8] sm:$0xff]   ;;  %v484_v3 = vrot.slane %v479_v0, %v483_v62  ;;  %v492_v4 = vrot.slane %v479_v0, %v491_v63  ;;  %v488_v5 = vrot.slane %v479_v0, %v487_v1 }
  0x37   : > { %1379 = vmatprep.subr.bf16.mxu0 %v1490_v31  ;;  %1407 = vmatprep.subr.bf16.mxu1 %v1491_v32  ;;  %v1512_v54 = vld [vmem:[%s1696_s25 + $0x30] sm:$0xff]   ;;  %v1516_v58 = vld [vmem:[%s1696_s25 + $0x38] sm:$0xff]   ;;  %v496_v6 = vrot.slane %v479_v0, %v495_v2 }
  0x38   : > { %v1513_v55 = vld [vmem:[%s1696_s25 + $0xb0] sm:$0xff]   ;;  %v1517_v59 = vld [vmem:[%s1696_s25 + $0xb8] sm:$0xff]  }
  0x3a   : > { %1380 = vmatpush3.bf16.msra.mxu0 %v1492_v33  ;;  %1408 = vmatpush3.bf16.msra.mxu1 %v1493_v34 }
  0x3b   : > { %1381 = vmatprep.subr.bf16.mxu0 %v1494_v35  ;;  %1409 = vmatprep.subr.bf16.mxu1 %v1495_v37 }
  0x3c   : > { %1332 = vmatmul.mubr.msk.bf16.gmra.mrb[4].mxu0 %vm541_vm1, %v470_v36  ;;  %1334 = vmatmul.mubr.msk.bf16.gmra.mrb[4].mxu1 %vm541_vm1, %v470_v36 }
  0x3e   : > { %1382 = vmatpush3.bf16.msra.mxu0 %v1496_v38  ;;  %1410 = vmatpush3.bf16.msra.mxu1 %v1497_v39 }
  0x3f   : > { %1383 = vmatprep.subr.bf16.mxu0 %v1498_v40  ;;  %1411 = vmatprep.subr.bf16.mxu1 %v1499_v41 }
  0x42   : > { %1384 = vmatpush3.bf16.msra.mxu0 %v1500_v42  ;;  %1412 = vmatpush3.bf16.msra.mxu1 %v1501_v43 }
  0x43   : > { %1385 = vmatprep.subr.bf16.mxu0 %v1502_v44  ;;  %1413 = vmatprep.subr.bf16.mxu1 %v1503_v45 }
  0x46   : > { %1386 = vmatpush3.bf16.msra.mxu0 %v1504_v46  ;;  %1414 = vmatpush3.bf16.msra.mxu1 %v1505_v47 }
  0x47   : > { %1387 = vmatprep.subr.bf16.mxu0 %v1506_v48  ;;  %1415 = vmatprep.subr.bf16.mxu1 %v1507_v49 }
  0x4a   : > { %1388 = vmatpush3.bf16.msra.mxu0 %v1508_v50  ;;  %1416 = vmatpush3.bf16.msra.mxu1 %v1509_v51 }
  0x4b   : > { %1389 = vmatprep.subr.bf16.mxu0 %v1510_v52  ;;  %1417 = vmatprep.subr.bf16.mxu1 %v1511_v53 }
  0x4e   : > { %1390 = vmatpush3.bf16.msra.mxu0 %v1512_v54  ;;  %1418 = vmatpush3.bf16.msra.mxu1 %v1513_v55 }
  0x4f   : > { %1391 = vmatprep.subr.bf16.mxu0 %v1514_v56  ;;  %1419 = vmatprep.subr.bf16.mxu1 %v1515_v57 }
  0x52   : > { %1392 = vmatpush3.bf16.msra.mxu0 %v1516_v58  ;;  %1420 = vmatpush3.bf16.msra.mxu1 %v1517_v59 }
 0x107   : > { %v582_v7 = vpop.f32.mrb[0].mxu0  ;;  %v635_v8 = vpop.f32.mrb[0].mxu1 }
 0x108   : > { %v583_v9 = vadd.f32 %v582_v7, %v484_v3  ;;  %v636_v10 = vadd.f32 %v635_v8, %v492_v4  ;;  %v584_v11 = vpop.f32.mrb[1].mxu0  ;;  %v637_v12 = vpop.f32.mrb[1].mxu1  ;;  %v670_v7 = vld [vmem:[%s1866_s9] sm:$0xff] }
 0x109   : > { %v585_v13 = vadd.f32 %v584_v11, %v488_v5  ;;  %v638_v14 = vadd.f32 %v637_v12, %v496_v6  ;;  %v586_v15 = vpop.f32.mrb[2].mxu0  ;;  %v639_v16 = vpop.f32.mrb[2].mxu1 }
 0x10a   : > { %v587_v17 = vadd.f32 %v586_v15, %v484_v3  ;;  %v640_v18 = vadd.f32 %v639_v16, %v492_v4  ;;  %v588_v19 = vpop.f32.mrb[3].mxu0  ;;  %v641_v20 = vpop.f32.mrb[3].mxu1  ;;  %v654_v23 = vmax.f32 %v583_v9, 0.0  ;;  %v656_v24 = vmax.f32 %v636_v10, 0.0 }
 0x10b   : > { %v589_v21 = vadd.f32 %v588_v19, %v488_v5  ;;  %v642_v22 = vadd.f32 %v641_v20, %v496_v6  ;;  %v655_v27 = vmax.f32 %v585_v13, 0.0  ;;  %v657_v28 = vmax.f32 %v638_v14, 0.0  ;;  %v671_v13 = vld [vmem:[%s1866_s9 + $0x8] sm:$0xff] }
 0x10c   : > { %v658_v25 = vmax.f32 %v587_v17, 0.0  ;;  %v660_v26 = vmax.f32 %v640_v18, 0.0 }
 0x10d   : > { %v659_v29 = vmax.f32 %v589_v21, 0.0  ;;  %v661_v30 = vmax.f32 %v642_v22, 0.0 }
 0x10e   : > { %v674_v31 = vpack.c.bf16 %v658_v25, %v654_v23  ;;  %v676_v32 = vpack.c.bf16 %v660_v26, %v656_v24  ;;  %v672_v25 = vld [vmem:[%s1866_s9 + $0x10] sm:$0xff] }
 0x10f   : > { %v675_v33 = vpack.c.bf16 %v659_v29, %v655_v27  ;;  %v677_v34 = vpack.c.bf16 %v661_v30, %v657_v28  ;;  %v592_v35 = vpop.f32.mrb[4].mxu0  ;;  %v645_v36 = vpop.f32.mrb[4].mxu1 }
 0x110   : > { %v593_v37 = vadd.f32 %v592_v35, %v484_v3  ;;  %v646_v38 = vadd.f32 %v645_v36, %v492_v4  ;;  %v594_v39 = vpop.f32.mrb[5].mxu0  ;;  %v647_v40 = vpop.f32.mrb[5].mxu1 }
 0x111   : > { %v595_v41 = vadd.f32 %v594_v39, %v488_v5  ;;  %v648_v42 = vadd.f32 %v647_v40, %v496_v6  ;;  %v596_v43 = vpop.f32.mrb[6].mxu0  ;;  %v649_v44 = vpop.f32.mrb[6].mxu1  ;;  %970 = vmatprep.mubr.bf16.mxu0 %v675_v33  ;;  %1019 = vmatprep.mubr.bf16.mxu1 %v677_v34 }
 0x112   : > { %v597_v45 = vadd.f32 %v596_v43, %v484_v3  ;;  %v650_v46 = vadd.f32 %v649_v44, %v492_v4  ;;  %v598_v47 = vpop.f32.mrb[7].mxu0  ;;  %v651_v48 = vpop.f32.mrb[7].mxu1  ;;  %971 = vmatmul.mubr.bf16.vlgmr.msra.gmra.mrb[8].mxu0 %v674_v31  ;;  %1020 = vmatmul.mubr.bf16.vlgmr.msra.gmra.mrb[8].mxu1 %v676_v32  ;;  %v662_v51 = vmax.f32 %v593_v37, 0.0  ;;  %v664_v52 = vmax.f32 %v646_v38, 0.0  ;;  %v673_v31 = vld [vmem:[%s1866_s9 + $0x18] sm:$0xff] }
 0x113   : > { %v599_v49 = vadd.f32 %v598_v47, %v488_v5  ;;  %v652_v50 = vadd.f32 %v651_v48, %v496_v6  ;;  %v663_v55 = vmax.f32 %v595_v41, 0.0  ;;  %v665_v56 = vmax.f32 %v648_v42, 0.0 }
 0x114   : > { %v666_v53 = vmax.f32 %v597_v45, 0.0  ;;  %v668_v54 = vmax.f32 %v650_v46, 0.0 }
 0x115   : > { %v667_v57 = vmax.f32 %v599_v49, 0.0  ;;  %v669_v58 = vmax.f32 %v652_v50, 0.0 }
 0x116   : > { %v678_v59 = vpack.c.bf16 %v666_v53, %v662_v51  ;;  %v680_v60 = vpack.c.bf16 %v668_v54, %v664_v52 }
 0x117   : > { %v679_v61 = vpack.c.bf16 %v667_v57, %v663_v55  ;;  %v681_v62 = vpack.c.bf16 %v669_v58, %v665_v56 }
 0x119   : > { %978 = vmatprep.mubr.bf16.mxu0 %v679_v61  ;;  %1027 = vmatprep.mubr.bf16.mxu1 %v681_v62 }
 0x11a   : > { %979 = vmatmul.mubr.bf16.gmra.mrb[12].mxu0 %v678_v59  ;;  %1028 = vmatmul.mubr.bf16.gmra.mrb[12].mxu1 %v680_v60 }
 0x1e5   : > { %v1393_v63 = vpop.f32.mrb[8].mxu0  ;;  %v1421_v0 = vpop.f32.mrb[8].mxu1 }
 0x1e6   : > { %v1394_v1 = vpop.f32.mrb[9].mxu0  ;;  %v1422_v2 = vpop.f32.mrb[9].mxu1 }
 0x1e7   : > { %v1395_v3 = vadd.f32 %v1394_v1, %v1393_v63  ;;  %v1423_v4 = vadd.f32 %v1422_v2, %v1421_v0  ;;  %v1396_v5 = vpop.f32.mrb[10].mxu0  ;;  %v1424_v6 = vpop.f32.mrb[10].mxu1 }
 0x1e8   : > { %v1397_v8 = vpop.f32.mrb[11].mxu0  ;;  %v1425_v9 = vpop.f32.mrb[11].mxu1 }
 0x1e9   : > { %v1022_v10 = vadd.f32 %v1423_v4, %v1395_v3  ;;  %v1398_v11 = vadd.f32 %v1397_v8, %v1396_v5  ;;  %v1426_v12 = vadd.f32 %v1425_v9, %v1424_v6 }
 0x1eb   : > { %v1036_v14 = vadd.f32 %v1022_v10, %v670_v7  ;;  %v1025_v15 = vadd.f32 %v1426_v12, %v1398_v11  ;;  %v1368_v12 = vld [vmem:[%s1862_s5] ss:$0 sm:$0xff] (!%p1367_p12) }
 0x1ed   : > { %1040 = vst.msk [vmem:[%s1866_s9] sm:$0xff] %vm541_vm1, %v1036_v14  ;;  %v1037_v16 = vadd.f32 %v1025_v15, %v671_v13  ;;  %v1399_v17 = vpop.f32.mrb[12].mxu0  ;;  %v1427_v18 = vpop.f32.mrb[12].mxu1  ;;  %v1369_v14 = vld [vmem:[%s1863_s6] ss:$0 sm:$0xff] (!%p1367_p12) }
 0x1ee   : > { %v1400_v19 = vpop.f32.mrb[13].mxu0  ;;  %v1428_v20 = vpop.f32.mrb[13].mxu1 }
 0x1ef   : > { %1041 = vst.msk [vmem:[%s1866_s9 + $0x8] sm:$0xff] %vm541_vm1, %v1037_v16  ;;  %v1401_v21 = vadd.f32 %v1400_v19, %v1399_v17  ;;  %v1429_v22 = vadd.f32 %v1428_v20, %v1427_v18  ;;  %v1402_v23 = vpop.f32.mrb[14].mxu0  ;;  %v1430_v24 = vpop.f32.mrb[14].mxu1 }
 0x1f0   : > { %v1403_v26 = vpop.f32.mrb[15].mxu0  ;;  %v1431_v27 = vpop.f32.mrb[15].mxu1 }
 0x1f1   : > { %v1030_v28 = vadd.f32 %v1429_v22, %v1401_v21  ;;  %v1404_v29 = vadd.f32 %v1403_v26, %v1402_v23  ;;  %v1432_v30 = vadd.f32 %v1431_v27, %v1430_v24  ;;  %1047 = sbr.rel (%p1367_p12) target bundleno = 1140 (0x474), region = 87 }
 0x1f3   : > { %v1038_v32 = vadd.f32 %v1030_v28, %v672_v25  ;;  %v1033_v33 = vadd.f32 %v1432_v30, %v1404_v29 }
 0x1f4   : > { %v1048_v35 = vld [vmem:[%s1866_s9] sm:$0xff] (!%p1367_p12) }
 0x1f5   : > { %1042 = vst.msk [vmem:[%s1866_s9 + $0x10] sm:$0xff] %vm541_vm1, %v1038_v32  ;;  %v1039_v34 = vadd.f32 %v1033_v33, %v673_v31  ;;  %v1054_v38 = vsel (!%p1367_p12), %vm541_vm1, %v1048_v35, 0.0 }
 0x1f6   : > { %v1049_v37 = vld [vmem:[%s1866_s9 + $0x8] sm:$0xff] (!%p1367_p12)  ;;  %1055 = vadd.xlane.f32.xlu0 (!%p1367_p12), %v1054_v38 }
 0x1f7   : > { %1043 = vst.msk [vmem:[%s1866_s9 + $0x18] sm:$0xff] %vm541_vm1, %v1039_v34  ;;  %v1057_v41 = vsel (!%p1367_p12), %vm541_vm1, %v1049_v37, 0.0 }
 0x1fa   : > { %1058 = vadd.xlane.f32.xlu0 %v1057_v41 }
 0x1fc   : > { %v1050_v36 = vld [vmem:[%s1866_s9 + $0x10] sm:$0xff] }
 0x1fd   : > { %v1060_v39 = vsel %vm541_vm1, %v1050_v36, 0.0 }
 0x1fe   : > { %v1051_v40 = vld [vmem:[%s1866_s9 + $0x18] sm:$0xff]  ;;  %1061 = vadd.xlane.f32.xlu1 %v1060_v39 }
 0x1ff   : > { %v1063_v42 = vsel %vm541_vm1, %v1051_v40, 0.0 }
 0x202   : > { %1064 = vadd.xlane.f32.xlu1 %v1063_v42 }
 0x283   : > { %v1056_v43 = vpop.xlane.xlu0 %1055 }
 0x284   : > { %v1067_v45 = vmul.f32 0.03125, %v1056_v43 }
 0x286   : > { %v1071_v47 = vsub.f32 %v1048_v35, %v1067_v45 }
 0x287   : > { %v1059_v49 = vpop.xlane.xlu0 %1058 }
 0x288   : > { %v1068_v51 = vmul.f32 0.03125, %v1059_v49  ;;  %v1075_v53 = vmul.f32 %v1071_v47, %v1071_v47 }
 0x28a   : > { %v1072_v55 = vsub.f32 %v1049_v37, %v1068_v51  ;;  %v1079_v57 = vsel %vm541_vm1, %v1075_v53, 0.0 }
 0x28b   : > { %v1062_v44 = vpop.xlane.xlu1 %1061  ;;  %1080 = vadd.xlane.f32.xlu0 %v1079_v57 }
 0x28c   : > { %v1069_v46 = vmul.f32 0.03125, %v1062_v44  ;;  %v1076_v59 = vmul.f32 %v1072_v55, %v1072_v55 }
 0x28e   : > { %v1073_v48 = vsub.f32 %v1050_v36, %v1069_v46  ;;  %v1082_v61 = vsel %vm541_vm1, %v1076_v59, 0.0 }
 0x28f   : > { %v1065_v50 = vpop.xlane.xlu1 %1064  ;;  %1083 = vadd.xlane.f32.xlu1 %v1082_v61 }
 0x290   : > { %v1070_v52 = vmul.f32 0.03125, %v1065_v50  ;;  %v1077_v54 = vmul.f32 %v1073_v48, %v1073_v48 }
 0x292   : > { %v1074_v56 = vsub.f32 %v1051_v40, %v1070_v52  ;;  %v1085_v58 = vsel %vm541_vm1, %v1077_v54, 0.0 }
 0x293   : > { %1086 = vadd.xlane.f32.xlu0 %v1085_v58 }
 0x294   : > { %v1078_v60 = vmul.f32 %v1074_v56, %v1074_v56 }
 0x296   : > { %v1088_v62 = vsel %vm541_vm1, %v1078_v60, 0.0 }
 0x297   : > { %1089 = vadd.xlane.f32.xlu1 %v1088_v62 }
 0x318   : > { %v1081_v63 = vpop.xlane.xlu0 %1080 }
 0x319   : > { %v1091_v0 = vmul.f32 0.03125, %v1081_v63 }
 0x31b   : > { %v1095_v1 = vadd.f32 1e-05, %v1091_v0 }
 0x31c   : > { %v1084_v2 = vpop.xlane.xlu1 %1083 }
 0x31d   : > { %1518 = vrsqrt.f32 %v1095_v1  ;;  %v1092_v4 = vmul.f32 0.03125, %v1084_v2  ;;  %v1370_v2 = vld [vmem:[%s1864_s7] ss:$0 sm:$0xff] }
 0x31f   : > { %v1096_v6 = vadd.f32 1e-05, %v1092_v4  ;;  %v1371_v4 = vld [vmem:[%s1865_s8] ss:$0 sm:$0xff] }
 0x320   : > { %v1087_v3 = vpop.xlane.xlu0 %1086 }
 0x321   : > { %v1093_v5 = vmul.f32 0.03125, %v1087_v3  ;;  %1520 = vrsqrt.f32 %v1096_v6 }
 0x323   : > { %v1097_v7 = vadd.f32 1e-05, %v1093_v5 }
 0x324   : > { %v1090_v8 = vpop.xlane.xlu1 %1089 }
 0x325   : > { %v1094_v9 = vmul.f32 0.03125, %v1090_v8  ;;  %1522 = vrsqrt.f32 %v1097_v7 }
 0x327   : > { %v1098_v10 = vadd.f32 1e-05, %v1094_v9  ;;  %v1519_v11 = vpop.eup %1518 }
 0x328   : > { %v1103_v13 = vmul.f32 %v1519_v11, %v1071_v47 }
 0x329   : > { %1524 = vrsqrt.f32 %v1098_v10 }
 0x32a   : > { %v1113_v15 = vmul.f32 %v1368_v12, %v1103_v13 }
 0x32b   : > { %v1521_v16 = vpop.eup %1520 }
 0x32c   : > { %v1123_v18 = vadd.f32 %v1369_v14, %v1113_v15  ;;  %v1104_v19 = vmul.f32 %v1521_v16, %v1072_v55 }
 0x32e   : > { %v1129_v21 = vsel %vm541_vm1, %v1123_v18, 0.0  ;;  %v1114_v22 = vmul.f32 %v1368_v12, %v1104_v19 }
 0x32f   : > { %v1523_v17 = vpop.eup %1522  ;;  %1130 = vadd.xlane.f32.xlu0 %v1129_v21 }
 0x330   : > { %v1105_v20 = vmul.f32 %v1523_v17, %v1073_v48  ;;  %v1124_v25 = vadd.f32 %v1369_v14, %v1114_v22 }
 0x332   : > { %v1115_v24 = vmul.f32 %v1368_v12, %v1105_v20  ;;  %v1132_v28 = vsel %vm541_vm1, %v1124_v25, 0.0 }
 0x333   : > { %v1525_v23 = vpop.eup %1524  ;;  %1133 = vadd.xlane.f32.xlu1 %v1132_v28 }
 0x334   : > { %v1106_v26 = vmul.f32 %v1525_v23, %v1074_v56  ;;  %v1125_v27 = vadd.f32 %v1369_v14, %v1115_v24 }
 0x336   : > { %v1116_v29 = vmul.f32 %v1368_v12, %v1106_v26  ;;  %v1135_v30 = vsel %vm541_vm1, %v1125_v27, 0.0 }
 0x337   : > { %1136 = vadd.xlane.f32.xlu0 %v1135_v30 }
 0x338   : > { %v1126_v31 = vadd.f32 %v1369_v14, %v1116_v29 }
 0x33a   : > { %v1138_v32 = vsel %vm541_vm1, %v1126_v31, 0.0 }
 0x33b   : > { %1139 = vadd.xlane.f32.xlu1 %v1138_v32 }
 0x3bc   : > { %v1131_v33 = vpop.xlane.xlu0 %1130 }
 0x3bd   : > { %v1141_v34 = vmul.f32 0.03125, %v1131_v33 }
 0x3bf   : > { %v1145_v35 = vsub.f32 %v1123_v18, %v1141_v34 }
 0x3c0   : > { %v1134_v36 = vpop.xlane.xlu1 %1133 }
 0x3c1   : > { %v1142_v37 = vmul.f32 0.03125, %v1134_v36  ;;  %v1149_v39 = vmul.f32 %v1145_v35, %v1145_v35 }
 0x3c3   : > { %v1146_v41 = vsub.f32 %v1124_v25, %v1142_v37  ;;  %v1153_v42 = vsel %vm541_vm1, %v1149_v39, 0.0 }
 0x3c4   : > { %v1137_v38 = vpop.xlane.xlu0 %1136  ;;  %1154 = vadd.xlane.f32.xlu0 %v1153_v42 }
 0x3c5   : > { %v1143_v40 = vmul.f32 0.03125, %v1137_v38  ;;  %v1150_v46 = vmul.f32 %v1146_v41, %v1146_v41 }
 0x3c7   : > { %v1147_v43 = vsub.f32 %v1125_v27, %v1143_v40  ;;  %v1156_v49 = vsel %vm541_vm1, %v1150_v46, 0.0 }
 0x3c8   : > { %v1140_v44 = vpop.xlane.xlu1 %1139  ;;  %1157 = vadd.xlane.f32.xlu1 %v1156_v49 }
 0x3c9   : > { %v1144_v45 = vmul.f32 0.03125, %v1140_v44  ;;  %v1151_v47 = vmul.f32 %v1147_v43, %v1147_v43 }
 0x3cb   : > { %v1148_v48 = vsub.f32 %v1126_v31, %v1144_v45  ;;  %v1159_v50 = vsel %vm541_vm1, %v1151_v47, 0.0 }
 0x3cc   : > { %1160 = vadd.xlane.f32.xlu0 %v1159_v50 }
 0x3cd   : > { %v1152_v51 = vmul.f32 %v1148_v48, %v1148_v48 }
 0x3cf   : > { %v1162_v52 = vsel %vm541_vm1, %v1152_v51, 0.0 }
 0x3d0   : > { %1163 = vadd.xlane.f32.xlu1 %v1162_v52 }
 0x451   : > { %v1155_v53 = vpop.xlane.xlu0 %1154 }
 0x452   : > { %v1165_v54 = vmul.f32 0.03125, %v1155_v53 }
 0x454   : > { %v1169_v55 = vadd.f32 1e-05, %v1165_v54 }
 0x455   : > { %v1158_v56 = vpop.xlane.xlu1 %1157 }
 0x456   : > { %1526 = vrsqrt.f32 %v1169_v55  ;;  %v1166_v57 = vmul.f32 0.03125, %v1158_v56 }
 0x458   : > { %v1170_v60 = vadd.f32 1e-05, %v1166_v57 }
 0x459   : > { %v1161_v58 = vpop.xlane.xlu0 %1160 }
 0x45a   : > { %v1167_v59 = vmul.f32 0.03125, %v1161_v58  ;;  %1528 = vrsqrt.f32 %v1170_v60 }
 0x45c   : > { %v1171_v61 = vadd.f32 1e-05, %v1167_v59 }
 0x45d   : > { %v1164_v62 = vpop.xlane.xlu1 %1163 }
 0x45e   : > { %v1168_v63 = vmul.f32 0.03125, %v1164_v62  ;;  %1530 = vrsqrt.f32 %v1171_v61 }
 0x460   : > { %v1172_v0 = vadd.f32 1e-05, %v1168_v63  ;;  %v1527_v1 = vpop.eup %1526 }
 0x461   : > { %v1177_v3 = vmul.f32 %v1527_v1, %v1145_v35 }
 0x462   : > { %1532 = vrsqrt.f32 %v1172_v0 }
 0x463   : > { %v1187_v5 = vmul.f32 %v1370_v2, %v1177_v3 }
 0x464   : > { %v1529_v6 = vpop.eup %1528 }
 0x465   : > { %v1197_v8 = vadd.f32 %v1371_v4, %v1187_v5  ;;  %v1178_v9 = vmul.f32 %v1529_v6, %v1146_v41 }
 0x467   : > { %1201 = vst.msk [vmem:[%s1866_s9] sm:$0xff] %vm541_vm1, %v1197_v8  ;;  %v1188_v11 = vmul.f32 %v1370_v2, %v1178_v9 }
 0x468   : > { %v1531_v7 = vpop.eup %1530 }
 0x469   : > { %v1179_v10 = vmul.f32 %v1531_v7, %v1147_v43  ;;  %v1198_v14 = vadd.f32 %v1371_v4, %v1188_v11 }
 0x46b   : > { %v1189_v13 = vmul.f32 %v1370_v2, %v1179_v10  ;;  %1202 = vst.msk [vmem:[%s1866_s9 + $0x8] sm:$0xff] %vm541_vm1, %v1198_v14 }
 0x46c   : > { %v1533_v12 = vpop.eup %1532 }
 0x46d   : > { %v1180_v15 = vmul.f32 %v1533_v12, %v1148_v48  ;;  %v1199_v16 = vadd.f32 %v1371_v4, %v1189_v13 }
 0x46f   : > { %v1190_v17 = vmul.f32 %v1370_v2, %v1180_v15  ;;  %1203 = vst.msk [vmem:[%s1866_s9 + $0x10] sm:$0xff] %vm541_vm1, %v1199_v16 }
 0x471   : > { %v1200_v18 = vadd.f32 %v1371_v4, %v1190_v17 }
 0x473   : > { %1204 = vst.msk [vmem:[%s1866_s9 + $0x18] sm:$0xff] %vm541_vm1, %v1200_v18 }
 0x474 PF: > { %s19_s13 = sadd.s32 1, %s1572_s13   ;;  %s1867_s30 = smov %s1560_s10 }
 0x475   : > { %p16_p13 = scmp.ge.s32.totalorder %s19_s13, 6   ;;  %s1868_s10 = smov %s1660_s17 }
 0x476   : > { %s1869_s11 = smov %s1568_s12  ;;  %s1870_s12 = smov %s1872_s14 }
 0x477   :  { %18 = sbr.rel (!%p16_p13) target bundleno = 3 (0x3), region = 131 }

// kernel: transformer_forward.11
= control target key start
LH: loop header
LB: loop body
LE: loop exit
PB: predicated region body
PF: predicated region fallthrough
CT: control target
= control target key end

     0   :  { %s1374_s27 = smov 0   ;;  %s1526_s0 = inlined_call_operand.vmem [shape: f32[2,16,32], index: 0, kind: input, shape index: {}]   ;;  %s1527_s1 = inlined_call_operand.vmem [shape: f32[2,1,16], index: 1, kind: input, shape index: {}]   ;;  %s1528_s2 = inlined_call_operand.vmem [shape: bf16[32,96], index: 2, kind: input, shape index: {}]   ;;  %s1529_s3 = inlined_call_operand.vmem [shape: f32[1,96], index: 3, kind: input, shape index: {}]   ;;  %s1530_s4 = inlined_call_operand.vmem [shape: bf16[32,32], index: 4, kind: input, shape index: {}]   ;;  %s1531_s5 = inlined_call_operand.vmem [shape: f32[1,32], index: 5, kind: input, shape index: {}]   ;;  %s1532_s6 = inlined_call_operand.vmem [shape: f32[1,32], index: 6, kind: input, shape index: {}]   ;;  %s1533_s7 = inlined_call_operand.vmem [shape: f32[1,32], index: 7, kind: input, shape index: {}]   ;;  %s1534_s8 = inlined_call_operand.vmem [shape: f32[2,16,32], index: 8, kind: output, shape index: {}]  }
   0x1 LB: > { %s1123_s28 = sadd.s32 4294967295, %s1311_s27   ;;  %p1127_p0 = scmp.ge.s32.totalorder %s1311_s27, 1  ;;  %s1311_s27 = sphi %s1374_s27, %s18_s27  }
   0x2   : > { %p270_p1 = scmp.lt.s32.totalorder %s1311_s27, 3 }
   0x4   : > { %p271_p2 = pnand %p1127_p0, %p270_p1 }
   0x5   : > { %v1265_v0 = vld [vmem:[%s1528_s2] sm:$0xff] (!%p271_p2)   ;;  %v1313_v1 = vmov (!%p271_p2), 0.0   ;;  %v1266_v2 = vld [vmem:[%s1528_s2 + $0x8] sm:$0xff] (!%p271_p2)   ;;  %vm1314_vm0 = vmmov (!%p271_p2), 0   ;;  %p307_p3 = scmp.lt.s32.totalorder (!%p271_p2), %s1123_s28, 1  ;;  %vm347_vm1 = vcmask (!%p271_p2), 261120  }
   0x6   : > { %274 = sbr.rel (%p271_p2) target bundleno = 1680 (0x690), region = 52  ;;  %1177 = vmatprep.subr.bf16.mxu0 (!%p271_p2), %v1313_v1  ;;  %1185 = vmatprep.subr.bf16.mxu1 (!%p271_p2), %v1313_v1  ;;  %v1132_v6 = vld [vmem:[%s1529_s3] ss:$0 sm:$0xff] (!%p271_p2)  ;;  %s1315_s17 = smov (!%p271_p2), 96   ;;  %vm406_vm2 = vcmask (!%p271_p2), 64512   ;;  %vm454_vm3 = vcmask (!%p271_p2), 130048  }
   0x7   : > { %1178 = vmatpush3.bf16.msra.mxu0 (!%p271_p2), %v1265_v0  ;;  %1181 = vmatprep.mubr.msk.bf16.mxu0 (!%p271_p2), %vm1314_vm0, %v1313_v1  ;;  %s1316_s18 = smov (!%p271_p2), 120   ;;  %s1317_s19 = smov (!%p271_p2), 88   ;;  %vm665_vm4 = vcmask (!%p271_p2), 130112   ;;  %vm801_vm5 = vcmask (!%p271_p2), 195712   ;;  %vm937_vm6 = vcmask (!%p271_p2), 261312  }
   0x8   : > { %1179 = vmatprep.subr.bf16.mxu0 (!%p271_p2), %v1313_v1  ;;  %1187 = vmatprep.mubr.msk.bf16.mxu1 (!%p271_p2), %vm1314_vm0, %v1313_v1  ;;  %s1318_s20 = smov (!%p271_p2), 80   ;;  %s1319_s21 = smov (!%p271_p2), 112  }
   0x9   : > { %s1320_s22 = smov (!%p271_p2), 72   ;;  %s1321_s23 = smov (!%p271_p2), 104  }
   0xa   : > { %s1322_s29 = smov (!%p271_p2), 56   ;;  %s1323_s30 = smov (!%p271_p2), 64  }
   0xb   : > { %1180 = vmatpush3.bf16.msra.mxu0 (!%p271_p2), %v1266_v2  ;;  %s1324_s9 = smov (!%p271_p2), 48   ;;  %s1325_s10 = smov (!%p271_p2), 40  }
   0xc   : > { %1191 = vmatprep.subr.bf16.mxu0 (!%p271_p2), %v1313_v1  ;;  %s1326_s12 = smov (!%p271_p2), 8  }
   0xd   : > { %s1536_s28 = smov (!%p307_p3, %s1123_s28), 1 }
   0xe   : > { %s1153_s11 = sshll.u32 %s1536_s28, 4  ;;  %s314_s26 = scalar_lea.vmem %s1527_s1, %s1536_s28 }
   0xf   : > { %s311_s14 = scalar_lea.vmem %s1526_s0, %s1153_s11  ;;  %v1136_v28 = vld [vmem:[%s314_s26] ss:$0 sm:$0xff] }
  0x10   : > { %v1404_v3 = vld [vmem:[%s311_s14] sm:$0xff]  ;;  %v1406_v4 = vld [vmem:[%s311_s14 + $0x8] sm:$0xff] }
  0x11   : > { %v323_v5 = vpack.c.bf16 %v1406_v4, %v1404_v3 }
  0x13   : > { %1182 = vmatmul.mubr.msk.bf16.vlgmr.msra.gmra.mrb[0].mxu0 %vm347_vm1, %v323_v5 }
  0x14   : > { %1193 = vmatprep.mubr.msk.bf16.mxu0 %vm1314_vm0, %v1313_v1 }
  0xe6   : > { %v385_v7 = vpop.f32.mrb[0].mxu0 }
  0xe7   : > { %v386_v8 = vadd.f32 %v1132_v6, %v385_v7  ;;  %v1183_v9 = vpop.f32.mrb[1].mxu0 }
  0xe8   : > { %v388_v10 = vpop.f32.mrb[2].mxu0 }
  0xe9   : > { %v389_v11 = vadd.f32 %v1132_v6, %v388_v10  ;;  %v1184_v12 = vpop.f32.mrb[3].mxu0  ;;  %v392_v13 = vmul.f32 0.35355338, %v386_v8 }
  0xeb   : > { %v393_v14 = vmul.f32 0.35355338, %v389_v11  ;;  %v1416_v15 = vpack.c.bf16 %v389_v11, %v386_v8 }
  0xed   : > { %v395_v16 = vpack.c.bf16 %v393_v14, %v392_v13  ;;  %404 = vrot.lane.b32.xlu0 %v1416_v15, %s1315_s17  ;;  %s1327_s17 = smov 16  }
  0xef   : > { %532 = vrot.lane.b32.xlu1 %v395_v16, %s1316_s18  ;;  %s1328_s18 = smov 24  }
  0xf1   : > { %534 = vrot.lane.b32.xlu0 %v1416_v15, %s1317_s19 }
  0xf3   : > { %670 = vrot.lane.b32.xlu1 %v1416_v15, %s1318_s20 }
  0xf5   : > { %668 = vrot.lane.b32.xlu0 %v395_v16, %s1319_s21 }
  0xf7   : > { %806 = vrot.lane.b32.xlu1 %v1416_v15, %s1320_s22 }
  0xf9   : > { %804 = vrot.lane.b32.xlu0 %v395_v16, %s1321_s23 }
 0x15f   : > { %v405_v17 = vpop.permute.xlu0 %404 }
 0x160   : > { %v411_v18 = vsel %vm406_vm2, %v405_v17, 0 }
 0x161   : > { %1186 = vmatpush3.bf16.xpose.msra.mxu1 %v411_v18  ;;  %v533_v20 = vpop.permute.xlu1 %532 }
 0x162   : > { %1197 = vmatprep.subr.bf16.mxu1 %v1313_v1 }
 0x163   : > { %v535_v19 = vpop.permute.xlu0 %534 }
 0x164   : > { %v540_v21 = vsel %vm406_vm2, %v535_v19, 0 }
 0x165   : > { %v671_v22 = vpop.permute.xlu1 %670 }
 0x166   : > { %v676_v23 = vsel %vm406_vm2, %v671_v22, 0 }
 0x167   : > { %v669_v25 = vpop.permute.xlu0 %668 }
 0x168   : > { %1188 = vmatmul.mubr.msk.bf16.vlgmr.msra.gmra.mrb[0].mxu1 %vm406_vm2, %v395_v16 }
 0x169   : > { %1198 = vmatpush3.bf16.xpose.msra.mxu1 %v540_v21  ;;  %1199 = vmatprep.mubr.msk.bf16.mxu1 %vm1314_vm0, %v1313_v1  ;;  %v807_v24 = vpop.permute.xlu1 %806 }
 0x16a   : > { %1209 = vmatprep.subr.bf16.mxu1 %v1313_v1  ;;  %v812_v26 = vsel %vm406_vm2, %v807_v24, 0 }
 0x16b   : > { %v805_v27 = vpop.permute.xlu0 %804 }
 0x170   : > { %1200 = vmatmul.mubr.msk.bf16.vlgmr.msra.gmra.mrb[4].mxu1 %vm406_vm2, %v533_v20 }
 0x171   : > { %1210 = vmatpush3.bf16.xpose.msra.mxu1 %v676_v23  ;;  %1211 = vmatprep.mubr.msk.bf16.mxu1 %vm1314_vm0, %v1313_v1 }
 0x172   : > { %1221 = vmatprep.subr.bf16.mxu1 %v1313_v1 }
 0x178   : > { %1212 = vmatmul.mubr.msk.bf16.vlgmr.msra.gmra.mrb[8].mxu1 %vm406_vm2, %v669_v25 }
 0x179   : > { %1222 = vmatpush3.bf16.xpose.msra.mxu1 %v812_v26  ;;  %1223 = vmatprep.mubr.msk.bf16.mxu1 %vm1314_vm0, %v1313_v1 }
 0x17a   : > { %1233 = vmatprep.subr.bf16.mxu1 %v1313_v1 }
 0x180   : > { %1224 = vmatmul.mubr.msk.bf16.vlgmr.msra.gmra.mrb[12].mxu1 %vm406_vm2, %v805_v27 }
 0x181   : > { %1237 = vmatprep.mubr.msk.bf16.mxu1 %vm1314_vm0, %v1313_v1 }
 0x23b   : > { %v447_v29 = vpop.f32.mrb[0].mxu1 }
 0x23c   : > { %v448_v30 = vadd.f32 %v1136_v28, %v447_v29  ;;  %v1189_v31 = vpop.f32.mrb[1].mxu1 }
 0x23d   : > { %v450_v32 = vpop.f32.mrb[2].mxu1 }
 0x23e   : > { %v451_v33 = vadd.f32 %v1136_v28, %v450_v32  ;;  %v1190_v34 = vpop.f32.mrb[3].mxu1  ;;  %v455_v35 = vsel %vm454_vm3, %v448_v30, -inf }
 0x23f   : > { %456 = vmax.xlane.f32.xlu1 %v455_v35 }
 0x240   : > { %v458_v36 = vsel %vm454_vm3, %v451_v33, -inf }
 0x241   : > { %459 = vmax.xlane.f32.xlu0 %v458_v36 }
 0x243   : > { %v576_v37 = vpop.f32.mrb[4].mxu1 }
 0x244   : > { %v577_v38 = vadd.f32 %v1136_v28, %v576_v37  ;;  %v1201_v39 = vpop.f32.mrb[5].mxu1 }
 0x245   : > { %v579_v40 = vpop.f32.mrb[6].mxu1 }
 0x246   : > { %v580_v41 = vadd.f32 %v1136_v28, %v579_v40  ;;  %v1202_v42 = vpop.f32.mrb[7].mxu1  ;;  %v583_v43 = vsel %vm454_vm3, %v577_v38, -inf }
 0x247   : > { %584 = vmax.xlane.f32.xlu0 %v583_v43 }
 0x248   : > { %v586_v44 = vsel %vm454_vm3, %v580_v41, -inf }
 0x249   : > { %587 = vmax.xlane.f32.xlu1 %v586_v44 }
 0x24b   : > { %v712_v45 = vpop.f32.mrb[8].mxu1 }
 0x24c   : > { %v713_v46 = vadd.f32 %v1136_v28, %v712_v45  ;;  %v1213_v47 = vpop.f32.mrb[9].mxu1 }
 0x24d   : > { %v715_v48 = vpop.f32.mrb[10].mxu1 }
 0x24e   : > { %v1450_v49 = vadd.f32 %v1136_v28, %v715_v48  ;;  %v1214_v50 = vpop.f32.mrb[11].mxu1  ;;  %v719_v51 = vsel %vm454_vm3, %v713_v46, -inf }
 0x24f   : > { %720 = vmax.xlane.f32.xlu0 %v719_v51 }
 0x250   : > { %v722_v58 = vsel %vm454_vm3, %v1450_v49, -inf }
 0x253   : > { %v848_v52 = vpop.f32.mrb[12].mxu1 }
 0x254   : > { %v1453_v53 = vadd.f32 %v1136_v28, %v848_v52  ;;  %v1225_v54 = vpop.f32.mrb[13].mxu1 }
 0x255   : > { %v851_v55 = vpop.f32.mrb[14].mxu1 }
 0x256   : > { %v1455_v56 = vadd.f32 %v1136_v28, %v851_v55  ;;  %v1226_v57 = vpop.f32.mrb[15].mxu1  ;;  %v855_v60 = vsel %vm454_vm3, %v1453_v53, -inf }
 0x258   : > { %v858_v59 = vsel %vm454_vm3, %v1455_v56, -inf }
 0x25a   : > { %608 = vrot.lane.b32.xlu1 %v1416_v15, %s1322_s29  ;;  %s319_s29 = scalar_lea.vmem %s1534_s8, %s1153_s11 }
 0x265   : > { %480 = vrot.lane.b32.xlu0 %v1416_v15, %s1323_s30 }
 0x27e   : > { %723 = vmax.xlane.f32.xlu1 %v722_v58 }
 0x282   : > { %859 = vmax.xlane.f32.xlu1 %v858_v59 }
 0x284   : > { %856 = vmax.xlane.f32.xlu0 %v855_v60 }
 0x293   : > { %744 = vrot.lane.b32.xlu1 %v1416_v15, %s1324_s9 }
 0x29a   : > { %880 = vrot.lane.b32.xlu0 %v1416_v15, %s1325_s10 }
 0x2cc   : > { %v457_v61 = vpop.xlane.xlu1 %456 }
 0x2cd   : > { %v461_v62 = vmax.f32 %v457_v61, -1e+30 }
 0x2ce   : > { %v460_v63 = vpop.xlane.xlu0 %459 }
 0x2cf   : > { %v463_v0 = vsub.f32 %v448_v30, %v461_v62  ;;  %v462_v2 = vmax.f32 %v460_v63, -1e+30 }
 0x2d1   : > { %v464_v5 = vsub.f32 %v451_v33, %v462_v2  ;;  %v465_v6 = vmul.f32 1.442695, %v463_v0 }
 0x2d3   : > { %v467_v7 = vmul.f32 1.442695, %v464_v5 }
 0x2d4   : > { %v585_v8 = vpop.xlane.xlu0 %584 }
 0x2d5   : > { %1269 = vpow2.f32 %v467_v7  ;;  %v589_v9 = vmax.f32 %v585_v8, -1e+30 }
 0x2d6   : > { %v588_v10 = vpop.xlane.xlu1 %587  ;;  %1271 = vpow2.f32 %v465_v6 }
 0x2d7   : > { %v591_v11 = vsub.f32 %v577_v38, %v589_v9  ;;  %v590_v12 = vmax.f32 %v588_v10, -1e+30 }
 0x2d9   : > { %v593_v13 = vmul.f32 1.442695, %v591_v11  ;;  %v592_v14 = vsub.f32 %v580_v41, %v590_v12 }
 0x2da   : > { %v609_v24 = vpop.permute.xlu1 %608 }
 0x2db   : > { %1273 = vpow2.f32 %v593_v13  ;;  %v595_v16 = vmul.f32 1.442695, %v592_v14 }
 0x2dc   : > { %v721_v15 = vpop.xlane.xlu0 %720 }
 0x2dd   : > { %1275 = vpow2.f32 %v595_v16  ;;  %v725_v17 = vmax.f32 %v721_v15, -1e+30 }
 0x2df   : > { %v1270_v18 = vpop.eup %1269  ;;  %v727_v19 = vsub.f32 %v713_v46, %v725_v17 }
 0x2e0   : > { %v481_v20 = vpop.permute.xlu0 %480  ;;  %v1272_v21 = vpop.eup %1271 }
 0x2e1   : > { %v729_v22 = vmul.f32 1.442695, %v727_v19  ;;  %1192 = vmatpush3.bf16.msra.mxu0 %v481_v20  ;;  %v479_v23 = vpack.c.bf16 %v1270_v18, %v1272_v21  ;;  %v469_v55 = vsel %vm454_vm3, %v1272_v21, 0.0 }
 0x2e2   : > { %1203 = vmatprep.subr.bf16.mxu0 %v1313_v1 }
 0x2e3   : > { %1277 = vpow2.f32 %v729_v22 }
 0x2e4   : > { %1194 = vmatmul.mubr.msk.bf16.vlgmr.msra.gmra.mrb[4].mxu0 %vm454_vm3, %v479_v23 }
 0x2e5   : > { %v1274_v25 = vpop.eup %1273  ;;  %1204 = vmatpush3.bf16.msra.mxu0 %v609_v24  ;;  %1205 = vmatprep.mubr.msk.bf16.mxu0 %vm1314_vm0, %v1313_v1 }
 0x2e6   : > { %v597_v26 = vsel %vm454_vm3, %v1274_v25, 0.0  ;;  %1215 = vmatprep.subr.bf16.mxu0 %v1313_v1 }
 0x2e7   : > { %v1276_v27 = vpop.eup %1275  ;;  %598 = vadd.xlane.f32.xlu1 %v597_v26 }
 0x2e8   : > { %v600_v28 = vsel %vm454_vm3, %v1276_v27, 0.0  ;;  %v607_v29 = vpack.c.bf16 %v1276_v27, %v1274_v25 }
 0x2e9   : > { %601 = vadd.xlane.f32.xlu0 %v600_v28 }
 0x2ec   : > { %1206 = vmatmul.mubr.msk.bf16.vlgmr.msra.gmra.mrb[8].mxu0 %vm454_vm3, %v607_v29  ;;  %v1267_v29 = vld [vmem:[%s1530_s4] sm:$0xff]  }
 0x2ed   : > { %v1278_v30 = vpop.eup %1277  ;;  %1217 = vmatprep.mubr.msk.bf16.mxu0 %vm1314_vm0, %v1313_v1  ;;  %1234 = vmatpush3.bf16.msra.mxu1 %v1267_v29 }
 0x2ee   : > { %v733_v31 = vsel %vm454_vm3, %v1278_v30, 0.0  ;;  %1235 = vmatprep.subr.bf16.mxu1 %v1313_v1 }
 0x2ef   : > { %734 = vadd.xlane.f32.xlu0 %v733_v31 }
 0x30b   : > { %v724_v32 = vpop.xlane.xlu1 %723 }
 0x30c   : > { %v726_v33 = vmax.f32 %v724_v32, -1e+30 }
 0x30e   : > { %v728_v34 = vsub.f32 %v1450_v49, %v726_v33 }
 0x30f   : > { %v860_v35 = vpop.xlane.xlu1 %859 }
 0x310   : > { %v731_v36 = vmul.f32 1.442695, %v728_v34  ;;  %v862_v37 = vmax.f32 %v860_v35, -1e+30  ;;  %v1268_v34 = vld [vmem:[%s1530_s4 + $0x8] sm:$0xff]  }
 0x311   : > { %v857_v38 = vpop.xlane.xlu0 %856  ;;  %1236 = vmatpush3.bf16.msra.mxu1 %v1268_v34 }
 0x312   : > { %1279 = vpow2.f32 %v731_v36  ;;  %v864_v39 = vsub.f32 %v1455_v56, %v862_v37  ;;  %v861_v40 = vmax.f32 %v857_v38, -1e+30 }
 0x313   : > { %v745_v41 = vpop.permute.xlu1 %744 }
 0x314   : > { %v867_v42 = vmul.f32 1.442695, %v864_v39  ;;  %v863_v43 = vsub.f32 %v1453_v53, %v861_v40  ;;  %1216 = vmatpush3.bf16.msra.mxu0 %v745_v41  ;;  %v472_v53 = vsel %vm454_vm3, %v1270_v18, 0.0 }
 0x315   : > { %1227 = vmatprep.subr.bf16.mxu0 %v1313_v1  ;;  %v881_v48 = vpop.permute.xlu0 %880 }
 0x316   : > { %1281 = vpow2.f32 %v867_v42  ;;  %v865_v44 = vmul.f32 1.442695, %v863_v43 }
 0x318   : > { %1283 = vpow2.f32 %v865_v44 }
 0x31c   : > { %v1280_v45 = vpop.eup %1279 }
 0x31d   : > { %v736_v46 = vsel %vm454_vm3, %v1280_v45, 0.0  ;;  %v743_v47 = vpack.c.bf16 %v1280_v45, %v1278_v30 }
 0x31e   : > { %737 = vadd.xlane.f32.xlu1 %v736_v46 }
 0x31f   : > { %1218 = vmatmul.mubr.msk.bf16.vlgmr.msra.gmra.mrb[12].mxu0 %vm454_vm3, %v743_v47 }
 0x320   : > { %v1282_v49 = vpop.eup %1281  ;;  %1228 = vmatpush3.bf16.msra.mxu0 %v881_v48  ;;  %1229 = vmatprep.mubr.msk.bf16.mxu0 %vm1314_vm0, %v1313_v1 }
 0x321   : > { %v872_v50 = vsel %vm454_vm3, %v1282_v49, 0.0 }
 0x322   : > { %v1284_v51 = vpop.eup %1283  ;;  %873 = vadd.xlane.f32.xlu1 %v872_v50 }
 0x323   : > { %v869_v52 = vsel %vm454_vm3, %v1284_v51, 0.0  ;;  %v879_v54 = vpack.c.bf16 %v1282_v49, %v1284_v51 }
 0x324   : > { %870 = vadd.xlane.f32.xlu0 %v869_v52 }
 0x326   : > { %473 = vadd.xlane.f32.xlu1 %v472_v53  ;;  %v1145_v53 = vld [vmem:[%s1531_s5] ss:$0 sm:$0xff] }
 0x327   : > { %1230 = vmatmul.mubr.msk.bf16.vlgmr.msra.gmra.mrb[16].mxu0 %vm454_vm3, %v879_v54 }
 0x328   : > { %470 = vadd.xlane.f32.xlu0 %v469_v55 }
 0x374   : > { %v599_v56 = vpop.xlane.xlu1 %598 }
 0x375   : > { %v603_v61 = vmax.f32 %v599_v56, 1e-30 }
 0x376   : > { %v602_v57 = vpop.xlane.xlu0 %601 }
 0x377   : > { %v604_v63 = vmax.f32 %v602_v57, 1e-30  ;;  %1285 = vrcp.f32 %v603_v61 }
 0x37c   : > { %v735_v59 = vpop.xlane.xlu0 %734 }
 0x37d   : > { %v739_v23 = vmax.f32 %v735_v59, 1e-30 }
 0x381   : > { %v1286_v11 = vpop.eup %1285 }
 0x3ab   : > { %v738_v58 = vpop.xlane.xlu1 %737 }
 0x3ac   : > { %v740_v24 = vmax.f32 %v738_v58, 1e-30 }
 0x3af   : > { %v874_v60 = vpop.xlane.xlu1 %873 }
 0x3b0   : > { %v876_v26 = vmax.f32 %v874_v60, 1e-30 }
 0x3b1   : > { %v871_v62 = vpop.xlane.xlu0 %870 }
 0x3b2   : > { %v875_v25 = vmax.f32 %v871_v62, 1e-30 }
 0x3b3   : > { %v474_v0 = vpop.xlane.xlu1 %473 }
 0x3b4   : > { %v476_v2 = vmax.f32 %v474_v0, 1e-30 }
 0x3b5   : > { %v471_v5 = vpop.xlane.xlu0 %470 }
 0x3b6   : > { %1287 = vrcp.f32 %v476_v2  ;;  %v475_v6 = vmax.f32 %v471_v5, 1e-30 }
 0x3b7   : > { %1289 = vrcp.f32 %v604_v63  ;;  %v520_v7 = vpop.f32.mrb[4].mxu0 }
 0x3b8   : > { %1291 = vrcp.f32 %v475_v6  ;;  %v1195_v8 = vpop.f32.mrb[5].mxu0 }
 0x3b9   : > { %v523_v9 = vpop.f32.mrb[6].mxu0  ;;  %1293 = vrcp.f32 %v739_v23 }
 0x3ba   : > { %v1196_v10 = vpop.f32.mrb[7].mxu0  ;;  %1295 = vrcp.f32 %v740_v24 }
 0x3bb   : > { %1297 = vrcp.f32 %v875_v25 }
 0x3bc   : > { %1299 = vrcp.f32 %v876_v26 }
 0x3bf   : > { %v648_v12 = vpop.f32.mrb[8].mxu0 }
 0x3c0   : > { %v1288_v13 = vpop.eup %1287  ;;  %v655_v14 = vmul.f32 %v1286_v11, %v648_v12  ;;  %v1207_v16 = vpop.f32.mrb[9].mxu0 }
 0x3c1   : > { %v1290_v15 = vpop.eup %1289  ;;  %v528_v17 = vmul.f32 %v1288_v13, %v523_v9  ;;  %v651_v18 = vpop.f32.mrb[10].mxu0 }
 0x3c2   : > { %v1292_v19 = vpop.eup %1291  ;;  %v656_v20 = vmul.f32 %v1290_v15, %v651_v18  ;;  %659 = vrot.lane.b32.xlu0 %v655_v14, %s1326_s12  ;;  %v1208_v21 = vpop.f32.mrb[11].mxu0  ;;  %v1149_v18 = vld [vmem:[%s1532_s6] ss:$0 sm:$0xff] }
 0x3c3   : > { %v527_v22 = vmul.f32 %v1292_v19, %v520_v7  ;;  %530 = vst.msk [vmem:[#allocation2 + $0x8] sm:$0xff] %vm406_vm2, %v528_v17  ;;  %v1294_v27 = vpop.eup %1293  ;;  %v1150_v21 = vld [vmem:[%s1533_s7] ss:$0 sm:$0xff] }
 0x3c4   : > { %661 = vrot.lane.b32.xlu1 %v656_v20, %s1326_s12  ;;  %v1296_v32 = vpop.eup %1295 }
 0x3c5   : > { %529 = vst.msk [vmem:[#allocation2] sm:$0xff] %vm406_vm2, %v527_v22  ;;  %v1298_v37 = vpop.eup %1297 }
 0x3c6   : > { %v1300_v41 = vpop.eup %1299 }
 0x3f2   : > { %v784_v28 = vpop.f32.mrb[12].mxu0 }
 0x3f3   : > { %v791_v30 = vmul.f32 %v1294_v27, %v784_v28  ;;  %v1219_v31 = vpop.f32.mrb[13].mxu0 }
 0x3f4   : > { %v787_v33 = vpop.f32.mrb[14].mxu0 }
 0x3f5   : > { %v792_v35 = vmul.f32 %v1296_v32, %v787_v33  ;;  %795 = vrot.lane.b32.xlu1 %v791_v30, %s1327_s17  ;;  %v1220_v36 = vpop.f32.mrb[15].mxu0 }
 0x3f7   : > { %797 = vrot.lane.b32.xlu0 %v792_v35, %s1327_s17 }
 0x3fa   : > { %v920_v38 = vpop.f32.mrb[16].mxu0 }
 0x3fb   : > { %v927_v39 = vmul.f32 %v1298_v37, %v920_v38  ;;  %v1231_v40 = vpop.f32.mrb[17].mxu0 }
 0x3fc   : > { %v923_v42 = vpop.f32.mrb[18].mxu0 }
 0x3fd   : > { %v928_v43 = vmul.f32 %v1300_v41, %v923_v42  ;;  %931 = vrot.lane.b32.xlu1 %v927_v39, %s1328_s18  ;;  %v1232_v44 = vpop.f32.mrb[19].mxu0 }
 0x3ff   : > { %933 = vrot.lane.b32.xlu0 %v928_v43, %s1328_s18 }
 0x434   : > { %v660_v45 = vpop.permute.xlu0 %659 }
 0x435   : > { %666 = vst.msk [vmem:[#allocation2] sm:$0xff] %vm665_vm4, %v660_v45 }
 0x436   : > { %v662_v46 = vpop.permute.xlu1 %661 }
 0x437   : > { %667 = vst.msk [vmem:[#allocation2 + $0x8] sm:$0xff] %vm665_vm4, %v662_v46 }
 0x467   : > { %v796_v1 = vpop.permute.xlu1 %795 }
 0x468   : > { %802 = vst.msk [vmem:[#allocation2] sm:$0xff] %vm801_vm5, %v796_v1 }
 0x469   : > { %v798_v47 = vpop.permute.xlu0 %797 }
 0x46a   : > { %803 = vst.msk [vmem:[#allocation2 + $0x8] sm:$0xff] %vm801_vm5, %v798_v47 }
 0x46f   : > { %v932_v48 = vpop.permute.xlu1 %931 }
 0x470   : > { %938 = vst.msk [vmem:[#allocation2] sm:$0xff] %vm937_vm6, %v932_v48 }
 0x471   : > { %v934_v49 = vpop.permute.xlu0 %933 }
 0x472   : > { %939 = vst.msk [vmem:[#allocation2 + $0x8] sm:$0xff] %vm937_vm6, %v934_v49 }
 0x477   : > { %v940_v50 = vld [vmem:[#allocation2] sm:$0xff] }
 0x479   : > { %v941_v51 = vld [vmem:[#allocation2 + $0x8] sm:$0xff] }
 0x47a   : > { %v942_v52 = vpack.c.bf16 %v941_v51, %v940_v50 }
 0x47c   : > { %1238 = vmatmul.mubr.msk.bf16.vlgmr.msra.gmra.mrb[16].mxu1 %vm347_vm1, %v942_v52 }
 0x54f   : > { %v1003_v54 = vpop.f32.mrb[16].mxu1 }
 0x550   : > { %v1004_v55 = vadd.f32 %v1145_v53, %v1003_v54  ;;  %v1239_v56 = vpop.f32.mrb[17].mxu1 }
 0x551   : > { %v1006_v57 = vpop.f32.mrb[18].mxu1 }
 0x552   : > { %v1007_v58 = vadd.f32 %v1145_v53, %v1006_v57  ;;  %v1240_v59 = vpop.f32.mrb[19].mxu1  ;;  %v1010_v60 = vadd.f32 %v1004_v55, %v1404_v3 }
 0x554   : > { %v1014_v61 = vsel %vm347_vm1, %v1010_v60, 0.0  ;;  %v1011_v62 = vadd.f32 %v1007_v58, %v1406_v4 }
 0x555   : > { %1015 = vadd.xlane.f32.xlu1 %v1014_v61 }
 0x556   : > { %v1017_v63 = vsel %vm347_vm1, %v1011_v62, 0.0 }
 0x557   : > { %1018 = vadd.xlane.f32.xlu0 %v1017_v63 }
 0x5e2   : > { %v1016_v0 = vpop.xlane.xlu1 %1015 }
 0x5e3   : > { %v1021_v2 = vmul.f32 0.03125, %v1016_v0 }
 0x5e4   : > { %v1019_v5 = vpop.xlane.xlu0 %1018 }
 0x5e5   : > { %v1023_v6 = vsub.f32 %v1010_v60, %v1021_v2  ;;  %v1022_v7 = vmul.f32 0.03125, %v1019_v5 }
 0x5e7   : > { %v1024_v8 = vsub.f32 %v1011_v62, %v1022_v7  ;;  %v1025_v9 = vmul.f32 %v1023_v6, %v1023_v6 }
 0x5e9   : > { %v1027_v10 = vsel %vm347_vm1, %v1025_v9, 0.0  ;;  %v1026_v11 = vmul.f32 %v1024_v8, %v1024_v8 }
 0x5ea   : > { %1028 = vadd.xlane.f32.xlu0 %v1027_v10 }
 0x5eb   : > { %v1030_v3 = vsel %vm347_vm1, %v1026_v11, 0.0 }
 0x5ec   : > { %1031 = vadd.xlane.f32.xlu1 %v1030_v3 }
 0x677   : > { %v1029_v4 = vpop.xlane.xlu0 %1028 }
 0x678   : > { %v1033_v12 = vmul.f32 0.03125, %v1029_v4 }
 0x679   : > { %v1032_v13 = vpop.xlane.xlu1 %1031 }
 0x67a   : > { %v1035_v14 = vadd.f32 1e-05, %v1033_v12  ;;  %v1034_v16 = vmul.f32 0.03125, %v1032_v13 }
 0x67c   : > { %1301 = vrsqrt.f32 %v1035_v14  ;;  %v1036_v15 = vadd.f32 1e-05, %v1034_v16 }
 0x67e   : > { %1303 = vrsqrt.f32 %v1036_v15 }
 0x686   : > { %v1302_v17 = vpop.eup %1301 }
 0x687   : > { %v1039_v19 = vmul.f32 %v1302_v17, %v1023_v6 }
 0x688   : > { %v1304_v20 = vpop.eup %1303 }
 0x689   : > { %v1047_v22 = vmul.f32 %v1149_v18, %v1039_v19  ;;  %v1040_v23 = vmul.f32 %v1304_v20, %v1024_v8 }
 0x68b   : > { %v1055_v24 = vadd.f32 %v1150_v21, %v1047_v22  ;;  %v1048_v25 = vmul.f32 %v1149_v18, %v1040_v23 }
 0x68d   : > { %1057 = vst.msk [vmem:[%s319_s29] sm:$0xff] %vm347_vm1, %v1055_v24  ;;  %v1056_v26 = vadd.f32 %v1150_v21, %v1048_v25 }
 0x68f   : > { %1058 = vst.msk [vmem:[%s319_s29 + $0x8] sm:$0xff] %vm347_vm1, %v1056_v26 }
 0x690 PF: > { %s18_s27 = sadd.s32 1, %s1311_s27  }
 0x691   : > { %p15_p4 = scmp.ge.s32.totalorder %s18_s27, 4  }
 0x693   :  { %17 = sbr.rel (!%p15_p4) target bundleno = 1 (0x1), region = 85 }

// kernel: transformer_forward.21
= control target key start
LH: loop header
LB: loop body
LE: loop exit
PB: predicated region body
PF: predicated region fallthrough
CT: control target
= control target key end

     0   :  { %10 = vsyncpa [#allocation3], 0  ;;  %s695_s0 = inlined_call_operand.vmem [shape: f32[2,8,32], index: 0, kind: input, shape index: {}]   ;;  %s696_s1 = inlined_call_operand.vmem [shape: f32[1,32], index: 1, kind: input, shape index: {}]   ;;  %s697_s2 = inlined_call_operand.vmem [shape: f32[1,32], index: 2, kind: input, shape index: {}]   ;;  %s698_s3 = inlined_call_operand.vmem [shape: bf16[32,128], index: 3, kind: input, shape index: {}]   ;;  %s699_s4 = inlined_call_operand.vmem [shape: f32[1,128], index: 4, kind: input, shape index: {}]   ;;  %s700_s5 = inlined_call_operand.hbm [shape: f32[2,8,128], index: 5, kind: output, shape index: {}]  }
   0x1   :  { %12 = vsyncpa [#allocation3 + $0x1], 0  ;;  %s577_s18 = smov 0   ;;  %s579_s19 = smov 0  }
   0x2   :  { %s581_s20 = smov 0   ;;  %s583_s21 = smov 0  }
   0x3 LB: > { %s598_s22 = sadd.s32 4294967295, %s542_s21   ;;  %s404_s23 = sadd.s32 4294967294, %s542_s21   ;;  %s542_s21 = sphi %s583_s21, %s706_s21   ;;  %s538_s20 = sphi %s581_s20, %s705_s20   ;;  %s534_s19 = sphi %s579_s19, %s704_s19   ;;  %s530_s18 = sphi %s577_s18, %s703_s18  }
   0x4   : > { %s602_s24 = sadd.s32 1, %s542_s21   ;;  %s135_s25 = sadd.s32 1, %s538_s20 }
   0x5   : > { %s132_s26 = ssub.s32 %s542_s21, %s602_s24  ;;  %p145_p0 = scmp.ne.s32.totalorder %s538_s20, %s534_s19 }
   0x6   : > { %p133_p1 = scmp.eq.s32.totalorder %s132_s26, 0  ;;  %p146_p2 = scmp.eq.s32.totalorder %s598_s22, 1 }
   0x7   : > { %p151_p3 = scmp.ne.s32.totalorder %s534_s19, %s530_s18  ;;  %p152_p4 = scmp.eq.s32.totalorder %s404_s23, 1 }
   0x8   : > { %s613_s27 = scalar_select %p133_p1, %s538_s20, %s135_s25  }
   0x9   : > { %p615_p5 = por %p146_p2, %p145_p0  ;;  %p619_p6 = por %p152_p4, %p151_p3 }
   0xa   : > { %p407_p7 = scmp.ge.s32.totalorder %s542_s21, 1  ;;  %p189_p8 = scmp.lt.s32.totalorder %s542_s21, 3 }
   0xc   : > { %p190_p9 = pnand %p407_p7, %p189_p8 }
   0xd   : > { %p216_p10 = scmp.lt.s32.totalorder (!%p190_p9), %s598_s22, 1  ;;  %vm224_vm0 = vcmask (!%p190_p9), 261120   ;;  %v472_v7 = vld [vmem:[%s698_s3] sm:$0xff] (!%p190_p9)   ;;  %v544_v8 = vmov (!%p190_p9), 0.0   ;;  %v473_v9 = vld [vmem:[%s698_s3 + $0x8] sm:$0xff] (!%p190_p9)   ;;  %vm545_vm1 = vmmov (!%p190_p9), 0  }
   0xe   : > { %193 = sbr.rel (%p190_p9) target bundleno = 883 (0x373), region = 40  ;;  %423 = vmatprep.subr.bf16.mxu0 (!%p190_p9), %v544_v8  ;;  %427 = vmatprep.mubr.msk.bf16.mxu0 (!%p190_p9), %vm545_vm1, %v544_v8  ;;  %v410_v14 = vld [vmem:[%s696_s1] ss:$0 sm:$0xff] (!%p190_p9)  ;;  %s213_s26 = sand.u32 (!%p190_p9), 1, %s534_s19  }
   0xf   : > { %424 = vmatpush3.bf16.msra.mxu0 (!%p190_p9), %v472_v7  ;;  %v411_v16 = vld [vmem:[%s697_s2] ss:$0 sm:$0xff] (!%p190_p9)  ;;  %s332_s12 = scalar_lea.sflag (!%p190_p9), [#allocation3], %s213_s26 }
  0x10   : > { %425 = vmatprep.subr.bf16.mxu0 (!%p190_p9), %v544_v8  ;;  %v412_v20 = vld [vmem:[%s699_s4] ss:$0 sm:$0xff] (!%p190_p9) }
  0x13   : > { %426 = vmatpush3.bf16.msra.mxu0 (!%p190_p9), %v473_v9 }
  0x15   : > { %s217_s30 = scalar_select %p216_p10, %s598_s22, 1 }
  0x17   : > { %s409_s6 = sshll.u32 %s217_s30, 3  ;;  %s408_s30 = sshll.u32 %s213_s26, 3 }
  0x18   : > { %s219_s9 = scalar_lea.vmem %s695_s0, %s409_s6  ;;  %s417_s6 = sshll.u32 %s598_s22, 7 }
  0x19   : > { %v221_v0 = vld [vmem:[%s219_s9] sm:$0xff]  ;;  %s215_s7 = scalar_lea.vmem [#allocation2], %s408_s30  ;;  %s653_s11 = scalar_lea.hbm %s700_s5, %s417_s6 }
  0x1a   : > { %v225_v1 = vsel %vm224_vm0, %v221_v0, 0.0  ;;  %s345_s8 = sshll.u32 %s215_s7, 4  ;;  %s546_s22 = smov [#allocation2]   ;;  %s655_s8 = int_to_ptr.vmem [resolvable:$true] %s345_s8 }
  0x1b   : > { %226 = vadd.xlane.f32.xlu0 %v225_v1  ;;  %s480_s13 = scalar_lea.vmem %s655_s8, 128  ;;  %s484_s14 = sshll.u32 %s546_s22, 4  ;;  %s485_s14 = int_to_ptr.vmem [resolvable:$false] %s484_s14 }
  0x1c   : > { %p481_p11 = scmp.ne.s32.totalorder %s655_s8, %s480_s13  ;;  %s486_s15 = scalar_lea.vmem %s485_s14, 256 }
  0x1d   : > { %p487_p0 = scmp.lt.s32.totalorder %s655_s8, %s485_s14  ;;  %p488_p1 = scmp.lt.s32.totalorder %s486_s15, %s480_s13 }
  0x1e   : > { %p482_p12 = pnand %p481_p11, %p615_p5 }
  0x1f   : > { %p489_p2 = por %p488_p1, %p487_p0 }
  0x20   : > { %p483_p13 = pneg %p482_p12 }
  0x22   : > { %p490_p3 = pnand %p489_p2, %p483_p13 }
  0xa8   : > { %v227_v2 = vpop.xlane.xlu0 %226 }
  0xa9   : > { %v229_v3 = vmul.f32 0.03125, %v227_v2 }
  0xab   : > { %v230_v4 = vsub.f32 %v221_v0, %v229_v3 }
  0xad   : > { %v231_v5 = vmul.f32 %v230_v4, %v230_v4 }
  0xaf   : > { %v232_v6 = vsel %vm224_vm0, %v231_v5, 0.0 }
  0xb0   : > { %233 = vadd.xlane.f32.xlu0 %v232_v6 }
 0x13d   : > { %v234_v10 = vpop.xlane.xlu0 %233 }
 0x13e   : > { %v235_v11 = vmul.f32 0.03125, %v234_v10 }
 0x140   : > { %v236_v12 = vadd.f32 1e-05, %v235_v11 }
 0x142   : > { %474 = vrsqrt.f32 %v236_v12 }
 0x14c   : > { %v475_v13 = vpop.eup %474 }
 0x14d   : > { %v238_v15 = vmul.f32 %v475_v13, %v230_v4 }
 0x14f   : > { %v245_v17 = vmul.f32 %v410_v14, %v238_v15 }
 0x151   : > { %v252_v18 = vadd.f32 %v411_v16, %v245_v17 }
 0x153   : > { %v253_v19 = vpack.c.bf16 %v252_v18, %v252_v18 }
 0x155   : > { %428 = vmatmul.mubr.msk.bf16.vlgmr.msra.gmra.mrb[0].mxu0 %vm224_vm0, %v253_v19 }
 0x228   : > { %v314_v21 = vpop.f32.mrb[0].mxu0 }
 0x229   : > { %v315_v22 = vadd.f32 %v412_v20, %v314_v21  ;;  %v429_v23 = vpop.f32.mrb[1].mxu0 }
 0x22a   : > { %v317_v24 = vpop.f32.mrb[2].mxu0 }
 0x22b   : > { %320 = vmax.xlane.f32.xlu1 %v315_v22  ;;  %v430_v25 = vpop.f32.mrb[3].mxu0 }
 0x2b8   : > { %v321_v26 = vpop.xlane.xlu1 %320 }
 0x2b9   : > { %v322_v27 = vsub.f32 %v315_v22, %v321_v26 }
 0x2bb   : > { %v323_v28 = vmul.f32 1.442695, %v322_v27 }
 0x2bd   : > { %476 = vpow2.f32 %v323_v28 }
 0x2c7   : > { %v477_v29 = vpop.eup %476 }
 0x2c8   : > { %325 = vadd.xlane.f32.xlu1 %v477_v29 }
 0x355   : > { %v326_v30 = vpop.xlane.xlu1 %325 }
 0x356   : > { %478 = vlog2.f32 %v326_v30 }
 0x360   : > { %v479_v31 = vpop.eup %478 }
 0x361   : > { %v328_v32 = vmul.f32 0.6931472, %v479_v31 }
 0x363   : > { %v329_v33 = vsub.f32 %v322_v27, %v328_v32 }
 0x365   : > { %330 = vst [vmem:[%s215_s7] sm:$0xff] %v329_v33 }
 0x366   : > { %493 = shalt.err (!%p490_p3)
}
 0x367   : > { %s494_s16 = scalar_lea.hbm %s653_s11, 128  ;;  %s498_s25 = scalar_lea.hbm %s700_s5, 256 }
 0x368   : > { %p495_p4 = scmp.ne.s32.totalorder %s653_s11, %s494_s16  ;;  %p499_p9 = scmp.lt.u32.totalorder %s653_s11, %s700_s5 }
 0x369   : > { %p500_p10 = scmp.lt.u32.totalorder %s498_s25, %s494_s16  ;;  %p502_p12 = scmp.lt.u32.totalorder %s494_s16, %s653_s11 }
 0x36a   : > { %p496_p7 = pnand %p495_p4, %p615_p5 }
 0x36b   : > { %p501_p11 = por %p500_p10, %p499_p9 }
 0x36c   : > { %p497_p8 = pneg %p496_p7 }
 0x36d   : > { %p503_p13 = por %p502_p12, %p501_p11 }
 0x36f   : > { %p504_p0 = pnand %p503_p13, %p497_p8 }
 0x371   : > { %507 = shalt.err (!%p504_p0)
}
 0x372   : > { %431 = dma.vmem_to_hbm [thread:$0]  (%p615_p5), %s655_s8, 128, %s653_s11, %s332_s12  }
 0x373 PF: > { %p437_p1 = scmp.ge.s32.totalorder %s542_s21, 2  ;;  %s357_s6 = sand.u32 1, %s530_s18  }
 0x374   : > { %s358_s7 = scalar_lea.sflag [#allocation3], %s357_s6 }
 0x375   : > { %p434_p2 = pnand %p437_p1, %p619_p6 }
 0x377   : > { %525 = dma.done.wait (!%p434_p2), %s358_s7, 128  }
 0x378   : > { %527 = vsyncadd (!%p434_p2), %s358_s7, 4294967168  ;;  %p15_p3 = scmp.ge.s32.totalorder %s602_s24, 4   ;;  %s703_s18 = smov %s534_s19 }
 0x379   : > { %s704_s19 = smov %s538_s20  ;;  %s705_s20 = smov %s613_s27 }
 0x37a   : > { %s706_s21 = smov %s602_s24  ;;  %17 = sbr.rel (!%p15_p3) target bundleno = 3 (0x3), region = 75 }
 0x381   :  { %363 = vsyncpa [#allocation3], 1 }
 0x382   :  { %365 = vsyncpa [#allocation3 + $0x1], 1 }

// kernel: transformer_forward.16
= control target key start
LH: loop header
LB: loop body
LE: loop exit
PB: predicated region body
PF: predicated region fallthrough
CT: control target
= control target key end

     0   :  { %s1392_s13 = smov 0   ;;  %s1531_s0 = inlined_call_operand.vmem [shape: f32[2,8,32], index: 0, kind: input, shape index: {}]   ;;  %s1532_s1 = inlined_call_operand.vmem [shape: f32[2,16,32], index: 1, kind: input, shape index: {}]   ;;  %s1533_s2 = inlined_call_operand.vmem [shape: bf16[32,32], index: 2, kind: input, shape index: {}]   ;;  %s1534_s3 = inlined_call_operand.vmem [shape: f32[1,32], index: 3, kind: input, shape index: {}]   ;;  %s1535_s4 = inlined_call_operand.vmem [shape: bf16[32,64], index: 4, kind: input, shape index: {}]   ;;  %s1536_s5 = inlined_call_operand.vmem [shape: f32[1,64], index: 5, kind: input, shape index: {}]   ;;  %s1537_s6 = inlined_call_operand.vmem [shape: bf16[32,32], index: 6, kind: input, shape index: {}]   ;;  %s1538_s7 = inlined_call_operand.vmem [shape: f32[1,32], index: 7, kind: input, shape index: {}]   ;;  %s1539_s8 = inlined_call_operand.vmem [shape: f32[1,32], index: 8, kind: input, shape index: {}]   ;;  %s1540_s9 = inlined_call_operand.vmem [shape: f32[1,32], index: 9, kind: input, shape index: {}]   ;;  %s1541_s10 = inlined_call_operand.vmem [shape: f32[2,8,32], index: 10, kind: output, shape index: {}]  }
   0x1 LB: > { %s1142_s14 = sadd.s32 4294967295, %s1323_s13   ;;  %p1146_p0 = scmp.ge.s32.totalorder %s1323_s13, 1  ;;  %s1323_s13 = sphi %s1392_s13, %s20_s13  }
   0x2   : > { %p321_p1 = scmp.lt.s32.totalorder %s1323_s13, 3 }
   0x4   : > { %p322_p2 = pnand %p1146_p0, %p321_p1 }
   0x5   : > { %v1293_v0 = vld [vmem:[%s1535_s4] sm:$0xff] (!%p322_p2)   ;;  %v1325_v1 = vmov (!%p322_p2), 0.0   ;;  %v1295_v3 = vld [vmem:[%s1535_s4 + $0x8] sm:$0xff] (!%p322_p2)   ;;  %vm1326_vm0 = vmmov (!%p322_p2), 0   ;;  %p362_p3 = scmp.lt.s32.totalorder (!%p322_p2), %s1142_s14, 1  ;;  %vm403_vm1 = vcmask (!%p322_p2), 261120  }
   0x6   : > { %325 = sbr.rel (%p322_p2) target bundleno = 1623 (0x657), region = 60  ;;  %1209 = vmatprep.subr.bf16.mxu1 (!%p322_p2), %v1325_v1  ;;  %1201 = vmatprep.subr.bf16.mxu0 (!%p322_p2), %v1325_v1  ;;  %v1294_v2 = vld [vmem:[%s1533_s2] sm:$0xff] (!%p322_p2)   ;;  %v1296_v4 = vld [vmem:[%s1533_s2 + $0x8] sm:$0xff] (!%p322_p2)   ;;  %vm518_vm2 = vcmask (!%p322_p2), 64512   ;;  %s1327_s17 = smov (!%p322_p2), 112   ;;  %vm565_vm3 = vcmask (!%p322_p2), 130048  }
   0x7   : > { %1210 = vmatpush3.bf16.msra.mxu1 (!%p322_p2), %v1293_v0  ;;  %1213 = vmatprep.mubr.msk.bf16.mxu1 (!%p322_p2), %vm1326_vm0, %v1325_v1  ;;  %v1151_v10 = vld [vmem:[%s1534_s3] ss:$0 sm:$0xff] (!%p322_p2)  ;;  %s1328_s18 = smov (!%p322_p2), 120   ;;  %s1329_s19 = smov (!%p322_p2), 104   ;;  %vm743_vm4 = vcmask (!%p322_p2), 130112   ;;  %vm859_vm5 = vcmask (!%p322_p2), 195712  }
   0x8   : > { %1211 = vmatprep.subr.bf16.mxu1 (!%p322_p2), %v1325_v1  ;;  %1202 = vmatpush3.bf16.msra.mxu0 (!%p322_p2), %v1294_v2  ;;  %v1155_v11 = vld [vmem:[%s1536_s5] ss:$0 sm:$0xff] (!%p322_p2)  ;;  %s1330_s20 = smov (!%p322_p2), 96   ;;  %s1331_s21 = smov (!%p322_p2), 80   ;;  %vm975_vm6 = vcmask (!%p322_p2), 261312  }
   0x9   : > { %1203 = vmatprep.subr.bf16.mxu0 (!%p322_p2), %v1325_v1  ;;  %1205 = vmatprep.mubr.msk.bf16.mxu0 (!%p322_p2), %vm1326_vm0, %v1325_v1  ;;  %s1332_s22 = smov (!%p322_p2), 72   ;;  %s1334_s25 = smov (!%p322_p2), 8  }
   0xa   : > { %s1336_s11 = smov (!%p322_p2), 24  }
   0xb   : > { %1212 = vmatpush3.bf16.msra.mxu1 (!%p322_p2), %v1295_v3 }
   0xc   : > { %1204 = vmatpush3.bf16.msra.mxu0 (!%p322_p2), %v1296_v4  ;;  %1223 = vmatprep.subr.bf16.mxu1 (!%p322_p2), %v1325_v1 }
   0xd   : > { %s1543_s14 = smov (!%p362_p3, %s1142_s14), 1  ;;  %1217 = vmatprep.subr.bf16.mxu0 %v1325_v1 }
   0xe   : > { %s1175_s23 = sshll.u32 %s1543_s14, 4  ;;  %s1147_s24 = sshll.u32 %s1543_s14, 3 }
   0xf   : > { %s370_s27 = scalar_lea.vmem %s1532_s1, %s1175_s23  ;;  %s365_s30 = scalar_lea.vmem %s1531_s0, %s1147_s24 }
  0x10   : > { %v377_v5 = vld [vmem:[%s370_s27] sm:$0xff]  ;;  %v378_v6 = vld [vmem:[%s370_s27 + $0x8] sm:$0xff]  ;;  %s1333_s23 = smov 88  }
  0x11   : > { %v1433_v7 = vld [vmem:[%s365_s30] sm:$0xff]  ;;  %v448_v8 = vpack.c.bf16 %v378_v6, %v377_v5  ;;  %s1335_s30 = smov 16  }
  0x12   : > { %v379_v9 = vpack.c.bf16 %v1433_v7, %v1433_v7 }
  0x13   : > { %1214 = vmatmul.mubr.msk.bf16.vlgmr.msra.gmra.mrb[0].mxu1 %vm403_vm1, %v448_v8 }
  0x14   : > { %1206 = vmatmul.mubr.msk.bf16.vlgmr.msra.gmra.mrb[0].mxu0 %vm403_vm1, %v379_v9  ;;  %1225 = vmatprep.mubr.msk.bf16.mxu1 %vm1326_vm0, %v1325_v1 }
  0x15   : > { %1219 = vmatprep.mubr.msk.bf16.mxu0 %vm1326_vm0, %v1325_v1 }
  0xe6   : > { %v509_v12 = vpop.f32.mrb[0].mxu1 }
  0xe7   : > { %v441_v13 = vpop.f32.mrb[0].mxu0  ;;  %v1215_v14 = vpop.f32.mrb[1].mxu1  ;;  %v510_v19 = vadd.f32 %v1155_v11, %v509_v12 }
  0xe8   : > { %v442_v15 = vadd.f32 %v1151_v10, %v441_v13  ;;  %v1207_v16 = vpop.f32.mrb[1].mxu0  ;;  %v512_v17 = vpop.f32.mrb[2].mxu1 }
  0xe9   : > { %v444_v18 = vpop.f32.mrb[2].mxu0  ;;  %v513_v20 = vadd.f32 %v1155_v11, %v512_v17  ;;  %v1216_v21 = vpop.f32.mrb[3].mxu1 }
  0xea   : > { %v447_v22 = vmul.f32 0.35355338, %v442_v15  ;;  %v1208_v23 = vpop.f32.mrb[3].mxu0 }
  0xeb   : > { %v1450_v24 = vpack.c.bf16 %v513_v20, %v510_v19 }
  0xec   : > { %v516_v25 = vpack.c.bf16 %v447_v22, %v447_v22 }
  0xed   : > { %747 = vrot.lane.b32.xlu1 %v1450_v24, %s1327_s17  ;;  %631 = vrot.lane.b32.xlu0 %v1450_v24, %s1328_s18  ;;  %v523_v26 = vsel %vm518_vm2, %v1450_v24, 0 }
  0xee   : > { %1218 = vmatpush3.bf16.xpose.msra.mxu0 %v523_v26 }
  0xef   : > { %1229 = vmatprep.subr.bf16.mxu0 %v1325_v1 }
  0xf1   : > { %745 = vrot.lane.b32.xlu1 %v516_v25, %s1327_s17  ;;  %629 = vrot.lane.b32.xlu0 %v516_v25, %s1328_s18 }
  0xf5   : > { %861 = vrot.lane.b32.xlu1 %v516_v25, %s1329_s19  ;;  %863 = vrot.lane.b32.xlu0 %v1450_v24, %s1329_s19 }
  0xf6   : > { %1220 = vmatmul.mubr.msk.bf16.vlgmr.msra.gmra.mrb[4].mxu0 %vm518_vm2, %v516_v25 }
  0xf7   : > { %1231 = vmatprep.mubr.msk.bf16.mxu0 %vm1326_vm0, %v1325_v1 }
 0x15f   : > { %v632_v27 = vpop.permute.xlu0 %631  ;;  %v748_v29 = vpop.permute.xlu1 %747 }
 0x160   : > { %v637_v28 = vsel %vm518_vm2, %v632_v27, 0  ;;  %v753_v31 = vsel %vm518_vm2, %v748_v29, 0 }
 0x161   : > { %1230 = vmatpush3.bf16.xpose.msra.mxu0 %v637_v28 }
 0x162   : > { %1241 = vmatprep.subr.bf16.mxu0 %v1325_v1 }
 0x163   : > { %v630_v30 = vpop.permute.xlu0 %629  ;;  %v746_v33 = vpop.permute.xlu1 %745 }
 0x167   : > { %v864_v32 = vpop.permute.xlu0 %863  ;;  %v862_v35 = vpop.permute.xlu1 %861 }
 0x168   : > { %1232 = vmatmul.mubr.msk.bf16.vlgmr.msra.gmra.mrb[8].mxu0 %vm518_vm2, %v630_v30  ;;  %v869_v34 = vsel %vm518_vm2, %v864_v32, 0 }
 0x169   : > { %1242 = vmatpush3.bf16.xpose.msra.mxu0 %v753_v31  ;;  %1243 = vmatprep.mubr.msk.bf16.mxu0 %vm1326_vm0, %v1325_v1 }
 0x16a   : > { %1253 = vmatprep.subr.bf16.mxu0 %v1325_v1 }
 0x170   : > { %1244 = vmatmul.mubr.msk.bf16.vlgmr.msra.gmra.mrb[12].mxu0 %vm518_vm2, %v746_v33 }
 0x171   : > { %1254 = vmatpush3.bf16.xpose.msra.mxu0 %v869_v34  ;;  %1255 = vmatprep.mubr.msk.bf16.mxu0 %vm1326_vm0, %v1325_v1 }
 0x172   : > { %1265 = vmatprep.subr.bf16.mxu0 %v1325_v1 }
 0x178   : > { %1256 = vmatmul.mubr.msk.bf16.vlgmr.msra.gmra.mrb[16].mxu0 %vm518_vm2, %v862_v35 }
 0x179   : > { %1269 = vmatprep.mubr.msk.bf16.mxu0 %vm1326_vm0, %v1325_v1 }
 0x1c9   : > { %v559_v36 = vpop.f32.mrb[4].mxu0 }
 0x1ca   : > { %v1221_v37 = vpop.f32.mrb[5].mxu0  ;;  %v566_v38 = vsel %vm565_vm3, %v559_v36, -inf }
 0x1cb   : > { %567 = vmax.xlane.f32.xlu0 %v566_v38  ;;  %v562_v39 = vpop.f32.mrb[6].mxu0 }
 0x1cc   : > { %v1222_v40 = vpop.f32.mrb[7].mxu0 }
 0x23b   : > { %v673_v41 = vpop.f32.mrb[8].mxu0 }
 0x23c   : > { %v1233_v42 = vpop.f32.mrb[9].mxu0  ;;  %v679_v43 = vsel %vm565_vm3, %v673_v41, -inf }
 0x23d   : > { %680 = vmax.xlane.f32.xlu1 %v679_v43  ;;  %v676_v44 = vpop.f32.mrb[10].mxu0 }
 0x23e   : > { %v1234_v45 = vpop.f32.mrb[11].mxu0 }
 0x243   : > { %v789_v46 = vpop.f32.mrb[12].mxu0 }
 0x244   : > { %v1245_v47 = vpop.f32.mrb[13].mxu0  ;;  %v795_v48 = vsel %vm565_vm3, %v789_v46, -inf }
 0x245   : > { %796 = vmax.xlane.f32.xlu0 %v795_v48  ;;  %v792_v49 = vpop.f32.mrb[14].mxu0 }
 0x246   : > { %v1246_v50 = vpop.f32.mrb[15].mxu0  ;;  %v1298_v49 = vld [vmem:[%s1537_s6 + $0x8] sm:$0xff]  }
 0x24b   : > { %v905_v51 = vpop.f32.mrb[16].mxu0 }
 0x24c   : > { %v1257_v52 = vpop.f32.mrb[17].mxu0  ;;  %v911_v53 = vsel %vm565_vm3, %v905_v51, -inf }
 0x24d   : > { %912 = vmax.xlane.f32.xlu0 %v911_v53  ;;  %v908_v54 = vpop.f32.mrb[18].mxu0 }
 0x24e   : > { %580 = vrot.lane.b32.xlu1 %v1450_v24, %s1330_s20  ;;  %v1258_v55 = vpop.f32.mrb[19].mxu0 }
 0x252   : > { %808 = vrot.lane.b32.xlu1 %v1450_v24, %s1331_s21 }
 0x256   : > { %924 = vrot.lane.b32.xlu1 %v1450_v24, %s1332_s22  ;;  %s374_s22 = scalar_lea.vmem %s1541_s10, %s1147_s24 }
 0x258   : > { %v568_v56 = vpop.xlane.xlu0 %567 }
 0x259   : > { %v569_v57 = vmax.f32 %v568_v56, -1e+30 }
 0x25b   : > { %v570_v58 = vsub.f32 %v559_v36, %v569_v57 }
 0x25d   : > { %v571_v59 = vmul.f32 1.442695, %v570_v58 }
 0x25f   : > { %1299 = vpow2.f32 %v571_v59 }
 0x263   : > { %692 = vrot.lane.b32.xlu0 %v1450_v24, %s1333_s23 }
 0x269   : > { %v1300_v62 = vpop.eup %1299 }
 0x26a   : > { %v578_v3 = vpack.c.bf16 %v1300_v62, %v1300_v62  ;;  %v573_v24 = vsel %vm565_vm3, %v1300_v62, 0.0 }
 0x2ca   : > { %v681_v60 = vpop.xlane.xlu1 %680 }
 0x2cb   : > { %v682_v61 = vmax.f32 %v681_v60, -1e+30 }
 0x2cd   : > { %v683_v63 = vsub.f32 %v673_v41, %v682_v61 }
 0x2ce   : > { %v581_v0 = vpop.permute.xlu1 %580 }
 0x2cf   : > { %v684_v2 = vmul.f32 1.442695, %v683_v63  ;;  %1224 = vmatpush3.bf16.msra.mxu1 %v581_v0  ;;  %v1167_v0 = vld [vmem:[%s1538_s7] ss:$0 sm:$0xff] }
 0x2d0   : > { %1235 = vmatprep.subr.bf16.mxu1 %v1325_v1 }
 0x2d1   : > { %1301 = vpow2.f32 %v684_v2 }
 0x2d2   : > { %1226 = vmatmul.mubr.msk.bf16.vlgmr.msra.gmra.mrb[4].mxu1 %vm565_vm3, %v578_v3  ;;  %v797_v4 = vpop.xlane.xlu0 %796  ;;  %v809_v17 = vpop.permute.xlu1 %808 }
 0x2d3   : > { %v798_v5 = vmax.f32 %v797_v4, -1e+30  ;;  %1237 = vmatprep.mubr.msk.bf16.mxu1 %vm1326_vm0, %v1325_v1 }
 0x2d5   : > { %v799_v6 = vsub.f32 %v789_v46, %v798_v5  ;;  %v1297_v46 = vld [vmem:[%s1537_s6] sm:$0xff]  }
 0x2d6   : > { %v925_v21 = vpop.permute.xlu1 %924  ;;  %1266 = vmatpush3.bf16.msra.mxu0 %v1297_v46 }
 0x2d7   : > { %v800_v8 = vmul.f32 1.442695, %v799_v6  ;;  %1267 = vmatprep.subr.bf16.mxu0 %v1325_v1 }
 0x2d9   : > { %1303 = vpow2.f32 %v800_v8 }
 0x2da   : > { %v913_v9 = vpop.xlane.xlu0 %912  ;;  %1268 = vmatpush3.bf16.msra.mxu0 %v1298_v49 }
 0x2db   : > { %v1302_v10 = vpop.eup %1301  ;;  %v914_v11 = vmax.f32 %v913_v9, -1e+30 }
 0x2dc   : > { %v686_v12 = vsel %vm565_vm3, %v1302_v10, 0.0  ;;  %v691_v16 = vpack.c.bf16 %v1302_v10, %v1302_v10 }
 0x2dd   : > { %v915_v13 = vsub.f32 %v905_v51, %v914_v11  ;;  %687 = vadd.xlane.f32.xlu0 %v686_v12 }
 0x2de   : > { %v693_v14 = vpop.permute.xlu0 %692 }
 0x2df   : > { %v916_v15 = vmul.f32 1.442695, %v915_v13  ;;  %1236 = vmatpush3.bf16.msra.mxu1 %v693_v14 }
 0x2e0   : > { %1247 = vmatprep.subr.bf16.mxu1 %v1325_v1 }
 0x2e1   : > { %1305 = vpow2.f32 %v916_v15 }
 0x2e2   : > { %1238 = vmatmul.mubr.msk.bf16.vlgmr.msra.gmra.mrb[8].mxu1 %vm565_vm3, %v691_v16 }
 0x2e3   : > { %v1304_v18 = vpop.eup %1303  ;;  %1248 = vmatpush3.bf16.msra.mxu1 %v809_v17  ;;  %1249 = vmatprep.mubr.msk.bf16.mxu1 %vm1326_vm0, %v1325_v1 }
 0x2e4   : > { %v802_v19 = vsel %vm565_vm3, %v1304_v18, 0.0  ;;  %1259 = vmatprep.subr.bf16.mxu1 %v1325_v1  ;;  %v807_v20 = vpack.c.bf16 %v1304_v18, %v1304_v18 }
 0x2e5   : > { %803 = vadd.xlane.f32.xlu1 %v802_v19 }
 0x2ea   : > { %1250 = vmatmul.mubr.msk.bf16.vlgmr.msra.gmra.mrb[12].mxu1 %vm565_vm3, %v807_v20  ;;  %v1172_v20 = vld [vmem:[%s1540_s9] ss:$0 sm:$0xff] }
 0x2eb   : > { %v1306_v22 = vpop.eup %1305  ;;  %1260 = vmatpush3.bf16.msra.mxu1 %v925_v21  ;;  %1261 = vmatprep.mubr.msk.bf16.mxu1 %vm1326_vm0, %v1325_v1 }
 0x2ec   : > { %v918_v23 = vsel %vm565_vm3, %v1306_v22, 0.0  ;;  %v923_v25 = vpack.c.bf16 %v1306_v22, %v1306_v22 }
 0x2ed   : > { %919 = vadd.xlane.f32.xlu0 %v918_v23 }
 0x2f1   : > { %574 = vadd.xlane.f32.xlu0 %v573_v24 }
 0x2f2   : > { %1262 = vmatmul.mubr.msk.bf16.vlgmr.msra.gmra.mrb[16].mxu1 %vm565_vm3, %v923_v25 }
 0x36a   : > { %v688_v26 = vpop.xlane.xlu0 %687 }
 0x36b   : > { %v689_v34 = vmax.f32 %v688_v26, 1e-30 }
 0x372   : > { %v804_v37 = vpop.xlane.xlu1 %803 }
 0x373   : > { %v805_v38 = vmax.f32 %v804_v37, 1e-30 }
 0x37a   : > { %v920_v27 = vpop.xlane.xlu0 %919 }
 0x37b   : > { %v921_v43 = vmax.f32 %v920_v27, 1e-30 }
 0x37e   : > { %v575_v28 = vpop.xlane.xlu0 %574 }
 0x37f   : > { %v576_v29 = vmax.f32 %v575_v28, 1e-30 }
 0x381   : > { %1307 = vrcp.f32 %v576_v29 }
 0x382   : > { %1309 = vrcp.f32 %v689_v34 }
 0x383   : > { %1311 = vrcp.f32 %v805_v38 }
 0x384   : > { %1313 = vrcp.f32 %v921_v43 }
 0x38b   : > { %v1308_v30 = vpop.eup %1307 }
 0x38c   : > { %v1310_v39 = vpop.eup %1309 }
 0x38d   : > { %v1312_v47 = vpop.eup %1311 }
 0x38e   : > { %v1314_v54 = vpop.eup %1313 }
 0x3a5   : > { %v620_v31 = vpop.f32.mrb[4].mxu1 }
 0x3a6   : > { %v626_v32 = vmul.f32 %v1308_v30, %v620_v31  ;;  %v1227_v33 = vpop.f32.mrb[5].mxu1 }
 0x3a7   : > { %v623_v35 = vpop.f32.mrb[6].mxu1 }
 0x3a8   : > { %627 = vst.msk [vmem:[#allocation2] sm:$0xff] %vm518_vm2, %v626_v32  ;;  %v1228_v36 = vpop.f32.mrb[7].mxu1 }
 0x3b5   : > { %v732_v40 = vpop.f32.mrb[8].mxu1 }
 0x3b6   : > { %v738_v41 = vmul.f32 %v1310_v39, %v732_v40  ;;  %v1239_v42 = vpop.f32.mrb[9].mxu1 }
 0x3b7   : > { %v735_v44 = vpop.f32.mrb[10].mxu1 }
 0x3b8   : > { %v1240_v45 = vpop.f32.mrb[11].mxu1  ;;  %740 = vrot.lane.b32.xlu1 %v738_v41, %s1334_s25 }
 0x3bd   : > { %v848_v48 = vpop.f32.mrb[12].mxu1 }
 0x3be   : > { %v854_v50 = vmul.f32 %v1312_v47, %v848_v48  ;;  %v1251_v51 = vpop.f32.mrb[13].mxu1 }
 0x3bf   : > { %v851_v52 = vpop.f32.mrb[14].mxu1 }
 0x3c0   : > { %856 = vrot.lane.b32.xlu0 %v854_v50, %s1335_s30  ;;  %v1252_v53 = vpop.f32.mrb[15].mxu1 }
 0x3c5   : > { %v964_v55 = vpop.f32.mrb[16].mxu1 }
 0x3c6   : > { %v970_v56 = vmul.f32 %v1314_v54, %v964_v55  ;;  %v1263_v57 = vpop.f32.mrb[17].mxu1 }
 0x3c7   : > { %v967_v58 = vpop.f32.mrb[18].mxu1 }
 0x3c8   : > { %v1264_v59 = vpop.f32.mrb[19].mxu1  ;;  %972 = vrot.lane.b32.xlu1 %v970_v56, %s1336_s11 }
 0x42a   : > { %v741_v60 = vpop.permute.xlu1 %740 }
 0x42b   : > { %744 = vst.msk [vmem:[#allocation2] sm:$0xff] %vm743_vm4, %v741_v60 }
 0x432   : > { %v857_v61 = vpop.permute.xlu0 %856 }
 0x433   : > { %860 = vst.msk [vmem:[#allocation2] sm:$0xff] %vm859_vm5, %v857_v61 }
 0x43a   : > { %v973_v1 = vpop.permute.xlu1 %972 }
 0x43b   : > { %976 = vst.msk [vmem:[#allocation2] sm:$0xff] %vm975_vm6, %v973_v1 }
 0x442   : > { %v977_v62 = vld [vmem:[#allocation2] sm:$0xff] }
 0x443   : > { %v978_v63 = vpack.c.bf16 %v977_v62, %v977_v62 }
 0x445   : > { %1270 = vmatmul.mubr.msk.bf16.vlgmr.msra.gmra.mrb[20].mxu0 %vm403_vm1, %v978_v63 }
 0x518   : > { %v1039_v2 = vpop.f32.mrb[20].mxu0 }
 0x519   : > { %v1040_v3 = vadd.f32 %v1167_v0, %v1039_v2  ;;  %v1271_v4 = vpop.f32.mrb[21].mxu0 }
 0x51a   : > { %v1042_v5 = vpop.f32.mrb[22].mxu0 }
 0x51b   : > { %v1272_v6 = vpop.f32.mrb[23].mxu0  ;;  %v1045_v8 = vadd.f32 %v1040_v3, %v1433_v7  ;;  %v1171_v7 = vld [vmem:[%s1539_s8] ss:$0 sm:$0xff] }
 0x51d   : > { %v1048_v9 = vsel %vm403_vm1, %v1045_v8, 0.0 }
 0x51e   : > { %1049 = vadd.xlane.f32.xlu1 %v1048_v9 }
 0x5ab   : > { %v1050_v10 = vpop.xlane.xlu1 %1049 }
 0x5ac   : > { %v1052_v11 = vmul.f32 0.03125, %v1050_v10 }
 0x5ae   : > { %v1053_v12 = vsub.f32 %v1045_v8, %v1052_v11 }
 0x5b0   : > { %v1054_v13 = vmul.f32 %v1053_v12, %v1053_v12 }
 0x5b2   : > { %v1055_v14 = vsel %vm403_vm1, %v1054_v13, 0.0 }
 0x5b3   : > { %1056 = vadd.xlane.f32.xlu0 %v1055_v14 }
 0x640   : > { %v1057_v15 = vpop.xlane.xlu0 %1056 }
 0x641   : > { %v1058_v16 = vmul.f32 0.03125, %v1057_v15 }
 0x643   : > { %v1059_v17 = vadd.f32 1e-05, %v1058_v16 }
 0x645   : > { %1315 = vrsqrt.f32 %v1059_v17 }
 0x64f   : > { %v1316_v18 = vpop.eup %1315 }
 0x650   : > { %v1061_v19 = vmul.f32 %v1316_v18, %v1053_v12 }
 0x652   : > { %v1068_v21 = vmul.f32 %v1171_v7, %v1061_v19 }
 0x654   : > { %v1075_v22 = vadd.f32 %v1172_v20, %v1068_v21 }
 0x656   : > { %1076 = vst.msk [vmem:[%s374_s22] sm:$0xff] %vm403_vm1, %v1075_v22 }
 0x657 PF: > { %s20_s13 = sadd.s32 1, %s1323_s13  }
 0x658   : > { %p17_p4 = scmp.ge.s32.totalorder %s20_s13, 4  }
 0x65a   :  { %19 = sbr.rel (!%p17_p4) target bundleno = 1 (0x1), region = 93 }

// kernel: transformer_forward.17
= control target key start
LH: loop header
LB: loop body
LE: loop exit
PB: predicated region body
PF: predicated region fallthrough
CT: control target
= control target key end

     0   :  { %s1361_s24 = smov 0   ;;  %s1363_s25 = smov 0   ;;  %s1529_s0 = inlined_call_operand.vmem [shape: f32[16,32], index: 0, kind: input, shape index: {}]   ;;  %s1530_s1 = inlined_call_operand.vmem [shape: bf16[32,2048], index: 1, kind: input, shape index: {}]   ;;  %s1531_s2 = inlined_call_operand.vmem [shape: f32[1,2048], index: 2, kind: input, shape index: {}]   ;;  %s1532_s3 = inlined_call_operand.vmem [shape: bf16[2048,32], index: 3, kind: input, shape index: {}]   ;;  %s1533_s4 = inlined_call_operand.vmem [shape: f32[1,32], index: 4, kind: input, shape index: {}]   ;;  %s1534_s5 = inlined_call_operand.vmem [shape: f32[1,32], index: 5, kind: input, shape index: {}]   ;;  %s1535_s6 = inlined_call_operand.vmem [shape: f32[1,32], index: 6, kind: input, shape index: {}]   ;;  %s1536_s7 = inlined_call_operand.vmem [shape: f32[16,32], index: 7, kind: output, shape index: {}]  }
   0x1   :  { %s1365_s26 = smov 0   ;;  %s1367_s27 = smov 0  }
   0x2   :  { %s1369_s28 = smov 0  }
   0x3 LB: > { %s26_s29 = sadd.s32 1, %s1314_s27  ;;  %p69_p1 = scmp.ne.s32.totalorder %s1306_s25, %s1302_s24  ;;  %s1318_s28 = sphi %s1369_s28, %s17_s28   ;;  %s1314_s27 = sphi %s1367_s27, %s1540_s27   ;;  %s1310_s26 = sphi %s1365_s26, %s1539_s26   ;;  %s1306_s25 = sphi %s1363_s25, %s1538_s25   ;;  %s1302_s24 = sphi %s1361_s24, %s1537_s24  }
   0x4   : > { %p27_p0 = scmp.ge.s32.totalorder %s26_s29, 4  ;;  %p70_p2 = scmp.eq.s32.totalorder %s1318_s28, 0 }
   0x5   : > { %s62_s8 = sadd.s32 1, %s1306_s25  ;;  %p1086_p5 = scmp.ge.s32.totalorder %s1318_s28, 4 }
   0x6   : > { %s1542_s29 = smov (%p27_p0, %s26_s29), 0  ;;  %p71_p3 = por %p70_p2, %p69_p1 }
   0x7   : > { %s59_s30 = ssub.s32 %s1314_s27, %s1542_s29  ;;  %254 = sbr.rel (%p1086_p5) target bundleno = 22 (0x16), region = 32 }
   0x8   : > { %p60_p4 = scmp.eq.s32.totalorder %s59_s30, 0 }
   0xa   : > { %s1396_s9 = scalar_select %p60_p4, %s1306_s25, %s62_s8  }
   0xe   : > { %257 = sbr.rel (!%p71_p3) target bundleno = 22 (0x16), region = 36  ;;  %s259_s10 = sand.u32 (%p71_p3), 1, %s1306_s25  }
   0xf   : > { %s1146_s11 = sshll.u32 (%p71_p3), %s1314_s27, 4  ;;  %s1087_s12 = sshll.u32 (%p71_p3), %s259_s10, 6 }
  0x10   : > { %s264_s15 = scalar_lea.vmem (%p71_p3), %s1530_s1, %s1146_s11  ;;  %s261_s16 = scalar_lea.vmem (%p71_p3), [#allocation2], %s1087_s12 }
  0x11   : > { %v277_v0 = vld [vmem:[%s264_s15] sm:$0xff] (%p71_p3)  ;;  %v279_v1 = vld [vmem:[%s264_s15 + $0x8] sm:$0xff] (%p71_p3) }
  0x12   : > { %v281_v2 = vld [vmem:[%s264_s15 + $0x40] sm:$0xff] (%p71_p3)  ;;  %278 = vst [vmem:[%s261_s16] sm:$0xff] (%p71_p3), %v277_v0  ;;  %280 = vst [vmem:[%s261_s16 + $0x8] sm:$0xff] (%p71_p3), %v279_v1  ;;  %v283_v3 = vld [vmem:[%s264_s15 + $0x48] sm:$0xff] (%p71_p3) }
  0x13   : > { %282 = vst [vmem:[%s261_s16 + $0x10] sm:$0xff] (%p71_p3), %v281_v2  ;;  %v285_v4 = vld [vmem:[%s264_s15 + $0x80] sm:$0xff] (%p71_p3)  ;;  %v287_v5 = vld [vmem:[%s264_s15 + $0x88] sm:$0xff] (%p71_p3)  ;;  %284 = vst [vmem:[%s261_s16 + $0x18] sm:$0xff] (%p71_p3), %v283_v3 }
  0x14   : > { %286 = vst [vmem:[%s261_s16 + $0x20] sm:$0xff] (%p71_p3), %v285_v4  ;;  %288 = vst [vmem:[%s261_s16 + $0x28] sm:$0xff] (%p71_p3), %v287_v5  ;;  %v289_v6 = vld [vmem:[%s264_s15 + $0xc0] sm:$0xff] (%p71_p3)  ;;  %v291_v7 = vld [vmem:[%s264_s15 + $0xc8] sm:$0xff] (%p71_p3) }
  0x15   : > { %290 = vst [vmem:[%s261_s16 + $0x30] sm:$0xff] %v289_v6  ;;  %292 = vst [vmem:[%s261_s16 + $0x38] sm:$0xff] %v291_v7 }
  0x16 PF: > { %p1090_p6 = scmp.ge.s32.totalorder %s1318_s28, 1  ;;  %p314_p7 = scmp.lt.s32.totalorder %s1318_s28, 5 }
  0x18   : > { %p315_p8 = pnand %p1090_p6, %p314_p7 }
  0x19   : > { %s321_s17 = sand.u32 (!%p315_p8), 1, %s1302_s24   ;;  %s1092_s18 = sshll.u32 (!%p315_p8), %s1310_s26, 2  ;;  %v391_v8 = vld [vmem:[%s1529_s0] sm:$0xff] (!%p315_p8)  ;;  %v392_v9 = vld [vmem:[%s1529_s0 + $0x8] sm:$0xff] (!%p315_p8) }
  0x1a   : > { %318 = sbr.rel (%p315_p8) target bundleno = 819 (0x333), region = 67  ;;  %s1091_s23 = sshll.u32 (!%p315_p8), %s321_s17, 6 }
  0x1b   : > { %p374_p9 = scmp.lt.s32.totalorder (!%p315_p8), %s1092_s18, 15  ;;  %s1093_s30 = sshll.u32 (!%p315_p8), %s1310_s26, 6 }
  0x1c   : > { %p379_p10 = scmp.lt.s32.totalorder (!%p315_p8), %s1093_s30, 255  ;;  %s323_s15 = scalar_lea.vmem (!%p315_p8), [#allocation2], %s1091_s23 }
  0x1d   : > { %p1095_p11 = scmp.ne.s32.totalorder (!%p315_p8), %s1310_s26, 0 }
  0x21   : > { %s1544_s18 = smov (!%p374_p9, %s1092_s18), 15  ;;  %s1546_s30 = smov (!%p379_p10, %s1093_s30), 255 }
  0x22   : > { %s376_s24 = scalar_lea.vmem %s1531_s2, %s1544_s18  ;;  %s1094_s11 = sshll.u32 %s1546_s30, 2  ;;  %v1096_v10 = vld [vmem:[%s1533_s4] ss:$0 sm:$0xff] (!%p1095_p11)  ;;  %vm406_vm0 = vcmask (!%p1095_p11), 261120  }
  0x23   : > { %s1424_s14 = scalar_lea.vmem %s1532_s3, %s1094_s11  ;;  %396 = sbr.rel (%p1095_p11) target bundleno = 42 (0x2a), region = 75  ;;  %v404_v11 = vadd.f32 (!%p1095_p11), %v1096_v10, %v391_v8  ;;  %v405_v12 = vadd.f32 (!%p1095_p11), %v1096_v10, %v392_v9 }
  0x25   : > { %407 = vst.msk [vmem:[%s1536_s7] sm:$0xff] (!%p1095_p11), %vm406_vm0, %v404_v11  ;;  %408 = vst.msk [vmem:[%s1536_s7 + $0x8] sm:$0xff] (!%p1095_p11), %vm406_vm0, %v405_v12 }
  0x2a PF: > { %v1232_v13 = vld [vmem:[%s323_s15 + $0x4] ss:$16 sps:$4 sm:$0xff]   ;;  %v1234_v14 = vld [vmem:[%s323_s15 + $0xc] ss:$16 sps:$4 sm:$0xff]   ;;  %v1320_v15 = vmov 0   ;;  %v409_v23 = vpack.c.bf16 %v392_v9, %v391_v8  ;;  %vm480_vm1 = vcmask 261120   ;;  %v420_v55 = vlaneseq }
  0x2b   : > { %516 = vmatprep.mubr.bf16.mxu0 %v1320_v15  ;;  %559 = vmatprep.mubr.bf16.mxu1 %v1320_v15  ;;  %v1236_v16 = vld [vmem:[%s323_s15] ss:$16 sps:$4 sm:$0xff]   ;;  %v1237_v17 = vld [vmem:[%s323_s15 + $0x8] ss:$16 sps:$4 sm:$0xff]   ;;  %v1238_v18 = vld [vmem:[%s323_s15 + $0x24] ss:$16 sps:$4 sm:$0xff]  }
  0x2c   : > { %484 = vmatprep.subr.bf16.mxu0 %v1232_v13  ;;  %527 = vmatprep.subr.bf16.mxu1 %v1234_v14  ;;  %v1240_v19 = vld [vmem:[%s323_s15 + $0x2c] ss:$16 sps:$4 sm:$0xff]   ;;  %v1242_v20 = vld [vmem:[%s323_s15 + $0x20] ss:$16 sps:$4 sm:$0xff]   ;;  %v1243_v21 = vld [vmem:[%s323_s15 + $0x28] ss:$16 sps:$4 sm:$0xff]  }
  0x2d   : > { %485 = vmatpush1.bf16.msra.mxu0 %v1236_v16  ;;  %528 = vmatpush1.bf16.msra.mxu1 %v1237_v17  ;;  %v1244_v22 = vld [vmem:[%s1424_s14 + $0x40] sm:$0xff]   ;;  %v1248_v27 = vld [vmem:[%s1424_s14 + $0x48] sm:$0xff]   ;;  %v1252_v31 = vld [vmem:[%s1424_s14 + $0x50] sm:$0xff]   ;;  %v421_v56 = vshrl.u32 %v420_v55, 7  ;;  %p1139_p12 = scmp.ne.s32.totalorder %s1310_s26, 3 }
  0x2e   : > { %486 = vmatprep.subr.bf16.mxu0 %v1238_v18  ;;  %529 = vmatprep.subr.bf16.mxu1 %v1240_v19  ;;  %v1245_v24 = vld [vmem:[%s1424_s14 + $0xc0] sm:$0xff]   ;;  %v1249_v28 = vld [vmem:[%s1424_s14 + $0xc8] sm:$0xff]   ;;  %v1253_v32 = vld [vmem:[%s1424_s14 + $0xd0] sm:$0xff]  }
  0x2f   : > { %v1246_v25 = vld [vmem:[%s1424_s14] sm:$0xff]   ;;  %v1250_v29 = vld [vmem:[%s1424_s14 + $0x8] sm:$0xff]   ;;  %v1254_v33 = vld [vmem:[%s1424_s14 + $0x10] sm:$0xff]   ;;  %v422_v57 = vsub.s32 0, %v421_v56  ;;  %v430_v58 = vsub.s32 2, %v421_v56  ;;  %v426_v60 = vsub.s32 1, %v421_v56 }
  0x30   : > { %v1247_v26 = vld [vmem:[%s1424_s14 + $0x80] sm:$0xff]   ;;  %v1251_v30 = vld [vmem:[%s1424_s14 + $0x88] sm:$0xff]   ;;  %v1255_v34 = vld [vmem:[%s1424_s14 + $0x90] sm:$0xff]   ;;  %v434_v61 = vsub.s32 3, %v421_v56 }
  0x31   : > { %487 = vmatpush1.bf16.msra.mxu0 %v1242_v20  ;;  %530 = vmatpush1.bf16.msra.mxu1 %v1243_v21  ;;  %v1256_v35 = vld [vmem:[%s1424_s14 + $0x58] sm:$0xff]   ;;  %v1260_v39 = vld [vmem:[%s1424_s14 + $0x60] sm:$0xff]   ;;  %v1264_v43 = vld [vmem:[%s1424_s14 + $0x68] sm:$0xff]  }
  0x32   : > { %1147 = vmatprep.subr.bf16.mxu0 %v1244_v22  ;;  %1169 = vmatprep.subr.bf16.mxu1 %v1245_v24  ;;  %v1257_v36 = vld [vmem:[%s1424_s14 + $0xd8] sm:$0xff]   ;;  %v1261_v40 = vld [vmem:[%s1424_s14 + $0xe0] sm:$0xff]   ;;  %v1265_v44 = vld [vmem:[%s1424_s14 + $0xe8] sm:$0xff]  }
  0x33   : > { %v1258_v37 = vld [vmem:[%s1424_s14 + $0x18] sm:$0xff]   ;;  %v1262_v41 = vld [vmem:[%s1424_s14 + $0x20] sm:$0xff]   ;;  %v1266_v45 = vld [vmem:[%s1424_s14 + $0x28] sm:$0xff]  }
  0x34   : > { %1105 = vmatmul.mubr.msk.bf16.vlgmr.msra.gmra.mrb[0].mxu0 %vm480_vm1, %v409_v23  ;;  %1106 = vmatmul.mubr.msk.bf16.vlgmr.msra.gmra.mrb[0].mxu1 %vm480_vm1, %v409_v23  ;;  %v1259_v38 = vld [vmem:[%s1424_s14 + $0x98] sm:$0xff]   ;;  %v1263_v42 = vld [vmem:[%s1424_s14 + $0xa0] sm:$0xff]   ;;  %v1267_v46 = vld [vmem:[%s1424_s14 + $0xa8] sm:$0xff]  }
  0x35   : > { %1148 = vmatpush3.bf16.msra.mxu0 %v1246_v25  ;;  %1170 = vmatpush3.bf16.msra.mxu1 %v1247_v26  ;;  %v1268_v47 = vld [vmem:[%s1424_s14 + $0x70] sm:$0xff]   ;;  %v1272_v51 = vld [vmem:[%s1424_s14 + $0x78] sm:$0xff]   ;;  %v418_v59 = vld [vmem:[%s376_s24] sm:$0xf] }
  0x36   : > { %1149 = vmatprep.subr.bf16.mxu0 %v1248_v27  ;;  %1171 = vmatprep.subr.bf16.mxu1 %v1249_v28  ;;  %v1269_v48 = vld [vmem:[%s1424_s14 + $0xf0] sm:$0xff]   ;;  %v1273_v52 = vld [vmem:[%s1424_s14 + $0xf8] sm:$0xff]   ;;  %v423_v62 = vrot.slane %v418_v59, %v422_v57  ;;  %v431_v63 = vrot.slane %v418_v59, %v430_v58  ;;  %v427_v0 = vrot.slane %v418_v59, %v426_v60 }
  0x37   : > { %v1270_v49 = vld [vmem:[%s1424_s14 + $0x30] sm:$0xff]   ;;  %v1274_v53 = vld [vmem:[%s1424_s14 + $0x38] sm:$0xff]   ;;  %v435_v1 = vrot.slane %v418_v59, %v434_v61 }
  0x38   : > { %v1271_v50 = vld [vmem:[%s1424_s14 + $0xb0] sm:$0xff]   ;;  %v1275_v54 = vld [vmem:[%s1424_s14 + $0xb8] sm:$0xff]  }
  0x39   : > { %1150 = vmatpush3.bf16.msra.mxu0 %v1250_v29  ;;  %1172 = vmatpush3.bf16.msra.mxu1 %v1251_v30 }
  0x3a   : > { %1151 = vmatprep.subr.bf16.mxu0 %v1252_v31  ;;  %1173 = vmatprep.subr.bf16.mxu1 %v1253_v32 }
  0x3d   : > { %1152 = vmatpush3.bf16.msra.mxu0 %v1254_v33  ;;  %1174 = vmatpush3.bf16.msra.mxu1 %v1255_v34 }
  0x3e   : > { %1153 = vmatprep.subr.bf16.mxu0 %v1256_v35  ;;  %1175 = vmatprep.subr.bf16.mxu1 %v1257_v36 }
  0x41   : > { %1154 = vmatpush3.bf16.msra.mxu0 %v1258_v37  ;;  %1176 = vmatpush3.bf16.msra.mxu1 %v1259_v38  ;;  %v578_v38 = vld [vmem:[%s1536_s7] sm:$0xff] }
  0x42   : > { %1155 = vmatprep.subr.bf16.mxu0 %v1260_v39  ;;  %1177 = vmatprep.subr.bf16.mxu1 %v1261_v40 }
  0x45   : > { %1156 = vmatpush3.bf16.msra.mxu0 %v1262_v41  ;;  %1178 = vmatpush3.bf16.msra.mxu1 %v1263_v42 }
  0x46   : > { %1157 = vmatprep.subr.bf16.mxu0 %v1264_v43  ;;  %1179 = vmatprep.subr.bf16.mxu1 %v1265_v44  ;;  %v579_v44 = vld [vmem:[%s1536_s7 + $0x8] sm:$0xff] }
  0x49   : > { %1158 = vmatpush3.bf16.msra.mxu0 %v1266_v45  ;;  %1180 = vmatpush3.bf16.msra.mxu1 %v1267_v46 }
  0x4a   : > { %1159 = vmatprep.subr.bf16.mxu0 %v1268_v47  ;;  %1181 = vmatprep.subr.bf16.mxu1 %v1269_v48 }
  0x4d   : > { %1160 = vmatpush3.bf16.msra.mxu0 %v1270_v49  ;;  %1182 = vmatpush3.bf16.msra.mxu1 %v1271_v50 }
  0x4e   : > { %1161 = vmatprep.subr.bf16.mxu0 %v1272_v51  ;;  %1183 = vmatprep.subr.bf16.mxu1 %v1273_v52 }
  0x51   : > { %1162 = vmatpush3.bf16.msra.mxu0 %v1274_v53  ;;  %1184 = vmatpush3.bf16.msra.mxu1 %v1275_v54 }
 0x107   : > { %v518_v2 = vpop.f32.mrb[0].mxu0  ;;  %v561_v3 = vpop.f32.mrb[0].mxu1 }
 0x108   : > { %v519_v4 = vadd.f32 %v518_v2, %v423_v62  ;;  %v562_v5 = vadd.f32 %v561_v3, %v431_v63  ;;  %v520_v6 = vpop.f32.mrb[1].mxu0  ;;  %v563_v7 = vpop.f32.mrb[1].mxu1 }
 0x109   : > { %v521_v8 = vadd.f32 %v520_v6, %v427_v0  ;;  %v564_v9 = vadd.f32 %v563_v7, %v435_v1  ;;  %v522_v10 = vpop.f32.mrb[2].mxu0  ;;  %v565_v11 = vpop.f32.mrb[2].mxu1  ;;  %v1141_v7 = vld [vmem:[%s1535_s6] ss:$0 sm:$0xff] (!%p1139_p12) }
 0x10a   : > { %v523_v12 = vadd.f32 %v522_v10, %v423_v62  ;;  %v566_v13 = vadd.f32 %v565_v11, %v431_v63  ;;  %v524_v14 = vpop.f32.mrb[3].mxu0  ;;  %v567_v15 = vpop.f32.mrb[3].mxu1  ;;  %v570_v18 = vmax.f32 %v519_v4, 0.0  ;;  %v572_v19 = vmax.f32 %v562_v5, 0.0  ;;  %v1140_v5 = vld [vmem:[%s1534_s5] ss:$0 sm:$0xff] (!%p1139_p12) }
 0x10b   : > { %v525_v16 = vadd.f32 %v524_v14, %v427_v0  ;;  %v568_v17 = vadd.f32 %v567_v15, %v435_v1  ;;  %v571_v22 = vmax.f32 %v521_v8, 0.0  ;;  %v573_v23 = vmax.f32 %v564_v9, 0.0 }
 0x10c   : > { %v574_v20 = vmax.f32 %v523_v12, 0.0  ;;  %v576_v21 = vmax.f32 %v566_v13, 0.0 }
 0x10d   : > { %v575_v24 = vmax.f32 %v525_v16, 0.0  ;;  %v577_v25 = vmax.f32 %v568_v17, 0.0 }
 0x10e   : > { %v580_v26 = vpack.c.bf16 %v574_v20, %v570_v18  ;;  %v582_v27 = vpack.c.bf16 %v576_v21, %v572_v19 }
 0x10f   : > { %v581_v28 = vpack.c.bf16 %v575_v24, %v571_v22  ;;  %v583_v29 = vpack.c.bf16 %v577_v25, %v573_v23 }
 0x111   : > { %872 = vmatprep.mubr.bf16.mxu0 %v581_v28  ;;  %913 = vmatprep.mubr.bf16.mxu1 %v583_v29 }
 0x112   : > { %873 = vmatmul.mubr.bf16.vlgmr.msra.gmra.mrb[4].mxu0 %v580_v26  ;;  %914 = vmatmul.mubr.bf16.vlgmr.msra.gmra.mrb[4].mxu1 %v582_v27 }
 0x1e5   : > { %v1163_v30 = vpop.f32.mrb[4].mxu0  ;;  %v1185_v31 = vpop.f32.mrb[4].mxu1 }
 0x1e6   : > { %v1164_v32 = vpop.f32.mrb[5].mxu0  ;;  %v1186_v33 = vpop.f32.mrb[5].mxu1 }
 0x1e7   : > { %v1165_v34 = vadd.f32 %v1164_v32, %v1163_v30  ;;  %v1187_v35 = vadd.f32 %v1186_v33, %v1185_v31  ;;  %v1166_v36 = vpop.f32.mrb[6].mxu0  ;;  %v1188_v37 = vpop.f32.mrb[6].mxu1 }
 0x1e8   : > { %v1167_v39 = vpop.f32.mrb[7].mxu0  ;;  %v1189_v40 = vpop.f32.mrb[7].mxu1 }
 0x1e9   : > { %v916_v41 = vadd.f32 %v1187_v35, %v1165_v34  ;;  %v1168_v42 = vadd.f32 %v1167_v39, %v1166_v36  ;;  %v1190_v43 = vadd.f32 %v1189_v40, %v1188_v37  ;;  %929 = sbr.rel (%p1139_p12) target bundleno = 819 (0x333), region = 79 }
 0x1eb   : > { %v922_v45 = vadd.f32 %v916_v41, %v578_v38  ;;  %v919_v46 = vadd.f32 %v1190_v43, %v1168_v42 }
 0x1ed   : > { %924 = vst.msk [vmem:[%s1536_s7] sm:$0xff] %vm480_vm1, %v922_v45  ;;  %v923_v47 = vadd.f32 %v919_v46, %v579_v44 }
 0x1ef   : > { %925 = vst.msk [vmem:[%s1536_s7 + $0x8] sm:$0xff] %vm480_vm1, %v923_v47 }
 0x1f4   : > { %v930_v48 = vld [vmem:[%s1536_s7] sm:$0xff] }
 0x1f5   : > { %v934_v50 = vsel %vm480_vm1, %v930_v48, 0.0 }
 0x1f6   : > { %v931_v49 = vld [vmem:[%s1536_s7 + $0x8] sm:$0xff]  ;;  %935 = vadd.xlane.f32.xlu0 %v934_v50 }
 0x1f7   : > { %v937_v51 = vsel %vm480_vm1, %v931_v49, 0.0 }
 0x1fa   : > { %938 = vadd.xlane.f32.xlu0 %v937_v51 }
 0x283   : > { %v936_v52 = vpop.xlane.xlu0 %935 }
 0x284   : > { %v941_v53 = vmul.f32 0.03125, %v936_v52 }
 0x286   : > { %v943_v54 = vsub.f32 %v930_v48, %v941_v53 }
 0x287   : > { %v939_v55 = vpop.xlane.xlu0 %938 }
 0x288   : > { %v942_v56 = vmul.f32 0.03125, %v939_v55  ;;  %v945_v57 = vmul.f32 %v943_v54, %v943_v54 }
 0x28a   : > { %v944_v58 = vsub.f32 %v931_v49, %v942_v56  ;;  %v947_v59 = vsel %vm480_vm1, %v945_v57, 0.0 }
 0x28b   : > { %948 = vadd.xlane.f32.xlu1 %v947_v59 }
 0x28c   : > { %v946_v60 = vmul.f32 %v944_v58, %v944_v58 }
 0x28e   : > { %v950_v61 = vsel %vm480_vm1, %v946_v60, 0.0 }
 0x28f   : > { %951 = vadd.xlane.f32.xlu1 %v950_v61 }
 0x318   : > { %v949_v62 = vpop.xlane.xlu1 %948 }
 0x319   : > { %v953_v63 = vmul.f32 0.03125, %v949_v62 }
 0x31b   : > { %v955_v0 = vadd.f32 1e-05, %v953_v63 }
 0x31c   : > { %v952_v1 = vpop.xlane.xlu1 %951 }
 0x31d   : > { %1276 = vrsqrt.f32 %v955_v0  ;;  %v954_v2 = vmul.f32 0.03125, %v952_v1 }
 0x31f   : > { %v956_v3 = vadd.f32 1e-05, %v954_v2 }
 0x321   : > { %1278 = vrsqrt.f32 %v956_v3 }
 0x327   : > { %v1277_v4 = vpop.eup %1276 }
 0x328   : > { %v959_v6 = vmul.f32 %v1277_v4, %v943_v54 }
 0x32a   : > { %v967_v8 = vmul.f32 %v1140_v5, %v959_v6 }
 0x32b   : > { %v1279_v9 = vpop.eup %1278 }
 0x32c   : > { %v975_v10 = vadd.f32 %v1141_v7, %v967_v8  ;;  %v960_v11 = vmul.f32 %v1279_v9, %v944_v58 }
 0x32e   : > { %977 = vst.msk [vmem:[%s1536_s7] sm:$0xff] %vm480_vm1, %v975_v10  ;;  %v968_v12 = vmul.f32 %v1140_v5, %v960_v11 }
 0x330   : > { %v976_v13 = vadd.f32 %v1141_v7, %v968_v12 }
 0x332   : > { %978 = vst.msk [vmem:[%s1536_s7 + $0x8] sm:$0xff] %vm480_vm1, %v976_v13 }
 0x333 PF: > { %s17_s28 = sadd.s32 1, %s1318_s28   ;;  %s1537_s24 = smov %s1306_s25 }
 0x334   : > { %p14_p13 = scmp.ge.s32.totalorder %s17_s28, 6   ;;  %s1538_s25 = smov %s1396_s9 }
 0x335   : > { %s1539_s26 = smov %s1314_s27  ;;  %s1540_s27 = smov %s1542_s29 }
 0x336   :  { %16 = sbr.rel (!%p14_p13) target bundleno = 3 (0x3), region = 123 }

// kernel: transformer_forward.15
= control target key start
LH: loop header
LB: loop body
LE: loop exit
PB: predicated region body
PF: predicated region fallthrough
CT: control target
= control target key end

     0   :  { %s1264_s27 = smov 0   ;;  %s1393_s0 = inlined_call_operand.vmem [shape: f32[2,8,32], index: 0, kind: input, shape index: {}]   ;;  %s1394_s1 = inlined_call_operand.vmem [shape: f32[2,1,8], index: 1, kind: input, shape index: {}]   ;;  %s1395_s2 = inlined_call_operand.vmem [shape: bf16[32,96], index: 2, kind: input, shape index: {}]   ;;  %s1396_s3 = inlined_call_operand.vmem [shape: f32[1,96], index: 3, kind: input, shape index: {}]   ;;  %s1397_s4 = inlined_call_operand.vmem [shape: bf16[32,32], index: 4, kind: input, shape index: {}]   ;;  %s1398_s5 = inlined_call_operand.vmem [shape: f32[1,32], index: 5, kind: input, shape index: {}]   ;;  %s1399_s6 = inlined_call_operand.vmem [shape: f32[1,32], index: 6, kind: input, shape index: {}]   ;;  %s1400_s7 = inlined_call_operand.vmem [shape: f32[1,32], index: 7, kind: input, shape index: {}]   ;;  %s1401_s8 = inlined_call_operand.vmem [shape: f32[2,8,32], index: 8, kind: output, shape index: {}]  }
   0x1 LB: > { %s1033_s28 = sadd.s32 4294967295, %s1200_s27   ;;  %p1037_p0 = scmp.ge.s32.totalorder %s1200_s27, 1  ;;  %s1200_s27 = sphi %s1264_s27, %s18_s27  }
   0x2   : > { %p269_p1 = scmp.lt.s32.totalorder %s1200_s27, 3 }
   0x4   : > { %p270_p2 = pnand %p1037_p0, %p269_p1 }
   0x5   : > { %v1172_v0 = vld [vmem:[%s1395_s2] sm:$0xff] (!%p270_p2)   ;;  %v1202_v1 = vmov (!%p270_p2), 0.0   ;;  %v1173_v2 = vld [vmem:[%s1395_s2 + $0x8] sm:$0xff] (!%p270_p2)   ;;  %vm1203_vm0 = vmmov (!%p270_p2), 0   ;;  %p304_p3 = scmp.lt.s32.totalorder (!%p270_p2), %s1033_s28, 1  ;;  %vm341_vm1 = vcmask (!%p270_p2), 261120   ;;  %v387_v25 = vlaneseq (!%p270_p2) }
   0x6   : > { %273 = sbr.rel (%p270_p2) target bundleno = 1656 (0x678), region = 52  ;;  %1083 = vmatprep.subr.bf16.mxu0 (!%p270_p2), %v1202_v1  ;;  %1091 = vmatprep.subr.bf16.mxu1 (!%p270_p2), %v1202_v1  ;;  %v1040_v5 = vld [vmem:[%s1396_s3] ss:$0 sm:$0xff] (!%p270_p2)  ;;  %s1204_s17 = smov (!%p270_p2), 96   ;;  %vm405_vm2 = vcmask (!%p270_p2), 64512   ;;  %v1211_v29 = vmov (!%p270_p2), -inf  }
   0x7   : > { %1084 = vmatpush3.bf16.msra.mxu0 (!%p270_p2), %v1172_v0  ;;  %1087 = vmatprep.mubr.msk.bf16.mxu0 (!%p270_p2), %vm1203_vm0, %v1202_v1  ;;  %s1205_s18 = smov (!%p270_p2), 120   ;;  %s1206_s19 = smov (!%p270_p2), 88   ;;  %v388_v26 = vshrl.u32 (!%p270_p2), %v387_v25, 7  ;;  %v390_v27 = vand.u32 (!%p270_p2), 127, %v387_v25  ;;  %vm470_vm4 = vcmask (!%p270_p2), 1043456   ;;  %vm633_vm5 = vcmask (!%p270_p2), 130112  }
   0x8   : > { %1085 = vmatprep.subr.bf16.mxu0 (!%p270_p2), %v1202_v1  ;;  %1093 = vmatprep.mubr.msk.bf16.mxu1 (!%p270_p2), %vm1203_vm0, %v1202_v1  ;;  %s1207_s20 = smov (!%p270_p2), 80   ;;  %s1208_s21 = smov (!%p270_p2), 112   ;;  %vm751_vm6 = vcmask (!%p270_p2), 195712   ;;  %vm869_vm7 = vcmask (!%p270_p2), 261312  }
   0x9   : > { %s1209_s22 = smov (!%p270_p2), 72   ;;  %s1210_s23 = smov (!%p270_p2), 104   ;;  %vm391_vm3 = vcmp.ge.s32.totalorder (!%p270_p2), %v388_v26, %v390_v27 }
   0xa   : > { %v392_v30 = vsel (!%p270_p2), %vm391_vm3, 0.0, %v1211_v29  ;;  %s1212_s29 = smov (!%p270_p2), 56   ;;  %s1213_s30 = smov (!%p270_p2), 64  }
   0xb   : > { %1086 = vmatpush3.bf16.msra.mxu0 (!%p270_p2), %v1173_v2  ;;  %s1214_s9 = smov (!%p270_p2), 40   ;;  %s1215_s10 = smov (!%p270_p2), 48  }
   0xc   : > { %1097 = vmatprep.subr.bf16.mxu0 (!%p270_p2), %v1202_v1  ;;  %s1216_s12 = smov (!%p270_p2), 8   ;;  %s1217_s15 = smov (!%p270_p2), 16  }
   0xd   : > { %s1403_s28 = smov (!%p304_p3, %s1033_s28), 1 }
   0xe   : > { %s1038_s11 = sshll.u32 %s1403_s28, 3  ;;  %s310_s26 = scalar_lea.vmem %s1394_s1, %s1403_s28 }
   0xf   : > { %s307_s14 = scalar_lea.vmem %s1393_s0, %s1038_s11  ;;  %v1044_v28 = vld [vmem:[%s310_s26] ss:$0 sm:$0xff] }
  0x10   : > { %v1294_v3 = vld [vmem:[%s307_s14] sm:$0xff]  ;;  %v399_v31 = vadd.f32 %v1044_v28, %v392_v30 }
  0x11   : > { %v317_v4 = vpack.c.bf16 %v1294_v3, %v1294_v3 }
  0x13   : > { %1088 = vmatmul.mubr.msk.bf16.vlgmr.msra.gmra.mrb[0].mxu0 %vm341_vm1, %v317_v4 }
  0x14   : > { %1099 = vmatprep.mubr.msk.bf16.mxu0 %vm1203_vm0, %v1202_v1 }
  0xe6   : > { %v379_v6 = vpop.f32.mrb[0].mxu0 }
  0xe7   : > { %v380_v7 = vadd.f32 %v1040_v5, %v379_v6  ;;  %v1089_v8 = vpop.f32.mrb[1].mxu0 }
  0xe8   : > { %v382_v9 = vpop.f32.mrb[2].mxu0 }
  0xe9   : > { %v385_v10 = vmul.f32 0.35355338, %v380_v7  ;;  %v1304_v11 = vpack.c.bf16 %v380_v7, %v380_v7  ;;  %v1090_v12 = vpop.f32.mrb[3].mxu0 }
  0xeb   : > { %v400_v13 = vpack.c.bf16 %v385_v10, %v385_v10  ;;  %403 = vrot.lane.b32.xlu0 %v1304_v11, %s1204_s17 }
  0xed   : > { %517 = vrot.lane.b32.xlu1 %v400_v13, %s1205_s18  ;;  %s1218_s18 = smov 24  }
  0xef   : > { %519 = vrot.lane.b32.xlu0 %v1304_v11, %s1206_s19 }
  0xf1   : > { %637 = vrot.lane.b32.xlu1 %v1304_v11, %s1207_s20 }
  0xf3   : > { %635 = vrot.lane.b32.xlu0 %v400_v13, %s1208_s21 }
  0xf5   : > { %755 = vrot.lane.b32.xlu1 %v1304_v11, %s1209_s22 }
  0xf7   : > { %753 = vrot.lane.b32.xlu0 %v400_v13, %s1210_s23 }
 0x15d   : > { %v404_v14 = vpop.permute.xlu0 %403 }
 0x15e   : > { %v410_v15 = vsel %vm405_vm2, %v404_v14, 0 }
 0x15f   : > { %1092 = vmatpush3.bf16.xpose.msra.mxu1 %v410_v15  ;;  %v518_v17 = vpop.permute.xlu1 %517 }
 0x160   : > { %1103 = vmatprep.subr.bf16.mxu1 %v1202_v1 }
 0x161   : > { %v520_v16 = vpop.permute.xlu0 %519 }
 0x162   : > { %v525_v18 = vsel %vm405_vm2, %v520_v16, 0 }
 0x163   : > { %v638_v19 = vpop.permute.xlu1 %637 }
 0x164   : > { %v643_v20 = vsel %vm405_vm2, %v638_v19, 0 }
 0x165   : > { %v636_v22 = vpop.permute.xlu0 %635 }
 0x166   : > { %1094 = vmatmul.mubr.msk.bf16.vlgmr.msra.gmra.mrb[0].mxu1 %vm405_vm2, %v400_v13 }
 0x167   : > { %1104 = vmatpush3.bf16.xpose.msra.mxu1 %v525_v18  ;;  %1105 = vmatprep.mubr.msk.bf16.mxu1 %vm1203_vm0, %v1202_v1  ;;  %v756_v21 = vpop.permute.xlu1 %755 }
 0x168   : > { %1115 = vmatprep.subr.bf16.mxu1 %v1202_v1  ;;  %v761_v23 = vsel %vm405_vm2, %v756_v21, 0 }
 0x169   : > { %v754_v24 = vpop.permute.xlu0 %753 }
 0x16e   : > { %1106 = vmatmul.mubr.msk.bf16.vlgmr.msra.gmra.mrb[4].mxu1 %vm405_vm2, %v518_v17 }
 0x16f   : > { %1116 = vmatpush3.bf16.xpose.msra.mxu1 %v643_v20  ;;  %1117 = vmatprep.mubr.msk.bf16.mxu1 %vm1203_vm0, %v1202_v1 }
 0x170   : > { %1127 = vmatprep.subr.bf16.mxu1 %v1202_v1 }
 0x176   : > { %1118 = vmatmul.mubr.msk.bf16.vlgmr.msra.gmra.mrb[8].mxu1 %vm405_vm2, %v636_v22 }
 0x177   : > { %1128 = vmatpush3.bf16.xpose.msra.mxu1 %v761_v23  ;;  %1129 = vmatprep.mubr.msk.bf16.mxu1 %vm1203_vm0, %v1202_v1 }
 0x178   : > { %1139 = vmatprep.subr.bf16.mxu1 %v1202_v1 }
 0x17e   : > { %1130 = vmatmul.mubr.msk.bf16.vlgmr.msra.gmra.mrb[12].mxu1 %vm405_vm2, %v754_v24 }
 0x17f   : > { %1143 = vmatprep.mubr.msk.bf16.mxu1 %vm1203_vm0, %v1202_v1 }
 0x239   : > { %v446_v32 = vpop.f32.mrb[0].mxu1 }
 0x23a   : > { %v447_v33 = vadd.f32 %v446_v32, %v399_v31  ;;  %v1095_v34 = vpop.f32.mrb[1].mxu1 }
 0x23b   : > { %v449_v35 = vpop.f32.mrb[2].mxu1 }
 0x23c   : > { %v1096_v36 = vpop.f32.mrb[3].mxu1  ;;  %v452_v37 = vsel %vm405_vm2, %v447_v33, -inf }
 0x23d   : > { %453 = vmax.xlane.f32.xlu1 %v452_v37 }
 0x241   : > { %v561_v38 = vpop.f32.mrb[4].mxu1 }
 0x242   : > { %v562_v39 = vadd.f32 %v561_v38, %v399_v31  ;;  %v1107_v40 = vpop.f32.mrb[5].mxu1 }
 0x243   : > { %v564_v41 = vpop.f32.mrb[6].mxu1 }
 0x244   : > { %v1108_v42 = vpop.f32.mrb[7].mxu1  ;;  %v567_v43 = vsel %vm405_vm2, %v562_v39, -inf }
 0x245   : > { %568 = vmax.xlane.f32.xlu0 %v567_v43 }
 0x249   : > { %v679_v44 = vpop.f32.mrb[8].mxu1 }
 0x24a   : > { %v680_v45 = vadd.f32 %v679_v44, %v399_v31  ;;  %v1119_v46 = vpop.f32.mrb[9].mxu1 }
 0x24b   : > { %v682_v47 = vpop.f32.mrb[10].mxu1 }
 0x24c   : > { %v1120_v48 = vpop.f32.mrb[11].mxu1  ;;  %v685_v49 = vsel %vm405_vm2, %v680_v45, -inf }
 0x24d   : > { %686 = vmax.xlane.f32.xlu0 %v685_v49 }
 0x24e   : > { %580 = vrot.lane.b32.xlu1 %v1304_v11, %s1212_s29  ;;  %s314_s29 = scalar_lea.vmem %s1401_s8, %s1038_s11 }
 0x251   : > { %v797_v50 = vpop.f32.mrb[12].mxu1 }
 0x252   : > { %v1131_v51 = vpop.f32.mrb[13].mxu1  ;;  %v798_v54 = vadd.f32 %v797_v50, %v399_v31 }
 0x253   : > { %v800_v52 = vpop.f32.mrb[14].mxu1 }
 0x254   : > { %v1132_v53 = vpop.f32.mrb[15].mxu1  ;;  %v803_v55 = vsel %vm405_vm2, %v798_v54, -inf }
 0x263   : > { %465 = vrot.lane.b32.xlu0 %v1304_v11, %s1213_s30 }
 0x267   : > { %816 = vrot.lane.b32.xlu0 %v1304_v11, %s1214_s9 }
 0x272   : > { %804 = vmax.xlane.f32.xlu1 %v803_v55 }
 0x283   : > { %698 = vrot.lane.b32.xlu1 %v1304_v11, %s1215_s10 }
 0x2ca   : > { %v454_v56 = vpop.xlane.xlu1 %453 }
 0x2cb   : > { %v455_v57 = vmax.f32 %v454_v56, -1e+30 }
 0x2cd   : > { %v456_v58 = vsub.f32 %v447_v33, %v455_v57  ;;  %v1175_v57 = vld [vmem:[%s1397_s4 + $0x8] sm:$0xff]  }
 0x2ce   : > { %v581_v9 = vpop.permute.xlu1 %580 }
 0x2cf   : > { %v457_v59 = vmul.f32 1.442695, %v456_v58  ;;  %v586_v12 = vsel %vm470_vm4, %v581_v9, 0 }
 0x2d1   : > { %1176 = vpow2.f32 %v457_v59 }
 0x2d2   : > { %v569_v60 = vpop.xlane.xlu0 %568 }
 0x2d3   : > { %v570_v61 = vmax.f32 %v569_v60, -1e+30 }
 0x2d5   : > { %v571_v62 = vsub.f32 %v562_v39, %v570_v61 }
 0x2d7   : > { %v572_v63 = vmul.f32 1.442695, %v571_v62 }
 0x2d9   : > { %1178 = vpow2.f32 %v572_v63 }
 0x2da   : > { %v687_v0 = vpop.xlane.xlu0 %686 }
 0x2db   : > { %v688_v2 = vmax.f32 %v687_v0, -1e+30  ;;  %v1177_v5 = vpop.eup %1176 }
 0x2dc   : > { %v464_v10 = vpack.c.bf16 %v1177_v5, %v1177_v5  ;;  %v459_v14 = vsel %vm405_vm2, %v1177_v5, 0.0 }
 0x2dd   : > { %v689_v4 = vsub.f32 %v680_v45, %v688_v2 }
 0x2de   : > { %v466_v6 = vpop.permute.xlu0 %465 }
 0x2df   : > { %v690_v7 = vmul.f32 1.442695, %v689_v4  ;;  %v472_v8 = vsel %vm470_vm4, %v466_v6, 0  ;;  %v1053_v6 = vld [vmem:[%s1398_s5] ss:$0 sm:$0xff] }
 0x2e0   : > { %1098 = vmatpush3.bf16.msra.mxu0 %v472_v8 }
 0x2e1   : > { %1180 = vpow2.f32 %v690_v7  ;;  %1109 = vmatprep.subr.bf16.mxu0 %v1202_v1 }
 0x2e2   : > { %v817_v24 = vpop.permute.xlu0 %816 }
 0x2e3   : > { %v1179_v11 = vpop.eup %1178  ;;  %1100 = vmatmul.mubr.msk.bf16.vlgmr.msra.gmra.mrb[4].mxu0 %vm405_vm2, %v464_v10  ;;  %v822_v26 = vsel %vm470_vm4, %v817_v24, 0  ;;  %v1058_v24 = vld [vmem:[%s1400_s7] ss:$0 sm:$0xff] }
 0x2e4   : > { %1110 = vmatpush3.bf16.msra.mxu0 %v586_v12  ;;  %v574_v13 = vsel %vm405_vm2, %v1179_v11, 0.0  ;;  %1111 = vmatprep.mubr.msk.bf16.mxu0 %vm1203_vm0, %v1202_v1  ;;  %v579_v15 = vpack.c.bf16 %v1179_v11, %v1179_v11 }
 0x2e5   : > { %575 = vadd.xlane.f32.xlu1 %v574_v13  ;;  %1121 = vmatprep.subr.bf16.mxu0 %v1202_v1 }
 0x2e9   : > { %460 = vadd.xlane.f32.xlu1 %v459_v14 }
 0x2eb   : > { %v1181_v16 = vpop.eup %1180  ;;  %1112 = vmatmul.mubr.msk.bf16.vlgmr.msra.gmra.mrb[8].mxu0 %vm405_vm2, %v579_v15 }
 0x2ec   : > { %v692_v17 = vsel %vm405_vm2, %v1181_v16, 0.0  ;;  %1123 = vmatprep.mubr.msk.bf16.mxu0 %vm1203_vm0, %v1202_v1  ;;  %v697_v25 = vpack.c.bf16 %v1181_v16, %v1181_v16 }
 0x2ed   : > { %693 = vadd.xlane.f32.xlu0 %v692_v17 }
 0x2ff   : > { %v805_v18 = vpop.xlane.xlu1 %804 }
 0x300   : > { %v806_v19 = vmax.f32 %v805_v18, -1e+30 }
 0x302   : > { %v807_v20 = vsub.f32 %v798_v54, %v806_v19  ;;  %v1174_v54 = vld [vmem:[%s1397_s4] sm:$0xff]  }
 0x303   : > { %v699_v21 = vpop.permute.xlu1 %698  ;;  %1140 = vmatpush3.bf16.msra.mxu1 %v1174_v54 }
 0x304   : > { %v808_v22 = vmul.f32 1.442695, %v807_v20  ;;  %v704_v23 = vsel %vm470_vm4, %v699_v21, 0  ;;  %1141 = vmatprep.subr.bf16.mxu1 %v1202_v1 }
 0x305   : > { %1122 = vmatpush3.bf16.msra.mxu0 %v704_v23 }
 0x306   : > { %1182 = vpow2.f32 %v808_v22  ;;  %1133 = vmatprep.subr.bf16.mxu0 %v1202_v1 }
 0x307   : > { %1142 = vmatpush3.bf16.msra.mxu1 %v1175_v57 }
 0x308   : > { %1124 = vmatmul.mubr.msk.bf16.vlgmr.msra.gmra.mrb[12].mxu0 %vm405_vm2, %v697_v25 }
 0x309   : > { %1134 = vmatpush3.bf16.msra.mxu0 %v822_v26  ;;  %1135 = vmatprep.mubr.msk.bf16.mxu0 %vm1203_vm0, %v1202_v1 }
 0x310   : > { %v1183_v27 = vpop.eup %1182 }
 0x311   : > { %v810_v28 = vsel %vm405_vm2, %v1183_v27, 0.0  ;;  %v815_v29 = vpack.c.bf16 %v1183_v27, %v1183_v27 }
 0x312   : > { %811 = vadd.xlane.f32.xlu0 %v810_v28 }
 0x313   : > { %1136 = vmatmul.mubr.msk.bf16.vlgmr.msra.gmra.mrb[16].mxu0 %vm405_vm2, %v815_v29 }
 0x372   : > { %v576_v30 = vpop.xlane.xlu1 %575 }
 0x373   : > { %v577_v33 = vmax.f32 %v576_v30, 1e-30 }
 0x376   : > { %v461_v31 = vpop.xlane.xlu1 %460 }
 0x377   : > { %v462_v32 = vmax.f32 %v461_v31, 1e-30 }
 0x379   : > { %1184 = vrcp.f32 %v462_v32 }
 0x37a   : > { %1186 = vrcp.f32 %v577_v33  ;;  %v694_v46 = vpop.xlane.xlu0 %693 }
 0x37b   : > { %v695_v47 = vmax.f32 %v694_v46, 1e-30 }
 0x37d   : > { %1188 = vrcp.f32 %v695_v47 }
 0x383   : > { %v1185_v34 = vpop.eup %1184 }
 0x384   : > { %v1187_v40 = vpop.eup %1186 }
 0x387   : > { %v1189_v50 = vpop.eup %1188 }
 0x39f   : > { %v812_v48 = vpop.xlane.xlu0 %811 }
 0x3a0   : > { %v813_v49 = vmax.f32 %v812_v48, 1e-30 }
 0x3a2   : > { %1190 = vrcp.f32 %v813_v49 }
 0x3ac   : > { %v1191_v58 = vpop.eup %1190 }
 0x3b6   : > { %v508_v35 = vpop.f32.mrb[4].mxu0 }
 0x3b7   : > { %v514_v36 = vmul.f32 %v1185_v34, %v508_v35  ;;  %v1101_v37 = vpop.f32.mrb[5].mxu0 }
 0x3b8   : > { %v511_v38 = vpop.f32.mrb[6].mxu0 }
 0x3b9   : > { %515 = vst.msk [vmem:[#allocation2] sm:$0xff] %vm405_vm2, %v514_v36  ;;  %v1102_v39 = vpop.f32.mrb[7].mxu0 }
 0x3be   : > { %v622_v41 = vpop.f32.mrb[8].mxu0 }
 0x3bf   : > { %v628_v42 = vmul.f32 %v1187_v40, %v622_v41  ;;  %v1113_v43 = vpop.f32.mrb[9].mxu0 }
 0x3c0   : > { %v625_v44 = vpop.f32.mrb[10].mxu0 }
 0x3c1   : > { %630 = vrot.lane.b32.xlu0 %v628_v42, %s1216_s12  ;;  %v1114_v45 = vpop.f32.mrb[11].mxu0 }
 0x3db   : > { %v740_v51 = vpop.f32.mrb[12].mxu0 }
 0x3dc   : > { %v746_v52 = vmul.f32 %v1189_v50, %v740_v51  ;;  %v1125_v53 = vpop.f32.mrb[13].mxu0 }
 0x3dd   : > { %v743_v55 = vpop.f32.mrb[14].mxu0 }
 0x3de   : > { %748 = vrot.lane.b32.xlu1 %v746_v52, %s1217_s15  ;;  %v1126_v56 = vpop.f32.mrb[15].mxu0 }
 0x3e6   : > { %v858_v59 = vpop.f32.mrb[16].mxu0 }
 0x3e7   : > { %v864_v60 = vmul.f32 %v1191_v58, %v858_v59  ;;  %v1137_v61 = vpop.f32.mrb[17].mxu0 }
 0x3e8   : > { %v861_v62 = vpop.f32.mrb[18].mxu0 }
 0x3e9   : > { %866 = vrot.lane.b32.xlu1 %v864_v60, %s1218_s18  ;;  %v1138_v63 = vpop.f32.mrb[19].mxu0 }
 0x433   : > { %v631_v0 = vpop.permute.xlu0 %630 }
 0x434   : > { %634 = vst.msk [vmem:[#allocation2] sm:$0xff] %vm633_vm5, %v631_v0 }
 0x450   : > { %v749_v2 = vpop.permute.xlu1 %748 }
 0x451   : > { %752 = vst.msk [vmem:[#allocation2] sm:$0xff] %vm751_vm6, %v749_v2 }
 0x45b   : > { %v867_v4 = vpop.permute.xlu1 %866 }
 0x45c   : > { %870 = vst.msk [vmem:[#allocation2] sm:$0xff] %vm869_vm7, %v867_v4 }
 0x463   : > { %v871_v5 = vld [vmem:[#allocation2] sm:$0xff] }
 0x464   : > { %v872_v1 = vpack.c.bf16 %v871_v5, %v871_v5 }
 0x466   : > { %1144 = vmatmul.mubr.msk.bf16.vlgmr.msra.gmra.mrb[16].mxu1 %vm341_vm1, %v872_v1 }
 0x539   : > { %v933_v7 = vpop.f32.mrb[16].mxu1 }
 0x53a   : > { %v934_v8 = vadd.f32 %v1053_v6, %v933_v7  ;;  %v1145_v9 = vpop.f32.mrb[17].mxu1 }
 0x53b   : > { %v936_v10 = vpop.f32.mrb[18].mxu1 }
 0x53c   : > { %v1146_v11 = vpop.f32.mrb[19].mxu1  ;;  %v939_v12 = vadd.f32 %v934_v8, %v1294_v3  ;;  %v1057_v3 = vld [vmem:[%s1399_s6] ss:$0 sm:$0xff] }
 0x53e   : > { %v942_v13 = vsel %vm341_vm1, %v939_v12, 0.0 }
 0x53f   : > { %943 = vadd.xlane.f32.xlu0 %v942_v13 }
 0x5cc   : > { %v944_v14 = vpop.xlane.xlu0 %943 }
 0x5cd   : > { %v946_v15 = vmul.f32 0.03125, %v944_v14 }
 0x5cf   : > { %v947_v16 = vsub.f32 %v939_v12, %v946_v15 }
 0x5d1   : > { %v948_v17 = vmul.f32 %v947_v16, %v947_v16 }
 0x5d3   : > { %v949_v18 = vsel %vm341_vm1, %v948_v17, 0.0 }
 0x5d4   : > { %950 = vadd.xlane.f32.xlu1 %v949_v18 }
 0x661   : > { %v951_v19 = vpop.xlane.xlu1 %950 }
 0x662   : > { %v952_v20 = vmul.f32 0.03125, %v951_v19 }
 0x664   : > { %v953_v21 = vadd.f32 1e-05, %v952_v20 }
 0x666   : > { %1192 = vrsqrt.f32 %v953_v21 }
 0x670   : > { %v1193_v22 = vpop.eup %1192 }
 0x671   : > { %v955_v23 = vmul.f32 %v1193_v22, %v947_v16 }
 0x673   : > { %v962_v25 = vmul.f32 %v1057_v3, %v955_v23 }
 0x675   : > { %v969_v26 = vadd.f32 %v1058_v24, %v962_v25 }
 0x677   : > { %970 = vst.msk [vmem:[%s314_s29] sm:$0xff] %vm341_vm1, %v969_v26 }
 0x678 PF: > { %s18_s27 = sadd.s32 1, %s1200_s27  }
 0x679   : > { %p15_p4 = scmp.ge.s32.totalorder %s18_s27, 4  }
 0x67b   :  { %17 = sbr.rel (!%p15_p4) target bundleno = 1 (0x1), region = 85 }

</bundles_post_ra>
